<compile_context>
chip_gen: v6e
topology: v6e:2x2x1
jax: 0.10.0
libtpu: 0.0.40
codegen_flags: <defaults>
</compile_context>

<pallas_src>
import jax
import jax.numpy as jnp
from jax.experimental import pallas as pl
from jax.experimental.pallas import tpu as pltpu

IN_FEATURES = 32


def _round_up(n, m):
    return ((n + m - 1) // m) * m


def _sigmoid(z):
    # Single-transcendental sigmoid: one EUP tanh + a VPU FMA (instead of exp + divide).
    return 0.5 * jnp.tanh(0.5 * z) + 0.5


def ebm_kernel(
    xT_ref, y_ref,
    # g_1 params (weights transposed to [out, in]; final layer as a [128,1] column)
    w1t, b1, w2t, b2, w3t, b3, w4c, b4,
    # g_2 params (first layer as a [128,1] column; final layer as a [128,1] column)
    v1c, c1, v2t, c2, v3t, c3, v4c, c4,
    out_ref,
):
    f32 = jnp.float32
    bf16 = jnp.bfloat16

    # ---------------- g_1 tower (layout: [features, batch]; batch on lanes) ------
    xT = xT_ref[...].astype(bf16)                                                # [F, TB]
    h = _sigmoid(jnp.dot(w1t[...], xT, preferred_element_type=f32) + b1[...])    # [256, TB]
    h = _sigmoid(jnp.dot(w2t[...], h.astype(bf16),
                         preferred_element_type=f32) + b2[...])                  # [256, TB]
    h = _sigmoid(jnp.dot(w3t[...], h.astype(bf16),
                         preferred_element_type=f32) + b3[...])                  # [128, TB]
    # Linear(128 -> 1): VPU multiply + sublane reduction (no N=1 MXU matmul).
    x_out = jnp.sum(h * w4c[...], axis=0, keepdims=True) + b4[...]               # [1, TB]

    # ---------------- g_2 tower on y ---------------------------------------------
    y_row = y_ref[...]                                                           # [1, TB]
    # Linear(1 -> 128): K=1 matmul replaced by an outer-product broadcast (VPU).
    g = _sigmoid(v1c[...] * y_row + c1[...])                                     # [128, TB]
    g = _sigmoid(jnp.dot(v2t[...], g.astype(bf16),
                         preferred_element_type=f32) + c2[...])                  # [128, TB]
    g = _sigmoid(jnp.dot(v3t[...], g.astype(bf16),
                         preferred_element_type=f32) + c3[...])                  # [128, TB]
    yn = jnp.sum(g * v4c[...], axis=0, keepdims=True) + c4[...]                  # [1, TB]

    # ---------------- energy ------------------------------------------------------
    diff = x_out - (y_row + yn)                                                  # [1, TB]
    out_ref[...] = 0.5 * diff * diff                                             # lane-dense store


def make_params(key, in_features=IN_FEATURES):
    """Deterministic xavier-uniform weights, bias = 0.01 (matches reinitialize_weights).

    Stored as [in, out] (so the pure-JAX reference is x @ W + b)."""
    dims_g1 = [(in_features, 256), (256, 256), (256, 128), (128, 1)]
    dims_g2 = [(1, 128), (128, 128), (128, 128), (128, 1)]
    params = []
    keys = jax.random.split(key, len(dims_g1) + len(dims_g2))
    for k, (fan_in, fan_out) in zip(keys, dims_g1 + dims_g2):
        limit = jnp.sqrt(6.0 / (fan_in + fan_out))
        w = jax.random.uniform(k, (fan_in, fan_out), jnp.float32, -limit, limit)
        b = jnp.full((1, fan_out), 0.01, jnp.float32)
        params.append((w, b))
    return params  # 8 (w, b) pairs: first 4 -> g_1, last 4 -> g_2


def ebm_forward(x, y, params, *, tb=512):
    """x: [B, in_features], y: [B] -> energy [B] float32 (Pallas TPU kernel)."""
    B, F = x.shape
    tb = _round_up(tb, 128)
    TB = min(tb, _round_up(B, 128))          # batch tile (multiple of 128)
    B_pad = _round_up(B, TB)
    G = B_pad // TB
    pad = B_pad - B

    xf = x.astype(jnp.float32)
    yf = y.astype(jnp.float32)
    if pad:
        xf = jnp.pad(xf, ((0, pad), (0, 0)))
        yf = jnp.pad(yf, ((0, pad),))
    xT = xf.T                                # [F, B_pad]  (batch on lanes)
    y_row = yf.reshape(1, B_pad)             # [1, B_pad]

    (w11, b11), (w12, b12), (w13, b13), (w14, b14) = params[:4]
    (w21, b21), (w22, b22), (w23, b23), (w24, b24) = params[4:]
    bf16 = jnp.bfloat16
    col = lambda b: b.reshape(-1, 1).astype(jnp.float32)
    flat_params = [
        w11.T.astype(bf16), col(b11),                         # Lin(F, 256)
        w12.T.astype(bf16), col(b12),                         # Lin(256, 256)
        w13.T.astype(bf16), col(b13),                         # Lin(256, 128)
        w14.reshape(-1, 1).astype(jnp.float32), col(b14),     # Lin(128, 1) as column
        w21.reshape(-1, 1).astype(jnp.float32), col(b21),     # Lin(1, 128) as column
        w22.T.astype(bf16), col(b22),                         # Lin(128, 128)
        w23.T.astype(bf16), col(b23),                         # Lin(128, 128)
        w24.reshape(-1, 1).astype(jnp.float32), col(b24),     # Lin(128, 1) as column
    ]

    in_specs = [
        pl.BlockSpec((F, TB), lambda i: (0, i)),              # x tile (batch on lanes)
        pl.BlockSpec((1, TB), lambda i: (0, i)),              # y tile
    ] + [
        # Full-array blocks with a constant index_map -> weights stay resident in VMEM.
        pl.BlockSpec(p.shape, lambda i: (0, 0)) for p in flat_params
    ]
    out_spec = pl.BlockSpec((1, TB), lambda i: (0, i))        # lane-dense energy row

    energy_row = pl.pallas_call(
        ebm_kernel,
        out_shape=jax.ShapeDtypeStruct((1, B_pad), jnp.float32),
        grid=(G,),
        in_specs=in_specs,
        out_specs=out_spec,
        compiler_params=pltpu.CompilerParams(
            dimension_semantics=("parallel",)),
    )(xT, y_row, *flat_params)

    return energy_row[0, :B]


def ebm_forward_ref(x, y, params, *, bf16_matmuls=False):
    """Pure-JAX reference (eval-mode dropout = identity).

    bf16_matmuls=True mirrors the kernel's bf16 MXU operands (f32 accumulation)
    for a tight numerical comparison; False is the pure-f32 PyTorch semantics."""
    f32 = jnp.float32

    def mm(a, w):
        if bf16_matmuls:
            return jnp.dot(a.astype(jnp.bfloat16), w.astype(jnp.bfloat16),
                           preferred_element_type=f32)
        return a @ w

    (w11, b11), (w12, b12), (w13, b13), (w14, b14) = params[:4]
    (w21, b21), (w22, b22), (w23, b23), (w24, b24) = params[4:]

    h = x.astype(f32)
    h = jax.nn.sigmoid(mm(h, w11) + b11)
    h = jax.nn.sigmoid(mm(h, w12) + b12)
    h = jax.nn.sigmoid(mm(h, w13) + b13)
    x_out = (h @ w14 + b14)[:, 0]

    g = y.astype(f32)[:, None]
    g = jax.nn.sigmoid(g @ w21 + b21)          # K=1 layer stays f32 (matches kernel)
    g = jax.nn.sigmoid(mm(g, w22) + b22)
    g = jax.nn.sigmoid(mm(g, w23) + b23)
    yn = (g @ w24 + b24)[:, 0]

    y_tot = y.astype(f32) + yn
    return 0.5 * (x_out - y_tot) ** 2


def _check(x, y, params):
    energy = jax.block_until_ready(ebm_forward(x, y, params))
    assert energy.shape == (x.shape[0],)
    # Tight check vs. a reference that mirrors the kernel's bf16 MXU operands.
    ref_bf16 = ebm_forward_ref(x, y, params, bf16_matmuls=True)
    assert jnp.allclose(energy, ref_bf16, atol=5e-3, rtol=5e-3), (energy, ref_bf16)
    # Loose check vs. the pure-f32 spec (difference = bf16 matmul rounding only).
    ref_f32 = ebm_forward_ref(x, y, params, bf16_matmuls=False)
    assert jnp.allclose(energy, ref_f32, atol=5e-2, rtol=5e-2), (energy, ref_f32)


if __name__ == "__main__":
    key = jax.random.PRNGKey(0)
    k_param, k_x, k_y, k_x2, k_y2 = jax.random.split(key, 5)

    params = make_params(k_param, IN_FEATURES)

    # Small demo batch (single grid step, padded to one 128-row tile).
    B = 8
    x = jax.random.normal(k_x, (B, IN_FEATURES), jnp.float32)
    y = jax.random.normal(k_y, (B,), jnp.float32)
    _check(x, y, params)

    # Larger batch exercising padding + a multi-step pipelined grid (G > 1).
    B2 = 600
    x2 = jax.random.normal(k_x2, (B2, IN_FEATURES), jnp.float32)
    y2 = jax.random.normal(k_y2, (B2,), jnp.float32)
    _check(x2, y2, params)

    print("KERNEL_OK")
</pallas_src>

<mosaic_0001>
module attributes {stable_mosaic.version = 11 : i64} {
  func.func @ebm_kernel(%arg0: i32, %arg1: memref<32x128xf32, #tpu.memory_space<vmem>>, %arg2: memref<1x128xf32, #tpu.memory_space<vmem>>, %arg3: memref<256x32xbf16, #tpu.memory_space<vmem>>, %arg4: memref<256x1xf32, #tpu.memory_space<vmem>>, %arg5: memref<256x256xbf16, #tpu.memory_space<vmem>>, %arg6: memref<256x1xf32, #tpu.memory_space<vmem>>, %arg7: memref<128x256xbf16, #tpu.memory_space<vmem>>, %arg8: memref<128x1xf32, #tpu.memory_space<vmem>>, %arg9: memref<128x1xf32, #tpu.memory_space<vmem>>, %arg10: memref<1x1xf32, #tpu.memory_space<vmem>>, %arg11: memref<128x1xf32, #tpu.memory_space<vmem>>, %arg12: memref<128x1xf32, #tpu.memory_space<vmem>>, %arg13: memref<128x128xbf16, #tpu.memory_space<vmem>>, %arg14: memref<128x1xf32, #tpu.memory_space<vmem>>, %arg15: memref<128x128xbf16, #tpu.memory_space<vmem>>, %arg16: memref<128x1xf32, #tpu.memory_space<vmem>>, %arg17: memref<128x1xf32, #tpu.memory_space<vmem>>, %arg18: memref<1x1xf32, #tpu.memory_space<vmem>>, %arg19: memref<1x128xf32, #tpu.memory_space<vmem>>) attributes {dimension_semantics = [#tpu.dimension_semantics<parallel>], iteration_bounds = array<i64: 1>, scalar_prefetch = 0 : i64, scratch_operands = 0 : i64, tpu.core_type = #tpu.core_type<tc>, window_params = [{transform_indices = @transform_0, window_bounds = array<i64: 32, 128>}, {transform_indices = @transform_1, window_bounds = array<i64: 1, 128>}, {pipeline_mode = #tpu.pipeline_mode<synchronous>, transform_indices = @transform_2, window_bounds = array<i64: 256, 32>}, {pipeline_mode = #tpu.pipeline_mode<synchronous>, transform_indices = @transform_3, window_bounds = array<i64: 256, 1>}, {pipeline_mode = #tpu.pipeline_mode<synchronous>, transform_indices = @transform_4, window_bounds = array<i64: 256, 256>}, {pipeline_mode = #tpu.pipeline_mode<synchronous>, transform_indices = @transform_5, window_bounds = array<i64: 256, 1>}, {pipeline_mode = #tpu.pipeline_mode<synchronous>, transform_indices = @transform_6, window_bounds = array<i64: 128, 256>}, {pipeline_mode = #tpu.pipeline_mode<synchronous>, transform_indices = @transform_7, window_bounds = array<i64: 128, 1>}, {pipeline_mode = #tpu.pipeline_mode<synchronous>, transform_indices = @transform_8, window_bounds = array<i64: 128, 1>}, {pipeline_mode = #tpu.pipeline_mode<synchronous>, transform_indices = @transform_9, window_bounds = array<i64: 1, 1>}, {pipeline_mode = #tpu.pipeline_mode<synchronous>, transform_indices = @transform_10, window_bounds = array<i64: 128, 1>}, {pipeline_mode = #tpu.pipeline_mode<synchronous>, transform_indices = @transform_11, window_bounds = array<i64: 128, 1>}, {pipeline_mode = #tpu.pipeline_mode<synchronous>, transform_indices = @transform_12, window_bounds = array<i64: 128, 128>}, {pipeline_mode = #tpu.pipeline_mode<synchronous>, transform_indices = @transform_13, window_bounds = array<i64: 128, 1>}, {pipeline_mode = #tpu.pipeline_mode<synchronous>, transform_indices = @transform_14, window_bounds = array<i64: 128, 128>}, {pipeline_mode = #tpu.pipeline_mode<synchronous>, transform_indices = @transform_15, window_bounds = array<i64: 128, 1>}, {pipeline_mode = #tpu.pipeline_mode<synchronous>, transform_indices = @transform_16, window_bounds = array<i64: 128, 1>}, {pipeline_mode = #tpu.pipeline_mode<synchronous>, transform_indices = @transform_17, window_bounds = array<i64: 1, 1>}, {transform_indices = @transform_18, window_bounds = array<i64: 1, 128>}]} {
    %c0 = arith.constant 0 : index
    %c0_0 = arith.constant 0 : index
    %0 = vector.load %arg1[%c0, %c0_0] : memref<32x128xf32, #tpu.memory_space<vmem>>, vector<32x128xf32>
    %1 = arith.truncf %0 : vector<32x128xf32> to vector<32x128xbf16>
    %c0_1 = arith.constant 0 : index
    %c0_2 = arith.constant 0 : index
    %2 = vector.load %arg3[%c0_1, %c0_2] : memref<256x32xbf16, #tpu.memory_space<vmem>>, vector<256x32xbf16>
    %cst = arith.constant dense<0.000000e+00> : vector<256x128xf32>
    %3 = tpu.matmul %2, %1, %cst {dimension_numbers = #tpu.dot_dimension_numbers<[1], [0], [0], [1], [0, 0, 1, 1], [], []>} : vector<256x32xbf16>, vector<32x128xbf16>, vector<256x128xf32> -> vector<256x128xf32>
    %c0_3 = arith.constant 0 : index
    %c0_4 = arith.constant 0 : index
    %4 = vector.load %arg4[%c0_3, %c0_4] : memref<256x1xf32, #tpu.memory_space<vmem>>, vector<256x1xf32>
    %5 = vector.broadcast %4 : vector<256x1xf32> to vector<256x128xf32>
    %6 = arith.addf %3, %5 : vector<256x128xf32>
    %cst_5 = arith.constant 5.000000e-01 : f32
    %7 = vector.broadcast %cst_5 : f32 to vector<256x128xf32>
    %8 = arith.mulf %7, %6 : vector<256x128xf32>
    %9 = math.tanh %8 : vector<256x128xf32>
    %cst_6 = arith.constant 5.000000e-01 : f32
    %10 = vector.broadcast %cst_6 : f32 to vector<256x128xf32>
    %11 = arith.mulf %10, %9 : vector<256x128xf32>
    %cst_7 = arith.constant 5.000000e-01 : f32
    %12 = vector.broadcast %cst_7 : f32 to vector<256x128xf32>
    %13 = arith.addf %11, %12 : vector<256x128xf32>
    %c0_8 = arith.constant 0 : index
    %c0_9 = arith.constant 0 : index
    %14 = vector.load %arg5[%c0_8, %c0_9] : memref<256x256xbf16, #tpu.memory_space<vmem>>, vector<256x256xbf16>
    %15 = arith.truncf %13 : vector<256x128xf32> to vector<256x128xbf16>
    %cst_10 = arith.constant dense<0.000000e+00> : vector<256x128xf32>
    %16 = tpu.matmul %14, %15, %cst_10 {dimension_numbers = #tpu.dot_dimension_numbers<[1], [0], [0], [1], [0, 0, 1, 1], [], []>} : vector<256x256xbf16>, vector<256x128xbf16>, vector<256x128xf32> -> vector<256x128xf32>
    %c0_11 = arith.constant 0 : index
    %c0_12 = arith.constant 0 : index
    %17 = vector.load %arg6[%c0_11, %c0_12] : memref<256x1xf32, #tpu.memory_space<vmem>>, vector<256x1xf32>
    %18 = vector.broadcast %17 : vector<256x1xf32> to vector<256x128xf32>
    %19 = arith.addf %16, %18 : vector<256x128xf32>
    %cst_13 = arith.constant 5.000000e-01 : f32
    %20 = vector.broadcast %cst_13 : f32 to vector<256x128xf32>
    %21 = arith.mulf %20, %19 : vector<256x128xf32>
    %22 = math.tanh %21 : vector<256x128xf32>
    %cst_14 = arith.constant 5.000000e-01 : f32
    %23 = vector.broadcast %cst_14 : f32 to vector<256x128xf32>
    %24 = arith.mulf %23, %22 : vector<256x128xf32>
    %cst_15 = arith.constant 5.000000e-01 : f32
    %25 = vector.broadcast %cst_15 : f32 to vector<256x128xf32>
    %26 = arith.addf %24, %25 : vector<256x128xf32>
    %c0_16 = arith.constant 0 : index
    %c0_17 = arith.constant 0 : index
    %27 = vector.load %arg7[%c0_16, %c0_17] : memref<128x256xbf16, #tpu.memory_space<vmem>>, vector<128x256xbf16>
    %28 = arith.truncf %26 : vector<256x128xf32> to vector<256x128xbf16>
    %cst_18 = arith.constant dense<0.000000e+00> : vector<128x128xf32>
    %29 = tpu.matmul %27, %28, %cst_18 {dimension_numbers = #tpu.dot_dimension_numbers<[1], [0], [0], [1], [0, 0, 1, 1], [], []>} : vector<128x256xbf16>, vector<256x128xbf16>, vector<128x128xf32> -> vector<128x128xf32>
    %c0_19 = arith.constant 0 : index
    %c0_20 = arith.constant 0 : index
    %30 = vector.load %arg8[%c0_19, %c0_20] : memref<128x1xf32, #tpu.memory_space<vmem>>, vector<128x1xf32>
    %31 = vector.broadcast %30 : vector<128x1xf32> to vector<128x128xf32>
    %32 = arith.addf %29, %31 : vector<128x128xf32>
    %cst_21 = arith.constant 5.000000e-01 : f32
    %33 = vector.broadcast %cst_21 : f32 to vector<128x128xf32>
    %34 = arith.mulf %33, %32 : vector<128x128xf32>
    %35 = math.tanh %34 : vector<128x128xf32>
    %cst_22 = arith.constant 5.000000e-01 : f32
    %36 = vector.broadcast %cst_22 : f32 to vector<128x128xf32>
    %37 = arith.mulf %36, %35 : vector<128x128xf32>
    %cst_23 = arith.constant 5.000000e-01 : f32
    %38 = vector.broadcast %cst_23 : f32 to vector<128x128xf32>
    %39 = arith.addf %37, %38 : vector<128x128xf32>
    %c0_24 = arith.constant 0 : index
    %c0_25 = arith.constant 0 : index
    %40 = vector.load %arg9[%c0_24, %c0_25] : memref<128x1xf32, #tpu.memory_space<vmem>>, vector<128x1xf32>
    %41 = vector.broadcast %40 : vector<128x1xf32> to vector<128x128xf32>
    %42 = arith.mulf %39, %41 : vector<128x128xf32>
    %cst_26 = arith.constant dense<0.000000e+00> : vector<128xf32>
    %43 = vector.multi_reduction <add>, %42, %cst_26 [0] : vector<128x128xf32> to vector<128xf32>
    %44 = vector.shape_cast %43 : vector<128xf32> to vector<1x128xf32>
    %c0_27 = arith.constant 0 : index
    %c0_28 = arith.constant 0 : index
    %45 = vector.load %arg10[%c0_27, %c0_28] : memref<1x1xf32, #tpu.memory_space<vmem>>, vector<1x1xf32>
    %46 = vector.broadcast %45 : vector<1x1xf32> to vector<1x128xf32>
    %47 = arith.addf %44, %46 : vector<1x128xf32>
    %c0_29 = arith.constant 0 : index
    %c0_30 = arith.constant 0 : index
    %48 = vector.load %arg2[%c0_29, %c0_30] : memref<1x128xf32, #tpu.memory_space<vmem>>, vector<1x128xf32>
    %c0_31 = arith.constant 0 : index
    %c0_32 = arith.constant 0 : index
    %49 = vector.load %arg11[%c0_31, %c0_32] : memref<128x1xf32, #tpu.memory_space<vmem>>, vector<128x1xf32>
    %50 = vector.broadcast %49 : vector<128x1xf32> to vector<128x128xf32>
    %51 = vector.broadcast %48 : vector<1x128xf32> to vector<128x128xf32>
    %52 = arith.mulf %50, %51 : vector<128x128xf32>
    %c0_33 = arith.constant 0 : index
    %c0_34 = arith.constant 0 : index
    %53 = vector.load %arg12[%c0_33, %c0_34] : memref<128x1xf32, #tpu.memory_space<vmem>>, vector<128x1xf32>
    %54 = vector.broadcast %53 : vector<128x1xf32> to vector<128x128xf32>
    %55 = arith.addf %52, %54 : vector<128x128xf32>
    %cst_35 = arith.constant 5.000000e-01 : f32
    %56 = vector.broadcast %cst_35 : f32 to vector<128x128xf32>
    %57 = arith.mulf %56, %55 : vector<128x128xf32>
    %58 = math.tanh %57 : vector<128x128xf32>
    %cst_36 = arith.constant 5.000000e-01 : f32
    %59 = vector.broadcast %cst_36 : f32 to vector<128x128xf32>
    %60 = arith.mulf %59, %58 : vector<128x128xf32>
    %cst_37 = arith.constant 5.000000e-01 : f32
    %61 = vector.broadcast %cst_37 : f32 to vector<128x128xf32>
    %62 = arith.addf %60, %61 : vector<128x128xf32>
    %c0_38 = arith.constant 0 : index
    %c0_39 = arith.constant 0 : index
    %63 = vector.load %arg13[%c0_38, %c0_39] : memref<128x128xbf16, #tpu.memory_space<vmem>>, vector<128x128xbf16>
    %64 = arith.truncf %62 : vector<128x128xf32> to vector<128x128xbf16>
    %cst_40 = arith.constant dense<0.000000e+00> : vector<128x128xf32>
    %65 = tpu.matmul %63, %64, %cst_40 {dimension_numbers = #tpu.dot_dimension_numbers<[1], [0], [0], [1], [0, 0, 1, 1], [], []>} : vector<128x128xbf16>, vector<128x128xbf16>, vector<128x128xf32> -> vector<128x128xf32>
    %c0_41 = arith.constant 0 : index
    %c0_42 = arith.constant 0 : index
    %66 = vector.load %arg14[%c0_41, %c0_42] : memref<128x1xf32, #tpu.memory_space<vmem>>, vector<128x1xf32>
    %67 = vector.broadcast %66 : vector<128x1xf32> to vector<128x128xf32>
    %68 = arith.addf %65, %67 : vector<128x128xf32>
    %cst_43 = arith.constant 5.000000e-01 : f32
    %69 = vector.broadcast %cst_43 : f32 to vector<128x128xf32>
    %70 = arith.mulf %69, %68 : vector<128x128xf32>
    %71 = math.tanh %70 : vector<128x128xf32>
    %cst_44 = arith.constant 5.000000e-01 : f32
    %72 = vector.broadcast %cst_44 : f32 to vector<128x128xf32>
    %73 = arith.mulf %72, %71 : vector<128x128xf32>
    %cst_45 = arith.constant 5.000000e-01 : f32
    %74 = vector.broadcast %cst_45 : f32 to vector<128x128xf32>
    %75 = arith.addf %73, %74 : vector<128x128xf32>
    %c0_46 = arith.constant 0 : index
    %c0_47 = arith.constant 0 : index
    %76 = vector.load %arg15[%c0_46, %c0_47] : memref<128x128xbf16, #tpu.memory_space<vmem>>, vector<128x128xbf16>
    %77 = arith.truncf %75 : vector<128x128xf32> to vector<128x128xbf16>
    %cst_48 = arith.constant dense<0.000000e+00> : vector<128x128xf32>
    %78 = tpu.matmul %76, %77, %cst_48 {dimension_numbers = #tpu.dot_dimension_numbers<[1], [0], [0], [1], [0, 0, 1, 1], [], []>} : vector<128x128xbf16>, vector<128x128xbf16>, vector<128x128xf32> -> vector<128x128xf32>
    %c0_49 = arith.constant 0 : index
    %c0_50 = arith.constant 0 : index
    %79 = vector.load %arg16[%c0_49, %c0_50] : memref<128x1xf32, #tpu.memory_space<vmem>>, vector<128x1xf32>
    %80 = vector.broadcast %79 : vector<128x1xf32> to vector<128x128xf32>
    %81 = arith.addf %78, %80 : vector<128x128xf32>
    %cst_51 = arith.constant 5.000000e-01 : f32
    %82 = vector.broadcast %cst_51 : f32 to vector<128x128xf32>
    %83 = arith.mulf %82, %81 : vector<128x128xf32>
    %84 = math.tanh %83 : vector<128x128xf32>
    %cst_52 = arith.constant 5.000000e-01 : f32
    %85 = vector.broadcast %cst_52 : f32 to vector<128x128xf32>
    %86 = arith.mulf %85, %84 : vector<128x128xf32>
    %cst_53 = arith.constant 5.000000e-01 : f32
    %87 = vector.broadcast %cst_53 : f32 to vector<128x128xf32>
    %88 = arith.addf %86, %87 : vector<128x128xf32>
    %c0_54 = arith.constant 0 : index
    %c0_55 = arith.constant 0 : index
    %89 = vector.load %arg17[%c0_54, %c0_55] : memref<128x1xf32, #tpu.memory_space<vmem>>, vector<128x1xf32>
    %90 = vector.broadcast %89 : vector<128x1xf32> to vector<128x128xf32>
    %91 = arith.mulf %88, %90 : vector<128x128xf32>
    %cst_56 = arith.constant dense<0.000000e+00> : vector<128xf32>
    %92 = vector.multi_reduction <add>, %91, %cst_56 [0] : vector<128x128xf32> to vector<128xf32>
    %93 = vector.shape_cast %92 : vector<128xf32> to vector<1x128xf32>
    %c0_57 = arith.constant 0 : index
    %c0_58 = arith.constant 0 : index
    %94 = vector.load %arg18[%c0_57, %c0_58] : memref<1x1xf32, #tpu.memory_space<vmem>>, vector<1x1xf32>
    %95 = vector.broadcast %94 : vector<1x1xf32> to vector<1x128xf32>
    %96 = arith.addf %93, %95 : vector<1x128xf32>
    %97 = arith.addf %48, %96 : vector<1x128xf32>
    %98 = arith.subf %47, %97 : vector<1x128xf32>
    %cst_59 = arith.constant 5.000000e-01 : f32
    %99 = vector.broadcast %cst_59 : f32 to vector<1x128xf32>
    %100 = arith.mulf %99, %98 : vector<1x128xf32>
    %101 = arith.mulf %100, %98 : vector<1x128xf32>
    %c0_60 = arith.constant 0 : index
    %c0_61 = arith.constant 0 : index
    %102 = vector.load %arg19[%c0_60, %c0_61] : memref<1x128xf32, #tpu.memory_space<vmem>>, vector<1x128xf32>
    tpu.vector_store %arg19[%c0_60, %c0_61], %101 {strides = array<i32>} : memref<1x128xf32, #tpu.memory_space<vmem>>, vector<1x128xf32>,
    return
  }
  func.func @transform_0(%arg0: i32) -> (i32, i32) {
    %c0_i32 = arith.constant 0 : i32
    %c0_i32_0 = arith.constant 0 : i32
    return %c0_i32, %arg0 : i32, i32
  }
  func.func @transform_1(%arg0: i32) -> (i32, i32) {
    %c0_i32 = arith.constant 0 : i32
    %c0_i32_0 = arith.constant 0 : i32
    return %c0_i32, %arg0 : i32, i32
  }
  func.func @transform_2(%arg0: i32) -> (i32, i32) {
    %c0_i32 = arith.constant 0 : i32
    %c0_i32_0 = arith.constant 0 : i32
    %c0_i32_1 = arith.constant 0 : i32
    return %c0_i32, %c0_i32_0 : i32, i32
  }
  func.func @transform_3(%arg0: i32) -> (i32, i32) {
    %c0_i32 = arith.constant 0 : i32
    %c0_i32_0 = arith.constant 0 : i32
    %c0_i32_1 = arith.constant 0 : i32
    return %c0_i32, %c0_i32_0 : i32, i32
  }
  func.func @transform_4(%arg0: i32) -> (i32, i32) {
    %c0_i32 = arith.constant 0 : i32
    %c0_i32_0 = arith.constant 0 : i32
    %c0_i32_1 = arith.constant 0 : i32
    return %c0_i32, %c0_i32_0 : i32, i32
  }
  func.func @transform_5(%arg0: i32) -> (i32, i32) {
    %c0_i32 = arith.constant 0 : i32
    %c0_i32_0 = arith.constant 0 : i32
    %c0_i32_1 = arith.constant 0 : i32
    return %c0_i32, %c0_i32_0 : i32, i32
  }
  func.func @transform_6(%arg0: i32) -> (i32, i32) {
    %c0_i32 = arith.constant 0 : i32
    %c0_i32_0 = arith.constant 0 : i32
    %c0_i32_1 = arith.constant 0 : i32
    return %c0_i32, %c0_i32_0 : i32, i32
  }
  func.func @transform_7(%arg0: i32) -> (i32, i32) {
    %c0_i32 = arith.constant 0 : i32
    %c0_i32_0 = arith.constant 0 : i32
    %c0_i32_1 = arith.constant 0 : i32
    return %c0_i32, %c0_i32_0 : i32, i32
  }
  func.func @transform_8(%arg0: i32) -> (i32, i32) {
    %c0_i32 = arith.constant 0 : i32
    %c0_i32_0 = arith.constant 0 : i32
    %c0_i32_1 = arith.constant 0 : i32
    return %c0_i32, %c0_i32_0 : i32, i32
  }
  func.func @transform_9(%arg0: i32) -> (i32, i32) {
    %c0_i32 = arith.constant 0 : i32
    %c0_i32_0 = arith.constant 0 : i32
    %c0_i32_1 = arith.constant 0 : i32
    return %c0_i32, %c0_i32_0 : i32, i32
  }
  func.func @transform_10(%arg0: i32) -> (i32, i32) {
    %c0_i32 = arith.constant 0 : i32
    %c0_i32_0 = arith.constant 0 : i32
    %c0_i32_1 = arith.constant 0 : i32
    return %c0_i32, %c0_i32_0 : i32, i32
  }
  func.func @transform_11(%arg0: i32) -> (i32, i32) {
    %c0_i32 = arith.constant 0 : i32
    %c0_i32_0 = arith.constant 0 : i32
    %c0_i32_1 = arith.constant 0 : i32
    return %c0_i32, %c0_i32_0 : i32, i32
  }
  func.func @transform_12(%arg0: i32) -> (i32, i32) {
    %c0_i32 = arith.constant 0 : i32
    %c0_i32_0 = arith.constant 0 : i32
    %c0_i32_1 = arith.constant 0 : i32
    return %c0_i32, %c0_i32_0 : i32, i32
  }
  func.func @transform_13(%arg0: i32) -> (i32, i32) {
    %c0_i32 = arith.constant 0 : i32
    %c0_i32_0 = arith.constant 0 : i32
    %c0_i32_1 = arith.constant 0 : i32
    return %c0_i32, %c0_i32_0 : i32, i32
  }
  func.func @transform_14(%arg0: i32) -> (i32, i32) {
    %c0_i32 = arith.constant 0 : i32
    %c0_i32_0 = arith.constant 0 : i32
    %c0_i32_1 = arith.constant 0 : i32
    return %c0_i32, %c0_i32_0 : i32, i32
  }
  func.func @transform_15(%arg0: i32) -> (i32, i32) {
    %c0_i32 = arith.constant 0 : i32
    %c0_i32_0 = arith.constant 0 : i32
    %c0_i32_1 = arith.constant 0 : i32
    return %c0_i32, %c0_i32_0 : i32, i32
  }
  func.func @transform_16(%arg0: i32) -> (i32, i32) {
    %c0_i32 = arith.constant 0 : i32
    %c0_i32_0 = arith.constant 0 : i32
    %c0_i32_1 = arith.constant 0 : i32
    return %c0_i32, %c0_i32_0 : i32, i32
  }
  func.func @transform_17(%arg0: i32) -> (i32, i32) {
    %c0_i32 = arith.constant 0 : i32
    %c0_i32_0 = arith.constant 0 : i32
    %c0_i32_1 = arith.constant 0 : i32
    return %c0_i32, %c0_i32_0 : i32, i32
  }
  func.func @transform_18(%arg0: i32) -> (i32, i32) {
    %c0_i32 = arith.constant 0 : i32
    %c0_i32_0 = arith.constant 0 : i32
    return %c0_i32, %arg0 : i32, i32
  }
}

</mosaic_0001>

<bundles_post_ra>
// kernel: tpu_custom_call.1
= control target key start
LH: loop header
LB: loop body
LE: loop exit
PB: predicated region body
PF: predicated region fallthrough
CT: control target
= control target key end

     0   :  { %s5391_s0 = inlined_call_operand.vmem [shape: f32[32,128], index: 0, kind: input, shape index: {}]   ;;  %s5392_s1 = inlined_call_operand.vmem [shape: f32[1,128], index: 1, kind: input, shape index: {}]   ;;  %s5393_s2 = inlined_call_operand.vmem [shape: bf16[256,32], index: 2, kind: input, shape index: {}]   ;;  %s5394_s3 = inlined_call_operand.vmem [shape: f32[256,1], index: 3, kind: input, shape index: {}]   ;;  %s5395_s4 = inlined_call_operand.vmem [shape: bf16[256,256], index: 4, kind: input, shape index: {}]   ;;  %s5396_s5 = inlined_call_operand.vmem [shape: f32[256,1], index: 5, kind: input, shape index: {}]   ;;  %s5397_s6 = inlined_call_operand.vmem [shape: bf16[128,256], index: 6, kind: input, shape index: {}]   ;;  %s5398_s7 = inlined_call_operand.vmem [shape: f32[128,1], index: 7, kind: input, shape index: {}]   ;;  %s5399_s8 = inlined_call_operand.vmem [shape: f32[128,1], index: 8, kind: input, shape index: {}]   ;;  %s5400_s9 = inlined_call_operand.<no memory space> [shape: f32[1,1], index: 9, kind: input, shape index: {}]   ;;  %s5401_s10 = inlined_call_operand.vmem [shape: f32[128,1], index: 10, kind: input, shape index: {}]   ;;  %s5402_s11 = inlined_call_operand.vmem [shape: f32[128,1], index: 11, kind: input, shape index: {}]   ;;  %s5403_s12 = inlined_call_operand.vmem [shape: bf16[128,128], index: 12, kind: input, shape index: {}]   ;;  %s5404_s13 = inlined_call_operand.vmem [shape: f32[128,1], index: 13, kind: input, shape index: {}]   ;;  %s5405_s14 = inlined_call_operand.vmem [shape: bf16[128,128], index: 14, kind: input, shape index: {}]   ;;  %s5406_s15 = inlined_call_operand.vmem [shape: f32[128,1], index: 15, kind: input, shape index: {}]   ;;  %s5407_s16 = inlined_call_operand.vmem [shape: f32[128,1], index: 16, kind: input, shape index: {}]   ;;  %s5408_s18 = inlined_call_operand.hbm [shape: f32[1,128], index: 18, kind: output, shape index: {}]   ;;  %s5409_s17 = inlined_call_operand.<no memory space> [shape: f32[1,1], index: 17, kind: input, shape index: {}]  }
   0x1   :  { %5429 = sst [smem:[#allocation31_spill]] %s5391_s0  ;;  %v23_v0 = vstv %s5400_s9  ;;  %v25_v1 = vstv %s5409_s17 }
   0x2   :  { %5430 = sst [smem:[#allocation32_spill]] %s5392_s1  ;;  %24 = vst [vmem:[#allocation2] sm:$0x1] %v23_v0  ;;  %26 = vst [vmem:[#allocation3] sm:$0x1] %v25_v1 }
   0x3   :  { %5431 = sst [smem:[#allocation33_spill]] %s5393_s2 }
   0x4   :  { %v133_v2 = vld [vmem:[%s5394_s3 + $0xf0] sm:$0xff]  ;;  %s5432_s2 = sld [smem:[#allocation31_spill]]  ;;  %v3857_v5 = vmov 0   ;;  %v134_v8 = vld [vmem:[%s5394_s3 + $0xf8] sm:$0xff]  ;;  %vm375_vm0 = vcmask 261120   ;;  %v131_v14 = vld [vmem:[%s5394_s3 + $0xe0] sm:$0xff] }
   0x5   :  { %v117_v3 = vld [vmem:[%s5394_s3 + $0x70] sm:$0xff]  ;;  %3472 = vset.pattern.permute.xlu1 %v3857_v5  ;;  %3471 = vset.pattern.permute.xlu0 %v3857_v5  ;;  %v118_v11 = vld [vmem:[%s5394_s3 + $0x78] sm:$0xff]  ;;  %s5433_s1 = sld [smem:[#allocation33_spill]]  ;;  %v132_v15 = vld [vmem:[%s5394_s3 + $0xe8] sm:$0xff] }
   0x6   :  { %287 = vperm.xlu0 %3471, %v133_v2   ;;  %207 = vperm.xlu1 %3472, %v117_v3   ;;  %v116_v18 = vld [vmem:[%s5394_s3 + $0x68] sm:$0xff]  ;;  %v115_v19 = vld [vmem:[%s5394_s3 + $0x60] sm:$0xff]  ;;  %v130_v20 = vld [vmem:[%s5394_s3 + $0xd8] sm:$0xff] }
   0x7   :  { %v129_v21 = vld [vmem:[%s5394_s3 + $0xd0] sm:$0xff]  ;;  %v114_v24 = vld [vmem:[%s5394_s3 + $0x58] sm:$0xff]  ;;  %v128_v26 = vld [vmem:[%s5394_s3 + $0xc8] sm:$0xff] }
   0x8   :  { %v113_v25 = vld [vmem:[%s5394_s3 + $0x50] sm:$0xff]  ;;  %v127_v27 = vld [vmem:[%s5394_s3 + $0xc0] sm:$0xff]  ;;  %v112_v30 = vld [vmem:[%s5394_s3 + $0x48] sm:$0xff] }
   0x9   :  { %v111_v31 = vld [vmem:[%s5394_s3 + $0x40] sm:$0xff]  ;;  %v126_v32 = vld [vmem:[%s5394_s3 + $0xb8] sm:$0xff]  ;;  %v125_v33 = vld [vmem:[%s5394_s3 + $0xb0] sm:$0xff] }
   0xa   :  { %v67_v4 = vld [vmem:[%s5432_s2 + $0x10] sm:$0xff]  ;;  %v68_v6 = vld [vmem:[%s5432_s2 + $0x18] sm:$0xff]  ;;  %v65_v9 = vld [vmem:[%s5432_s2] sm:$0xff]  ;;  %292 = vperm.xlu0 %3471, %v134_v8   ;;  %212 = vperm.xlu1 %3472, %v118_v11  }
   0xb   :  { %v70_v7 = vpack.c.bf16 %v68_v6, %v67_v4  ;;  %v66_v10 = vld [vmem:[%s5432_s2 + $0x8] sm:$0xff]  ;;  %v3473_v13 = vld [vmem:[%s5433_s1] sm:$0xff]   ;;  %v3475_v17 = vld [vmem:[%s5433_s1 + $0x10] sm:$0xff]  }
   0xc   :  { %v69_v12 = vpack.c.bf16 %v66_v10, %v65_v9  ;;  %3357 = vmatprep.mubr.msk.bf16.mxu0 %vm375_vm0, %v3473_v13  ;;  %v3474_v16 = vld [vmem:[%s5433_s1 + $0x8] sm:$0xff]   ;;  %v3476_v22 = vld [vmem:[%s5433_s1 + $0x18] sm:$0xff]   ;;  %v3477_v23 = vld [vmem:[%s5433_s1 + $0x20] sm:$0xff]  }
   0xd   :  { %3353 = vmatprep.subr.bf16.mxu0 %v70_v7  ;;  %v3478_v28 = vld [vmem:[%s5433_s1 + $0x28] sm:$0xff]   ;;  %v3479_v29 = vld [vmem:[%s5433_s1 + $0x30] sm:$0xff]   ;;  %v3480_v34 = vld [vmem:[%s5433_s1 + $0x38] sm:$0xff]  }
   0xe   :  { %3354 = vmatpush3.bf16.msra.mxu0 %v70_v7  ;;  %277 = vperm.xlu0 %3471, %v131_v14   ;;  %v3481_v35 = vld [vmem:[%s5433_s1 + $0x40] sm:$0xff]   ;;  %v110_v36 = vld [vmem:[%s5394_s3 + $0x38] sm:$0xff]  ;;  %v109_v37 = vld [vmem:[%s5394_s3 + $0x30] sm:$0xff] }
   0xf   :  { %3355 = vmatprep.subr.bf16.mxu0 %v69_v12  ;;  %282 = vperm.xlu1 %3472, %v132_v15   ;;  %v124_v38 = vld [vmem:[%s5394_s3 + $0xa8] sm:$0xff]  ;;  %v123_v39 = vld [vmem:[%s5394_s3 + $0xa0] sm:$0xff]  ;;  %v3483_v41 = vld [vmem:[%s5433_s1 + $0x50] sm:$0xff]  }
  0x10   :  { %v3482_v40 = vld [vmem:[%s5433_s1 + $0x48] sm:$0xff]   ;;  %v107_v43 = vld [vmem:[%s5394_s3 + $0x20] sm:$0xff]  ;;  %v122_v44 = vld [vmem:[%s5394_s3 + $0x98] sm:$0xff] }
  0x11   :  { %v108_v42 = vld [vmem:[%s5394_s3 + $0x28] sm:$0xff]  ;;  %v121_v45 = vld [vmem:[%s5394_s3 + $0x90] sm:$0xff]  ;;  %v3484_v46 = vld [vmem:[%s5433_s1 + $0x58] sm:$0xff]  }
  0x12   :  { %3356 = vmatpush3.bf16.msra.mxu0 %v69_v12  ;;  %197 = vperm.xlu0 %3471, %v115_v19   ;;  %v106_v47 = vld [vmem:[%s5394_s3 + $0x18] sm:$0xff]  ;;  %v3485_v48 = vld [vmem:[%s5433_s1 + $0x60] sm:$0xff]   ;;  %v105_v49 = vld [vmem:[%s5394_s3 + $0x10] sm:$0xff] }
  0x13   :  { %202 = vperm.xlu1 %3472, %v116_v18   ;;  %v120_v50 = vld [vmem:[%s5394_s3 + $0x88] sm:$0xff]  ;;  %v119_v51 = vld [vmem:[%s5394_s3 + $0x80] sm:$0xff]  ;;  %v3487_v54 = vld [vmem:[%s5433_s1 + $0x70] sm:$0xff]  }
  0x14   :  { %v3486_v52 = vld [vmem:[%s5433_s1 + $0x68] sm:$0xff]   ;;  %v103_v55 = vld [vmem:[%s5394_s3] sm:$0xff]  ;;  %v792_v56 = vld [vmem:[%s5396_s5 + $0xf8] sm:$0xff] }
  0x15   :  { %3358 = vmatmul.mubr.msk.bf16.vlgmr.msra.gmra.mxu0 %vm375_vm0, %v3474_v16  ;;  %v104_v53 = vld [vmem:[%s5394_s3 + $0x8] sm:$0xff]  ;;  %v791_v57 = vld [vmem:[%s5396_s5 + $0xf0] sm:$0xff]  ;;  %v3488_v58 = vld [vmem:[%s5433_s1 + $0x78] sm:$0xff]  }
  0x16   :  { %3361 = vmatprep.mubr.msk.bf16.mxu0 %vm375_vm0, %v3475_v17  ;;  %267 = vperm.xlu0 %3471, %v129_v21   ;;  %v776_v59 = vld [vmem:[%s5396_s5 + $0x78] sm:$0xff]  ;;  %v775_v60 = vld [vmem:[%s5396_s5 + $0x70] sm:$0xff]  ;;  %v790_v61 = vld [vmem:[%s5396_s5 + $0xe8] sm:$0xff] }
  0x17   :  { %272 = vperm.xlu1 %3472, %v130_v20   ;;  %v789_v62 = vld [vmem:[%s5396_s5 + $0xe0] sm:$0xff]  ;;  %v774_v63 = vld [vmem:[%s5396_s5 + $0x68] sm:$0xff] }
  0x18   :  { %v773_v0 = vld [vmem:[%s5396_s5 + $0x60] sm:$0xff] }
  0x1a   :  { %187 = vperm.xlu0 %3471, %v113_v25  }
  0x1b   :  { %192 = vperm.xlu1 %3472, %v114_v24  }
  0x1d   :  { %3362 = vmatmul.mubr.msk.bf16.gmra.mxu0 %vm375_vm0, %v3476_v22 }
  0x1e   :  { %3365 = vmatprep.mubr.msk.bf16.mxu0 %vm375_vm0, %v3477_v23  ;;  %257 = vperm.xlu0 %3471, %v127_v27  }
  0x1f   :  { %262 = vperm.xlu1 %3472, %v128_v26  }
  0x22   :  { %177 = vperm.xlu0 %3471, %v111_v31  }
  0x23   :  { %182 = vperm.xlu1 %3472, %v112_v30  }
  0x25   :  { %3366 = vmatmul.mubr.msk.bf16.gmra.mxu0 %vm375_vm0, %v3478_v28 }
  0x26   :  { %3369 = vmatprep.mubr.msk.bf16.mxu0 %vm375_vm0, %v3479_v29  ;;  %247 = vperm.xlu0 %3471, %v125_v33  }
  0x27   :  { %252 = vperm.xlu1 %3472, %v126_v32  }
  0x2a   :  { %167 = vperm.xlu0 %3471, %v109_v37  }
  0x2b   :  { %172 = vperm.xlu1 %3472, %v110_v36  }
  0x2d   :  { %3370 = vmatmul.mubr.msk.bf16.gmra.mxu0 %vm375_vm0, %v3480_v34 }
  0x2e   :  { %3373 = vmatprep.mubr.msk.bf16.mxu0 %vm375_vm0, %v3481_v35  ;;  %237 = vperm.xlu0 %3471, %v123_v39  }
  0x2f   :  { %242 = vperm.xlu1 %3472, %v124_v38  }
  0x32   :  { %157 = vperm.xlu0 %3471, %v107_v43  }
  0x33   :  { %162 = vperm.xlu1 %3472, %v108_v42  }
  0x35   :  { %3374 = vmatmul.mubr.msk.bf16.gmra.mxu0 %vm375_vm0, %v3482_v40 }
  0x36   :  { %3377 = vmatprep.mubr.msk.bf16.mxu0 %vm375_vm0, %v3483_v41  ;;  %227 = vperm.xlu0 %3471, %v121_v45  }
  0x37   :  { %232 = vperm.xlu1 %3472, %v122_v44  }
  0x3a   :  { %147 = vperm.xlu0 %3471, %v105_v49  }
  0x3b   :  { %152 = vperm.xlu1 %3472, %v106_v47  }
  0x3d   :  { %3378 = vmatmul.mubr.msk.bf16.gmra.mxu0 %vm375_vm0, %v3484_v46 }
  0x3e   :  { %3381 = vmatprep.mubr.msk.bf16.mxu0 %vm375_vm0, %v3485_v48  ;;  %217 = vperm.xlu0 %3471, %v119_v51  }
  0x3f   :  { %222 = vperm.xlu1 %3472, %v120_v50  }
  0x42   :  { %137 = vperm.xlu0 %3471, %v103_v55  }
  0x43   :  { %142 = vperm.xlu1 %3472, %v104_v53  }
  0x45   :  { %3382 = vmatmul.mubr.msk.bf16.gmra.mxu0 %vm375_vm0, %v3486_v52 }
  0x46   :  { %3385 = vmatprep.mubr.msk.bf16.mxu0 %vm375_vm0, %v3487_v54  ;;  %945 = vperm.xlu0 %3471, %v791_v57  }
  0x47   :  { %950 = vperm.xlu1 %3472, %v792_v56  }
  0x4a   :  { %865 = vperm.xlu0 %3471, %v775_v60  }
  0x4b   :  { %870 = vperm.xlu1 %3472, %v776_v59  }
  0x4d   :  { %3386 = vmatmul.mubr.msk.bf16.gmra.mxu0 %vm375_vm0, %v3488_v58 }
  0x4e   :  { %935 = vperm.xlu0 %3471, %v789_v62  }
  0x4f   :  { %940 = vperm.xlu1 %3472, %v790_v61  }
  0x52   :  { %855 = vperm.xlu0 %3471, %v773_v0  }
  0x53   :  { %860 = vperm.xlu1 %3472, %v774_v63  }
  0x54   :  { %27 = vsyncpa [#allocation5], 0  ;;  %v788_v1 = vld [vmem:[%s5396_s5 + $0xd8] sm:$0xff]  ;;  %v787_v2 = vld [vmem:[%s5396_s5 + $0xd0] sm:$0xff]  ;;  %s3858_s23 = smov [#allocation4]  }
  0x55   :  { %v772_v3 = vld [vmem:[%s5396_s5 + $0x58] sm:$0xff]  ;;  %v771_v4 = vld [vmem:[%s5396_s5 + $0x50] sm:$0xff]  ;;  %v786_v5 = vld [vmem:[%s5396_s5 + $0xc8] sm:$0xff] }
  0x56   :  { %925 = vperm.xlu0 %3471, %v787_v2   ;;  %v785_v6 = vld [vmem:[%s5396_s5 + $0xc0] sm:$0xff]  ;;  %v770_v7 = vld [vmem:[%s5396_s5 + $0x48] sm:$0xff]  ;;  %v784_v9 = vld [vmem:[%s5396_s5 + $0xb8] sm:$0xff] }
  0x57   :  { %930 = vperm.xlu1 %3472, %v788_v1   ;;  %v769_v8 = vld [vmem:[%s5396_s5 + $0x40] sm:$0xff]  ;;  %v783_v10 = vld [vmem:[%s5396_s5 + $0xb0] sm:$0xff]  ;;  %v768_v11 = vld [vmem:[%s5396_s5 + $0x38] sm:$0xff] }
  0x58   :  { %v767_v12 = vld [vmem:[%s5396_s5 + $0x30] sm:$0xff]  ;;  %v782_v13 = vld [vmem:[%s5396_s5 + $0xa8] sm:$0xff]  ;;  %v781_v14 = vld [vmem:[%s5396_s5 + $0xa0] sm:$0xff] }
  0x59   :  { %v766_v15 = vld [vmem:[%s5396_s5 + $0x28] sm:$0xff]  ;;  %v765_v16 = vld [vmem:[%s5396_s5 + $0x20] sm:$0xff]  ;;  %v780_v17 = vld [vmem:[%s5396_s5 + $0x98] sm:$0xff] }
  0x5a   :  { %845 = vperm.xlu0 %3471, %v771_v4   ;;  %v779_v18 = vld [vmem:[%s5396_s5 + $0x90] sm:$0xff]  ;;  %v764_v19 = vld [vmem:[%s5396_s5 + $0x18] sm:$0xff]  ;;  %v778_v21 = vld [vmem:[%s5396_s5 + $0x88] sm:$0xff] }
  0x5b   :  { %850 = vperm.xlu1 %3472, %v772_v3   ;;  %v763_v20 = vld [vmem:[%s5396_s5 + $0x10] sm:$0xff]  ;;  %v777_v22 = vld [vmem:[%s5396_s5 + $0x80] sm:$0xff]  ;;  %v762_v23 = vld [vmem:[%s5396_s5 + $0x8] sm:$0xff] }
  0x5c   :  { %v761_v24 = vld [vmem:[%s5396_s5] sm:$0xff]  ;;  %v1931_v27 = vld [vmem:[%s5401_s10 + $0x78] sm:$0xff]  ;;  %v1930_v28 = vld [vmem:[%s5401_s10 + $0x70] sm:$0xff] }
  0x5d   :  { %v2049_v31 = vld [vmem:[%s5402_s11 + $0x78] sm:$0xff]  ;;  %v2048_v32 = vld [vmem:[%s5402_s11 + $0x70] sm:$0xff]  ;;  %v1929_v35 = vld [vmem:[%s5401_s10 + $0x68] sm:$0xff] }
  0x5e   :  { %915 = vperm.xlu0 %3471, %v785_v6   ;;  %v1928_v36 = vld [vmem:[%s5401_s10 + $0x60] sm:$0xff]  ;;  %v2047_v39 = vld [vmem:[%s5402_s11 + $0x68] sm:$0xff]  ;;  %v1927_v42 = vld [vmem:[%s5401_s10 + $0x58] sm:$0xff] }
  0x5f   :  { %920 = vperm.xlu1 %3472, %v786_v5   ;;  %v2046_v40 = vld [vmem:[%s5402_s11 + $0x60] sm:$0xff]  ;;  %v1926_v43 = vld [vmem:[%s5401_s10 + $0x50] sm:$0xff]  ;;  %v2045_v46 = vld [vmem:[%s5402_s11 + $0x58] sm:$0xff] }
  0x60   :  { %v2044_v47 = vld [vmem:[%s5402_s11 + $0x50] sm:$0xff]  ;;  %v1925_v49 = vld [vmem:[%s5401_s10 + $0x48] sm:$0xff]  ;;  %v1924_v50 = vld [vmem:[%s5401_s10 + $0x40] sm:$0xff] }
  0x61   :  { %v2043_v52 = vld [vmem:[%s5402_s11 + $0x48] sm:$0xff]  ;;  %v2042_v53 = vld [vmem:[%s5402_s11 + $0x40] sm:$0xff]  ;;  %v1923_v56 = vld [vmem:[%s5401_s10 + $0x38] sm:$0xff] }
  0x62   :  { %835 = vperm.xlu0 %3471, %v769_v8   ;;  %v1922_v57 = vld [vmem:[%s5401_s10 + $0x30] sm:$0xff]  ;;  %v2041_v59 = vld [vmem:[%s5402_s11 + $0x38] sm:$0xff]  ;;  %v1921_v62 = vld [vmem:[%s5401_s10 + $0x28] sm:$0xff] }
  0x63   :  { %840 = vperm.xlu1 %3472, %v770_v7   ;;  %v2040_v60 = vld [vmem:[%s5402_s11 + $0x30] sm:$0xff]  ;;  %v1920_v63 = vld [vmem:[%s5401_s10 + $0x20] sm:$0xff]  ;;  %v2039_v2 = vld [vmem:[%s5402_s11 + $0x28] sm:$0xff] }
  0x64   :  { %v2038_v3 = vld [vmem:[%s5402_s11 + $0x20] sm:$0xff]  ;;  %v1919_v5 = vld [vmem:[%s5401_s10 + $0x18] sm:$0xff]  ;;  %v1918_v6 = vld [vmem:[%s5401_s10 + $0x10] sm:$0xff] }
  0x65   :  { %v2037_v8 = vld [vmem:[%s5402_s11 + $0x18] sm:$0xff] }
  0x66   :  { %905 = vperm.xlu0 %3471, %v783_v10  }
  0x67   :  { %910 = vperm.xlu1 %3472, %v784_v9   ;;  %v2036_v9 = vld [vmem:[%s5402_s11 + $0x10] sm:$0xff] }
  0x6a   :  { %825 = vperm.xlu0 %3471, %v767_v12   ;;  %v1917_v12 = vld [vmem:[%s5401_s10 + $0x8] sm:$0xff] }
  0x6b   :  { %830 = vperm.xlu1 %3472, %v768_v11  }
  0x6e   :  { %895 = vperm.xlu0 %3471, %v781_v14  }
  0x6f   :  { %900 = vperm.xlu1 %3472, %v782_v13   ;;  %v1916_v13 = vld [vmem:[%s5401_s10] sm:$0xff] }
  0x72   :  { %815 = vperm.xlu0 %3471, %v765_v16   ;;  %v2034_v16 = vld [vmem:[%s5402_s11] sm:$0xff] }
  0x73   :  { %820 = vperm.xlu1 %3472, %v766_v15   ;;  %v2035_v15 = vld [vmem:[%s5402_s11 + $0x8] sm:$0xff] }
  0x76   :  { %885 = vperm.xlu0 %3471, %v779_v18   ;;  %v2249_v18 = vld [vmem:[%s5404_s13 + $0x78] sm:$0xff] }
  0x77   :  { %890 = vperm.xlu1 %3472, %v780_v17  }
  0x7a   :  { %805 = vperm.xlu0 %3471, %v763_v20   ;;  %v3491_v20 = vld [vmem:[%s5395_s4 + $0x4] ss:$8 sps:$4 sm:$0xff]  }
  0x7b   :  { %810 = vperm.xlu1 %3472, %v764_v19   ;;  %v2248_v19 = vld [vmem:[%s5404_s13 + $0x70] sm:$0xff]  ;;  %1145 = vmatprep.mubr.bf16.mxu1 %v3491_v20 }
  0x7e   :  { %875 = vperm.xlu0 %3471, %v777_v22  }
  0x7f   :  { %880 = vperm.xlu1 %3472, %v778_v21  }
  0x81   :  { %v4228_v25 = vpop.permute.xlu0 %287  ;;  %v4230_v26 = vpop.permute.xlu1 %207 }
  0x82   :  { %795 = vperm.xlu0 %3471, %v761_v24   ;;  %v2246_v24 = vld [vmem:[%s5404_s13 + $0x60] sm:$0xff] }
  0x83   :  { %800 = vperm.xlu1 %3472, %v762_v23   ;;  %v2247_v23 = vld [vmem:[%s5404_s13 + $0x68] sm:$0xff] }
  0x85   :  { %v4238_v29 = vpop.permute.xlu0 %292  ;;  %v4240_v30 = vpop.permute.xlu1 %212 }
  0x86   :  { %2004 = vperm.xlu0 %3471, %v1930_v28   ;;  %v2245_v28 = vld [vmem:[%s5404_s13 + $0x58] sm:$0xff] }
  0x87   :  { %2009 = vperm.xlu1 %3472, %v1931_v27  }
  0x89   :  { %v4248_v33 = vpop.permute.xlu0 %277 }
  0x8a   :  { %v4250_v34 = vpop.permute.xlu1 %282  ;;  %2122 = vperm.xlu0 %3471, %v2048_v32  }
  0x8b   :  { %2127 = vperm.xlu1 %3472, %v2049_v31   ;;  %v2244_v31 = vld [vmem:[%s5404_s13 + $0x50] sm:$0xff] }
  0x8d   :  { %v4258_v37 = vpop.permute.xlu0 %197 }
  0x8e   :  { %v4260_v38 = vpop.permute.xlu1 %202  ;;  %1994 = vperm.xlu0 %3471, %v1928_v36   ;;  %v2242_v36 = vld [vmem:[%s5404_s13 + $0x40] sm:$0xff] }
  0x8f   :  { %1999 = vperm.xlu1 %3472, %v1929_v35   ;;  %v2243_v35 = vld [vmem:[%s5404_s13 + $0x48] sm:$0xff] }
  0x91   :  { %v4268_v41 = vpop.permute.xlu0 %267 }
  0x92   :  { %2112 = vperm.xlu0 %3471, %v2046_v40   ;;  %v4276_v44 = vpop.permute.xlu1 %272 }
  0x93   :  { %2117 = vperm.xlu1 %3472, %v2047_v39  }
  0x95   :  { %v4278_v45 = vpop.permute.xlu0 %187 }
  0x96   :  { %1984 = vperm.xlu0 %3471, %v1926_v43   ;;  %v4286_v48 = vpop.permute.xlu1 %192 }
  0x97   :  { %1989 = vperm.xlu1 %3472, %v1927_v42  }
  0x99   :  { %v4294_v51 = vpop.permute.xlu0 %257 }
  0x9a   :  { %2102 = vperm.xlu0 %3471, %v2044_v47   ;;  %v4302_v54 = vpop.permute.xlu1 %262 }
  0x9b   :  { %2107 = vperm.xlu1 %3472, %v2045_v46  }
  0x9d   :  { %v4304_v55 = vpop.permute.xlu0 %177 }
  0x9e   :  { %1974 = vperm.xlu0 %3471, %v1924_v50   ;;  %v4312_v58 = vpop.permute.xlu1 %182  ;;  %v2241_v50 = vld [vmem:[%s5404_s13 + $0x38] sm:$0xff] }
  0x9f   :  { %1979 = vperm.xlu1 %3472, %v1925_v49  }
  0xa1   :  { %v4320_v61 = vpop.permute.xlu0 %247 }
  0xa2   :  { %2092 = vperm.xlu0 %3471, %v2042_v53   ;;  %v4328_v0 = vpop.permute.xlu1 %252 }
  0xa3   :  { %2097 = vperm.xlu1 %3472, %v2043_v52   ;;  %v2240_v52 = vld [vmem:[%s5404_s13 + $0x30] sm:$0xff] }
  0xa5   :  { %v4330_v1 = vpop.permute.xlu0 %167 }
  0xa6   :  { %1964 = vperm.xlu0 %3471, %v1922_v57   ;;  %v4338_v4 = vpop.permute.xlu1 %172 }
  0xa7   :  { %1969 = vperm.xlu1 %3472, %v1923_v56  }
  0xa9   :  { %v4346_v7 = vpop.permute.xlu0 %237 }
  0xaa   :  { %2082 = vperm.xlu0 %3471, %v2040_v60   ;;  %v4354_v10 = vpop.permute.xlu1 %242 }
  0xab   :  { %2087 = vperm.xlu1 %3472, %v2041_v59  }
  0xad   :  { %v4356_v11 = vpop.permute.xlu0 %157 }
  0xae   :  { %1954 = vperm.xlu0 %3471, %v1920_v63   ;;  %v4364_v14 = vpop.permute.xlu1 %162 }
  0xaf   :  { %1959 = vperm.xlu1 %3472, %v1921_v62  }
  0xb1   :  { %v4372_v17 = vpop.permute.xlu0 %227 }
  0xb2   :  { %2072 = vperm.xlu0 %3471, %v2038_v3   ;;  %v4383_v21 = vpop.permute.xlu1 %232  ;;  %v2238_v3 = vld [vmem:[%s5404_s13 + $0x20] sm:$0xff] }
  0xb3   :  { %2077 = vperm.xlu1 %3472, %v2039_v2   ;;  %v2239_v2 = vld [vmem:[%s5404_s13 + $0x28] sm:$0xff] }
  0xb5   :  { %v148_v22 = vpop.permute.xlu0 %147 }
  0xb6   :  { %1944 = vperm.xlu0 %3471, %v1918_v6   ;;  %v153_v27 = vpop.permute.xlu1 %152 }
  0xb7   :  { %1949 = vperm.xlu1 %3472, %v1919_v5  }
  0xb9   :  { %v4397_v32 = vpop.permute.xlu0 %217 }
  0xba   :  { %2062 = vperm.xlu0 %3471, %v2036_v9   ;;  %v4405_v39 = vpop.permute.xlu1 %222 }
  0xbb   :  { %2067 = vperm.xlu1 %3472, %v2037_v8  }
  0xbd   :  { %v138_v43 = vpop.permute.xlu0 %137 }
  0xbe   :  { %1934 = vperm.xlu0 %3471, %v1916_v13   ;;  %v143_v59 = vpop.permute.xlu1 %142 }
  0xbf   :  { %1939 = vperm.xlu1 %3472, %v1917_v12  }
  0xc1   :  { %v4429_v20 = vpop.permute.xlu0 %945 }
  0xc2   :  { %2052 = vperm.xlu0 %3471, %v2034_v16   ;;  %v2236_v16 = vld [vmem:[%s5404_s13 + $0x10] sm:$0xff]  ;;  %5435 = vst [vmem:[#allocation8_spill] sm:$0xff] %v4429_v20 }
  0xc3   :  { %2057 = vperm.xlu1 %3472, %v2035_v15   ;;  %v2237_v15 = vld [vmem:[%s5404_s13 + $0x18] sm:$0xff] }
  0xc6   :  { %2322 = vperm.xlu0 %3471, %v2248_v19  }
  0xc7   :  { %2327 = vperm.xlu1 %3472, %v2249_v18   ;;  %v4427_v18 = vpop.permute.xlu1 %950 }
  0xc8   :  { %5434 = vst [vmem:[#allocation7_spill] sm:$0xff] %v4427_v18 }
  0xca   :  { %2312 = vperm.xlu0 %3471, %v2246_v24  }
  0xcb   :  { %2317 = vperm.xlu1 %3472, %v2247_v23  }
  0xce   :  { %2302 = vperm.xlu0 %3471, %v2244_v31  }
  0xcf   :  { %2307 = vperm.xlu1 %3472, %v2245_v28   ;;  %v2234_v28 = vld [vmem:[%s5404_s13] sm:$0xff] }
  0xd2   :  { %2292 = vperm.xlu0 %3471, %v2242_v36  }
  0xd3   :  { %2297 = vperm.xlu1 %3472, %v2243_v35   ;;  %v4441_v35 = vpop.permute.xlu1 %870 }
  0xd4   :  { %5436 = vst [vmem:[#allocation9_spill] sm:$0xff] %v4441_v35 }
  0xd5   :  { %v3359_v40 = vpop.f32.mrf.mxu0 }
  0xd6   :  { %v467_v42 = vadd.f32 %v3359_v40, %v148_v22  ;;  %2282 = vperm.xlu0 %3471, %v2240_v52   ;;  %v4445_v40 = vpop.permute.xlu0 %865 }
  0xd7   :  { %v458_v46 = vpop.f32.mrf.mxu0  ;;  %2287 = vperm.xlu1 %3472, %v2241_v50   ;;  %5437 = vst [vmem:[#allocation10_spill] sm:$0xff] %v4445_v40  ;;  %v1774_v40 = vld [vmem:[%s5399_s8 + $0x18] sm:$0xff] }
  0xd8   :  { %v587_v47 = vmul.f32 0.5, %v467_v42  ;;  %v459_v49 = vadd.f32 %v458_v46, %v138_v43  ;;  %v1435_v42 = vld [vmem:[%s5398_s7 + $0x8] sm:$0xff]  ;;  %v1434_v43 = vld [vmem:[%s5398_s7] sm:$0xff] }
  0xd9   :  { %v3360_v53 = vpop.f32.mrf.mxu0 }
  0xda   :  { %v585_v56 = vmul.f32 0.5, %v459_v49  ;;  %v470_v57 = vadd.f32 %v3360_v53, %v153_v27  ;;  %3577 = vtanh.f32 %v587_v47  ;;  %2272 = vperm.xlu0 %3471, %v2238_v3   ;;  %v2235_v27 = vld [vmem:[%s5404_s13 + $0x8] sm:$0xff]  ;;  %s5474_s13 = sld [smem:[#allocation32_spill]] }
  0xdb   :  { %v461_v60 = vpop.f32.mrf.mxu0  ;;  %2277 = vperm.xlu1 %3472, %v2239_v2   ;;  %v4467_v2 = vpop.permute.xlu0 %935 }
  0xdc   :  { %v588_v62 = vmul.f32 0.5, %v470_v57  ;;  %v462_v63 = vadd.f32 %v461_v60, %v143_v59  ;;  %3579 = vtanh.f32 %v585_v56  ;;  %v1437_v56 = vld [vmem:[%s5398_s7 + $0x18] sm:$0xff]  ;;  %v1436_v57 = vld [vmem:[%s5398_s7 + $0x10] sm:$0xff]  ;;  %v4463_v60 = vpop.permute.xlu1 %940  ;;  %5439 = vst [vmem:[#allocation12_spill] sm:$0xff] %v4467_v2 }
  0xdd   :  { %v3363_v5 = vpop.f32.mrf.mxu0  ;;  %5438 = vst [vmem:[#allocation11_spill] sm:$0xff] %v4463_v60 }
  0xde   :  { %3581 = vtanh.f32 %v588_v62  ;;  %v586_v6 = vmul.f32 0.5, %v462_v63  ;;  %v483_v8 = vadd.f32 %v3363_v5, %v4330_v1  ;;  %2262 = vperm.xlu0 %3471, %v2236_v16  }
  0xdf   :  { %v474_v9 = vpop.f32.mrf.mxu0  ;;  %2267 = vperm.xlu1 %3472, %v2237_v15   ;;  %v1438_v15 = vld [vmem:[%s5398_s7 + $0x20] sm:$0xff] }
  0xe0   :  { %3583 = vtanh.f32 %v586_v6  ;;  %v591_v12 = vmul.f32 0.5, %v483_v8  ;;  %v475_v13 = vadd.f32 %v474_v9, %v4356_v11 }
  0xe1   :  { %v3364_v19 = vpop.f32.mrf.mxu0 }
  0xe2   :  { %v589_v1 = vmul.f32 0.5, %v475_v13  ;;  %v486_v22 = vadd.f32 %v3364_v19, %v4338_v4  ;;  %3585 = vtanh.f32 %v591_v12  ;;  %2252 = vperm.xlu0 %3471, %v2234_v28   ;;  %v1439_v13 = vld [vmem:[%s5398_s7 + $0x28] sm:$0xff] }
  0xe3   :  { %v477_v23 = vpop.f32.mrf.mxu0  ;;  %2257 = vperm.xlu1 %3472, %v2235_v27  }
  0xe4   :  { %v592_v11 = vmul.f32 0.5, %v486_v22  ;;  %v478_v24 = vadd.f32 %v477_v23, %v4364_v14  ;;  %3587 = vtanh.f32 %v589_v1  ;;  %v1446_v1 = vld [vmem:[%s5398_s7 + $0x60] sm:$0xff] }
  0xe5   :  { %v4439_v31 = vpop.f32.mrf.mxu0 }
  0xe6   :  { %3589 = vtanh.f32 %v592_v11  ;;  %v590_v4 = vmul.f32 0.5, %v478_v24  ;;  %1452 = vperm.xlu0 %3471, %v1434_v43   ;;  %v4487_v11 = vpop.permute.xlu1 %860  ;;  %v1440_v43 = vld [vmem:[%s5398_s7 + $0x30] sm:$0xff] }
  0xe7   :  { %v4443_v36 = vpop.f32.mrf.mxu0  ;;  %v3578_v14 = vpop.eup %3577  ;;  %1457 = vperm.xlu1 %3472, %v1435_v42   ;;  %v1441_v42 = vld [vmem:[%s5398_s7 + $0x38] sm:$0xff] }
  0xe8   :  { %3591 = vtanh.f32 %v590_v4  ;;  %v651_v50 = vmul.f32 0.5, %v3578_v14  ;;  %v4491_v4 = vpop.permute.xlu0 %855 }
  0xe9   :  { %v4453_v46 = vpop.f32.mrf.mxu0  ;;  %v3580_v47 = vpop.eup %3579 }
  0xea   :  { %v649_v62 = vmul.f32 0.5, %v3580_v47  ;;  %v4471_v6 = vadd.f32 0.5, %v651_v50  ;;  %1462 = vperm.xlu0 %3471, %v1436_v57  }
  0xeb   :  { %v3582_v49 = vpop.eup %3581  ;;  %v4455_v52 = vpop.f32.mrf.mxu0  ;;  %1467 = vperm.xlu1 %3472, %v1437_v56  }
  0xec   :  { %v652_v53 = vmul.f32 0.5, %v3582_v49  ;;  %v4483_v16 = vadd.f32 0.5, %v649_v62 }
  0xed   :  { %v3584_v59 = vpop.eup %3583  ;;  %v4465_v63 = vpop.f32.mrf.mxu0 }
  0xee   :  { %v4469_v3 = vadd.f32 0.5, %v652_v53  ;;  %v650_v5 = vmul.f32 0.5, %v3584_v59  ;;  %1472 = vperm.xlu0 %3471, %v1438_v15  }
  0xef   :  { %v4473_v8 = vpop.f32.mrf.mxu0  ;;  %v3586_v9 = vpop.eup %3585  ;;  %1477 = vperm.xlu1 %3472, %v1439_v13  }
  0xf0   :  { %v4475_v12 = vadd.f32 0.5, %v650_v5  ;;  %v655_v24 = vmul.f32 0.5, %v3586_v9  ;;  %v1443_v5 = vld [vmem:[%s5398_s7 + $0x48] sm:$0xff]  ;;  %v1442_v9 = vld [vmem:[%s5398_s7 + $0x40] sm:$0xff]  ;;  %v4515_v13 = vpop.permute.xlu1 %930 }
  0xf1   :  { %v3372_v19 = vpop.f32.mrf.mxu0  ;;  %v3588_v22 = vpop.eup %3587  ;;  %5440 = vst [vmem:[#allocation13_spill] sm:$0xff] %v4515_v13  ;;  %v502_v13 = vadd.f32 %v4453_v46, %v4286_v48 }
  0xf2   :  { %v653_v49 = vmul.f32 0.5, %v3588_v22  ;;  %v4503_v57 = vadd.f32 0.5, %v655_v24  ;;  %1482 = vperm.xlu0 %3471, %v1440_v43   ;;  %v4523_v24 = vpop.permute.xlu0 %925  ;;  %v1445_v43 = vld [vmem:[%s5398_s7 + $0x58] sm:$0xff]  ;;  %v518_v60 = vadd.f32 %v3372_v19, %v4240_v30  ;;  %v1773_v30 = vld [vmem:[%s5399_s8 + $0x10] sm:$0xff] }
  0xf3   :  { %v3590_v23 = vpop.eup %3589  ;;  %v509_v27 = vpop.f32.mrf.mxu0  ;;  %1487 = vperm.xlu1 %3472, %v1441_v42   ;;  %5441 = vst [vmem:[#allocation14_spill] sm:$0xff] %v4523_v24  ;;  %v596_v48 = vmul.f32 0.5, %v502_v13 }
  0xf4   :  { %v656_v14 = vmul.f32 0.5, %v3590_v23  ;;  %v4517_v15 = vadd.f32 0.5, %v653_v49  ;;  %v510_v46 = vadd.f32 %v509_v27, %v4260_v38  ;;  %v600_v19 = vmul.f32 0.5, %v518_v60  ;;  %v1776_v60 = vld [vmem:[%s5399_s8 + $0x28] sm:$0xff] }
  0xf5   :  { %v3592_v47 = vpop.eup %3591  ;;  %v4499_v50 = vpop.f32.mrf.mxu0  ;;  %3593 = vtanh.f32 %v596_v48 }
  0xf6   :  { %v4501_v53 = vadd.f32 0.5, %v656_v14  ;;  %v654_v56 = vmul.f32 0.5, %v3592_v47  ;;  %1492 = vperm.xlu0 %3471, %v1442_v9   ;;  %v1444_v47 = vld [vmem:[%s5398_s7 + $0x50] sm:$0xff]  ;;  %v1447_v9 = vld [vmem:[%s5398_s7 + $0x68] sm:$0xff]  ;;  %v598_v27 = vmul.f32 0.5, %v510_v46 }
  0xf7   :  { %v4505_v59 = vpop.f32.mrf.mxu0  ;;  %1497 = vperm.xlu1 %3472, %v1443_v5   ;;  %v4541_v5 = vpop.permute.xlu0 %845 }
  0xf8   :  { %v4507_v62 = vadd.f32 0.5, %v654_v56  ;;  %v4537_v56 = vpop.permute.xlu1 %850 }
  0xf9   :  { %v4519_v22 = vpop.f32.mrf.mxu0 }
  0xfa   :  { %1502 = vperm.xlu0 %3471, %v1444_v47   ;;  %v1448_v47 = vld [vmem:[%s5398_s7 + $0x70] sm:$0xff] }
  0xfb   :  { %v4525_v14 = vpop.f32.mrf.mxu0  ;;  %1507 = vperm.xlu1 %3472, %v1445_v43   ;;  %v1449_v43 = vld [vmem:[%s5398_s7 + $0x78] sm:$0xff]  ;;  %v4561_v20 = vpop.permute.xlu0 %915 }
  0xfc   :  { %v4559_v18 = vpop.permute.xlu1 %920  ;;  %5443 = vst [vmem:[#allocation16_spill] sm:$0xff] %v4561_v20 }
  0xfd   :  { %v4535_v49 = vpop.f32.mrf.mxu0  ;;  %5442 = vst [vmem:[#allocation15_spill] sm:$0xff] %v4559_v18  ;;  %v1771_v18 = vld [vmem:[%s5399_s8] sm:$0xff] }
  0xfe   :  { %1512 = vperm.xlu0 %3471, %v1446_v1   ;;  %v515_v1 = vadd.f32 %v4465_v63, %v4230_v26 }
  0xff   :  { %v4539_v28 = vpop.f32.mrf.mxu0  ;;  %1517 = vperm.xlu1 %3472, %v1447_v9   ;;  %v1772_v9 = vld [vmem:[%s5399_s8 + $0x8] sm:$0xff]  ;;  %v4577_v26 = vpop.permute.xlu0 %835 }
 0x100   :  { %v4574_v35 = vpop.permute.xlu1 %840  ;;  %v599_v63 = vmul.f32 0.5, %v515_v1 }
 0x101   :  { %v4549_v42 = vpop.f32.mrf.mxu0 }
 0x102   :  { %1522 = vperm.xlu0 %3471, %v1448_v47   ;;  %3595 = vtanh.f32 %v599_v63 }
 0x103   :  { %v4551_v23 = vpop.f32.mrf.mxu0  ;;  %1527 = vperm.xlu1 %3472, %v1449_v43   ;;  %3597 = vtanh.f32 %v600_v19 }
 0x104   :  { %v4596_v48 = vpop.permute.xlu1 %910 }
 0x105   :  { %v3383_v24 = vpop.f32.mrf.mxu0 }
 0x106   :  { %1789 = vperm.xlu0 %3471, %v1771_v18   ;;  %v507_v18 = vadd.f32 %v4473_v8, %v4258_v37  ;;  %v563_v1 = vadd.f32 %v3383_v24, %v4268_v41  ;;  %v4601_v8 = vpop.permute.xlu0 %905 }
 0x107   :  { %v554_v2 = vpop.f32.mrf.mxu0  ;;  %1794 = vperm.xlu1 %3472, %v1772_v9  }
 0x108   :  { %v597_v63 = vmul.f32 0.5, %v507_v18  ;;  %v4619_v18 = vpop.permute.xlu1 %830 }
 0x109   :  { %v3384_v20 = vpop.f32.mrf.mxu0 }
 0x10a   :  { %v566_v47 = vadd.f32 %v3384_v20, %v4276_v44  ;;  %1799 = vperm.xlu0 %3471, %v1773_v30  }
 0x10b   :  { %v557_v43 = vpop.f32.mrf.mxu0  ;;  %1804 = vperm.xlu1 %3472, %v1774_v40   ;;  %v499_v40 = vadd.f32 %v4439_v31, %v4278_v45  ;;  %v494_v31 = vadd.f32 %v4455_v52, %v4312_v58  ;;  %v547_v58 = vadd.f32 %v4535_v49, %v4320_v61  ;;  %v3594_v61 = vpop.eup %3593 }
 0x10c   :  { %v612_v20 = vmul.f32 0.5, %v566_v47  ;;  %v558_v24 = vadd.f32 %v557_v43, %v4302_v54  ;;  %v611_v47 = vmul.f32 0.5, %v563_v1  ;;  %v1778_v54 = vld [vmem:[%s5399_s8 + $0x38] sm:$0xff]  ;;  %v550_v43 = vadd.f32 %v4549_v42, %v4328_v0  ;;  %v1780_v0 = vld [vmem:[%s5399_s8 + $0x48] sm:$0xff] }
 0x10d   :  { %v3387_v13 = vpop.f32.mrf.mxu0  ;;  %v542_v1 = vadd.f32 %v4551_v23, %v4354_v10  ;;  %v607_v49 = vmul.f32 0.5, %v547_v58  ;;  %v4641_v23 = vpop.permute.xlu1 %900 }
 0x10e   :  { %v579_v38 = vadd.f32 %v3387_v13, %v4228_v25  ;;  %v1775_v25 = vld [vmem:[%s5399_s8 + $0x20] sm:$0xff]  ;;  %v608_v42 = vmul.f32 0.5, %v550_v43 }
 0x10f   :  { %v570_v44 = vpop.f32.mrf.mxu0  ;;  %1814 = vperm.xlu1 %3472, %v1776_v60   ;;  %1809 = vperm.xlu0 %3471, %v1775_v25   ;;  %v1781_v60 = vld [vmem:[%s5399_s8 + $0x50] sm:$0xff]  ;;  %v3596_v10 = vpop.eup %3595  ;;  %v534_v25 = vadd.f32 %v4519_v22, %v4383_v21  ;;  %v1783_v21 = vld [vmem:[%s5399_s8 + $0x60] sm:$0xff] }
 0x110   :  { %v615_v9 = vmul.f32 0.5, %v579_v38  ;;  %v571_v37 = vadd.f32 %v570_v44, %v4248_v33  ;;  %v555_v33 = vadd.f32 %v554_v2, %v4294_v51  ;;  %v610_v51 = vmul.f32 0.5, %v558_v24 }
 0x111   :  { %v3388_v41 = vpop.f32.mrf.mxu0  ;;  %v595_v38 = vmul.f32 0.5, %v499_v40  ;;  %v531_v24 = vadd.f32 %v4499_v50, %v4372_v17  ;;  %v4657_v50 = vpop.permute.xlu1 %820 }
 0x112   :  { %3599 = vtanh.f32 %v615_v9  ;;  %v582_v46 = vadd.f32 %v3388_v41, %v4238_v29  ;;  %v613_v30 = vmul.f32 0.5, %v571_v37  ;;  %v1777_v29 = vld [vmem:[%s5399_s8 + $0x30] sm:$0xff]  ;;  %v609_v52 = vmul.f32 0.5, %v555_v33  ;;  %v1782_v9 = vld [vmem:[%s5399_s8 + $0x58] sm:$0xff]  ;;  %v3598_v37 = vpop.eup %3597 }
 0x113   :  { %3601 = vtanh.f32 %v598_v27  ;;  %v573_v13 = vpop.f32.mrf.mxu0  ;;  %1824 = vperm.xlu1 %3472, %v1778_v54   ;;  %1819 = vperm.xlu0 %3471, %v1777_v29   ;;  %v4621_v27 = vpop.permute.xlu0 %825  ;;  %v526_v33 = vadd.f32 %v4525_v14, %v4405_v39  ;;  %v663_v54 = vmul.f32 0.5, %v3596_v10  ;;  %v603_v43 = vmul.f32 0.5, %v531_v24  ;;  %v2563_v39 = vld [vmem:[%s5406_s15] sm:$0xff]  ;;  %v1785_v14 = vld [vmem:[%s5399_s8 + $0x70] sm:$0xff] }
 0x114   :  { %3603 = vtanh.f32 %v612_v20  ;;  %v616_v19 = vmul.f32 0.5, %v582_v46  ;;  %v574_v45 = vadd.f32 %v573_v13, %v4250_v34  ;;  %v491_v34 = vadd.f32 %v4443_v36, %v4304_v55  ;;  %v1779_v55 = vld [vmem:[%s5399_s8 + $0x40] sm:$0xff] }
 0x115   :  { %3605 = vtanh.f32 %v613_v30  ;;  %v594_v36 = vmul.f32 0.5, %v494_v31  ;;  %v539_v20 = vadd.f32 %v4539_v28, %v4346_v7  ;;  %v606_v7 = vmul.f32 0.5, %v542_v1 }
 0x116   :  { %3607 = vtanh.f32 %v616_v19  ;;  %v614_v2 = vmul.f32 0.5, %v574_v45  ;;  %v593_v44 = vmul.f32 0.5, %v491_v34  ;;  %v664_v30 = vmul.f32 0.5, %v3598_v37 }
 0x117   :  { %3609 = vtanh.f32 %v597_v63  ;;  %1834 = vperm.xlu1 %3472, %v1780_v0   ;;  %1829 = vperm.xlu0 %3471, %v1779_v55   ;;  %v4645_v41 = vpop.permute.xlu0 %895  ;;  %v605_v46 = vmul.f32 0.5, %v539_v20  ;;  %v1784_v63 = vld [vmem:[%s5399_s8 + $0x68] sm:$0xff]  ;;  %v523_v45 = vadd.f32 %v4505_v59, %v4397_v32  ;;  %v602_v58 = vmul.f32 0.5, %v526_v33 }
 0x118   :  { %3611 = vtanh.f32 %v611_v47  ;;  %v604_v47 = vmul.f32 0.5, %v534_v25  ;;  %v696_v59 = vadd.f32 0.5, %v664_v30  ;;  %v2565_v25 = vld [vmem:[%s5406_s15 + $0x10] sm:$0xff] }
 0x119   :  { %3613 = vtanh.f32 %v614_v2  ;;  %v601_v1 = vmul.f32 0.5, %v523_v45 }
 0x11a   :  { %3615 = vtanh.f32 %v610_v51 }
 0x11b   :  { %3617 = vtanh.f32 %v595_v38  ;;  %1844 = vperm.xlu1 %3472, %v1782_v9   ;;  %1839 = vperm.xlu0 %3471, %v1781_v60   ;;  %v4661_v31 = vpop.permute.xlu0 %815  ;;  %v660_v9 = vmul.f32 0.5, %v3594_v61 }
 0x11c   :  { %3619 = vtanh.f32 %v609_v52 }
 0x11d   :  { %3621 = vtanh.f32 %v594_v36 }
 0x11e   :  { %3623 = vtanh.f32 %v608_v42 }
 0x11f   :  { %v3600_v28 = vpop.eup %3599  ;;  %3625 = vtanh.f32 %v593_v44  ;;  %1854 = vperm.xlu1 %3472, %v1784_v63   ;;  %1849 = vperm.xlu0 %3471, %v1783_v21   ;;  %v2564_v63 = vld [vmem:[%s5406_s15 + $0x8] sm:$0xff]  ;;  %v4677_v61 = vpop.permute.xlu0 %885 }
 0x120   :  { %v3602_v40 = vpop.eup %3601  ;;  %3627 = vtanh.f32 %v607_v49  ;;  %v679_v19 = vmul.f32 0.5, %v3600_v28  ;;  %v695_v49 = vadd.f32 0.5, %v663_v54  ;;  %v4672_v28 = vpop.permute.xlu1 %890 }
 0x121   :  { %v3604_v22 = vpop.eup %3603  ;;  %3629 = vtanh.f32 %v606_v7  ;;  %v662_v38 = vmul.f32 0.5, %v3602_v40 }
 0x122   :  { %v3606_v13 = vpop.eup %3605  ;;  %3631 = vtanh.f32 %v605_v46  ;;  %v676_v52 = vmul.f32 0.5, %v3604_v22  ;;  %v711_v0 = vadd.f32 0.5, %v679_v19  ;;  %v752_v46 = vpack.c.bf16 %v696_v59, %v695_v49 }
 0x123   :  { %v3608_v17 = vpop.eup %3607  ;;  %3633 = vtanh.f32 %v604_v47  ;;  %v677_v32 = vmul.f32 0.5, %v3606_v13  ;;  %2581 = vperm.xlu1 %3472, %v2563_v39   ;;  %1859 = vperm.xlu0 %3471, %v1785_v14   ;;  %v694_v7 = vadd.f32 0.5, %v662_v38  ;;  %v692_v39 = vadd.f32 0.5, %v660_v9  ;;  %v2568_v9 = vld [vmem:[%s5406_s15 + $0x28] sm:$0xff] }
 0x124   :  { %v3610_v29 = vpop.eup %3609  ;;  %v680_v51 = vmul.f32 0.5, %v3608_v17  ;;  %3635 = vtanh.f32 %v603_v43  ;;  %v708_v22 = vadd.f32 0.5, %v676_v52 }
 0x125   :  { %v3612_v2 = vpop.eup %3611  ;;  %v661_v42 = vmul.f32 0.5, %v3610_v29  ;;  %v709_v40 = vadd.f32 0.5, %v677_v32  ;;  %3637 = vtanh.f32 %v602_v58  ;;  %v2567_v29 = vld [vmem:[%s5406_s15 + $0x20] sm:$0xff] }
 0x126   :  { %v3614_v34 = vpop.eup %3613  ;;  %v712_v55 = vadd.f32 0.5, %v680_v51  ;;  %v675_v60 = vmul.f32 0.5, %v3612_v2  ;;  %3639 = vtanh.f32 %v601_v1  ;;  %v2566_v2 = vld [vmem:[%s5406_s15 + $0x18] sm:$0xff]  ;;  %v2569_v1 = vld [vmem:[%s5406_s15 + $0x30] sm:$0xff] }
 0x127   :  { %v3616_v36 = vpop.eup %3615  ;;  %v678_v44 = vmul.f32 0.5, %v3614_v34  ;;  %v693_v33 = vadd.f32 0.5, %v661_v42  ;;  %2591 = vperm.xlu1 %3472, %v2565_v25   ;;  %2586 = vperm.xlu0 %3471, %v2564_v63  }
 0x128   :  { %v3618_v20 = vpop.eup %3617  ;;  %v760_v10 = vpack.c.bf16 %v712_v55, %v711_v0  ;;  %v674_v47 = vmul.f32 0.5, %v3616_v36  ;;  %v707_v45 = vadd.f32 0.5, %v675_v60  ;;  %v4685_v0 = vpop.permute.xlu1 %810 }
 0x129   :  { %v3620_v37 = vpop.eup %3619  ;;  %v710_v24 = vadd.f32 0.5, %v678_v44  ;;  %v659_v13 = vmul.f32 0.5, %v3618_v20  ;;  %v751_v51 = vpack.c.bf16 %v694_v7, %v693_v33  ;;  %v4687_v55 = vpop.permute.xlu0 %805 }
 0x12a   :  { %v3622_v21 = vpop.eup %3621  ;;  %3145 = vmatprep.subr.bf16.mxu1 %v760_v10  ;;  %v673_v54 = vmul.f32 0.5, %v3620_v37  ;;  %v706_v32 = vadd.f32 0.5, %v674_v47  ;;  %v758_v59 = vpack.c.bf16 %v708_v22, %v707_v45  ;;  %v2570_v47 = vld [vmem:[%s5406_s15 + $0x38] sm:$0xff] }
 0x12b   :  { %v3624_v30 = vpop.eup %3623  ;;  %3146 = vmatpush3.bf16.msra.mxu1 %v752_v46  ;;  %v759_v19 = vpack.c.bf16 %v710_v24, %v709_v40  ;;  %v658_v14 = vmul.f32 0.5, %v3622_v21  ;;  %v691_v58 = vadd.f32 0.5, %v659_v13  ;;  %2601 = vperm.xlu1 %3472, %v2567_v29   ;;  %v2571_v46 = vld [vmem:[%s5406_s15 + $0x40] sm:$0xff]  ;;  %v2573_v29 = vld [vmem:[%s5406_s15 + $0x50] sm:$0xff] }
 0x12c   :  { %v3626_v17 = vpop.eup %3625  ;;  %v672_v38 = vmul.f32 0.5, %v3624_v30  ;;  %v705_v42 = vadd.f32 0.5, %v673_v54  ;;  %2596 = vperm.xlu0 %3471, %v2566_v2   ;;  %v4698_v21 = vpop.permute.xlu1 %880 }
 0x12d   :  { %v3628_v43 = vpop.eup %3627  ;;  %3147 = vmatprep.subr.bf16.mxu1 %v759_v19  ;;  %v657_v52 = vmul.f32 0.5, %v3626_v17  ;;  %v690_v49 = vadd.f32 0.5, %v658_v14  ;;  %v750_v20 = vpack.c.bf16 %v692_v39, %v691_v58  ;;  %v4703_v13 = vpop.permute.xlu0 %875  ;;  %v2572_v39 = vld [vmem:[%s5406_s15 + $0x48] sm:$0xff] }
 0x12e   :  { %v3630_v34 = vpop.eup %3629  ;;  %v671_v36 = vmul.f32 0.5, %v3628_v43  ;;  %v704_v10 = vadd.f32 0.5, %v672_v38  ;;  %v757_v37 = vpack.c.bf16 %v706_v32, %v705_v42  ;;  %v5444_v32 = vpack.c.bf16 %v4501_v53, %v4503_v57 }
 0x12f   :  { %3148 = vmatpush3.bf16.msra.mxu1 %v751_v51  ;;  %v3632_v44 = vpop.eup %3631  ;;  %v670_v25 = vmul.f32 0.5, %v3630_v34  ;;  %v689_v7 = vadd.f32 0.5, %v657_v52  ;;  %2611 = vperm.xlu1 %3472, %v2569_v1   ;;  %v2575_v52 = vld [vmem:[%s5406_s15 + $0x60] sm:$0xff]  ;;  %v5445_v53 = vpack.c.bf16 %v4507_v62, %v4517_v15  ;;  %v5446_v62 = vpack.c.bf16 %v4469_v3, %v4471_v6  ;;  %v2870_v15 = vld [vmem:[%s5407_s16 + $0x10] sm:$0xff] }
 0x130   :  { %3149 = vmatprep.subr.bf16.mxu1 %v758_v59  ;;  %v3634_v60 = vpop.eup %3633  ;;  %v703_v40 = vadd.f32 0.5, %v671_v36  ;;  %v669_v24 = vmul.f32 0.5, %v3632_v44  ;;  %2606 = vperm.xlu0 %3471, %v2568_v9   ;;  %v4711_v38 = vpop.permute.xlu1 %800  ;;  %v2574_v36 = vld [vmem:[%s5406_s15 + $0x58] sm:$0xff]  ;;  %v2869_v44 = vld [vmem:[%s5407_s16 + $0x8] sm:$0xff]  ;;  %v5447_v3 = vpack.c.bf16 %v4475_v12, %v4483_v16  ;;  %v2872_v12 = vld [vmem:[%s5407_s16 + $0x20] sm:$0xff] }
 0x131   :  { %v3636_v63 = vpop.eup %3635  ;;  %v749_v22 = vpack.c.bf16 %v690_v49, %v689_v7  ;;  %v668_v30 = vmul.f32 0.5, %v3634_v60  ;;  %v702_v33 = vadd.f32 0.5, %v670_v25  ;;  %v4716_v58 = vpop.permute.xlu0 %795  ;;  %v3489_v25 = vld [vmem:[%s5395_s4] ss:$8 sps:$4 sm:$0xff]   ;;  %v3492_v6 = vld [vmem:[%s5395_s4 + $0x14] ss:$8 sps:$4 sm:$0xff]  }
 0x132   :  { %v756_v19 = vpack.c.bf16 %v704_v10, %v703_v40  ;;  %v3638_v17 = vpop.eup %3637  ;;  %v667_v45 = vmul.f32 0.5, %v3636_v63  ;;  %v701_v54 = vadd.f32 0.5, %v669_v24  ;;  %v2576_v10 = vld [vmem:[%s5406_s15 + $0x68] sm:$0xff]  ;;  %v2871_v40 = vld [vmem:[%s5407_s16 + $0x18] sm:$0xff]  ;;  %v2577_v24 = vld [vmem:[%s5406_s15 + $0x70] sm:$0xff] }
 0x133   :  { %3150 = vmatpush3.bf16.msra.mxu1 %v750_v20  ;;  %2621 = vperm.xlu1 %3472, %v2571_v46   ;;  %v3640_v43 = vpop.eup %3639  ;;  %v700_v14 = vadd.f32 0.5, %v668_v30  ;;  %v666_v51 = vmul.f32 0.5, %v3638_v17  ;;  %v2868_v20 = vld [vmem:[%s5407_s16] sm:$0xff]  ;;  %v2578_v46 = vld [vmem:[%s5406_s15 + $0x78] sm:$0xff]  ;;  %v2874_v30 = vld [vmem:[%s5407_s16 + $0x30] sm:$0xff] }
 0x134   :  { %3151 = vmatprep.subr.bf16.mxu1 %v757_v37  ;;  %2616 = vperm.xlu0 %3471, %v2570_v47   ;;  %v755_v2 = vpack.c.bf16 %v702_v33, %v701_v54  ;;  %v699_v59 = vadd.f32 0.5, %v667_v45  ;;  %v665_v34 = vmul.f32 0.5, %v3640_v43  ;;  %v4730_v49 = vpop.permute.xlu1 %2009  ;;  %v3495_v47 = vld [vmem:[%s5395_s4 + $0x24] ss:$8 sps:$4 sm:$0xff]   ;;  %v2875_v54 = vld [vmem:[%s5407_s16 + $0x38] sm:$0xff] }
 0x135   :  { %v698_v42 = vadd.f32 0.5, %v666_v51  ;;  %v4735_v9 = vpop.permute.xlu0 %2004  ;;  %v2873_v33 = vld [vmem:[%s5407_s16 + $0x28] sm:$0xff]  ;;  %v2876_v45 = vld [vmem:[%s5407_s16 + $0x40] sm:$0xff]  ;;  %v3498_v43 = vld [vmem:[%s5395_s4 + $0x34] ss:$8 sps:$4 sm:$0xff]  }
 0x136   :  { %v754_v1 = vpack.c.bf16 %v700_v14, %v699_v59  ;;  %v697_v57 = vadd.f32 0.5, %v665_v34  ;;  %v2877_v51 = vld [vmem:[%s5407_s16 + $0x48] sm:$0xff]  ;;  %v2879_v59 = vld [vmem:[%s5407_s16 + $0x58] sm:$0xff] }
 0x137   :  { %3152 = vmatpush3.bf16.msra.mxu1 %v749_v22  ;;  %2631 = vperm.xlu1 %3472, %v2573_v29   ;;  %v3494_v22 = vld [vmem:[%s5395_s4 + $0x10] ss:$8 sps:$4 sm:$0xff]   ;;  %v3497_v29 = vld [vmem:[%s5395_s4 + $0x20] ss:$8 sps:$4 sm:$0xff]  }
 0x138   :  { %3153 = vmatprep.subr.bf16.mxu1 %v756_v19  ;;  %2626 = vperm.xlu0 %3471, %v2572_v39   ;;  %v753_v60 = vpack.c.bf16 %v698_v42, %v697_v57  ;;  %v4749_v37 = vpop.permute.xlu1 %2127  ;;  %v2878_v39 = vld [vmem:[%s5407_s16 + $0x50] sm:$0xff]  ;;  %v1786_v57 = vld [vmem:[%s5399_s8 + $0x78] sm:$0xff] }
 0x139   :  { %v4757_v7 = vpop.permute.xlu0 %2122  ;;  %v3500_v34 = vld [vmem:[%s5395_s4 + $0x30] ss:$8 sps:$4 sm:$0xff]  }
 0x13b   :  { %3154 = vmatpush3.bf16.msra.mxu1 %v5444_v32  ;;  %2641 = vperm.xlu1 %3472, %v2575_v52   ;;  %v2880_v32 = vld [vmem:[%s5407_s16 + $0x60] sm:$0xff] }
 0x13c   :  { %3155 = vmatprep.subr.bf16.mxu1 %v755_v2  ;;  %2636 = vperm.xlu0 %3471, %v2574_v36   ;;  %v4768_v16 = vpop.permute.xlu1 %1999  ;;  %v3501_v36 = vld [vmem:[%s5395_s4 + $0x44] ss:$8 sps:$4 sm:$0xff]  }
 0x13d   :  { %v4773_v63 = vpop.permute.xlu0 %1994 }
 0x13f   :  { %3156 = vmatpush3.bf16.msra.mxu1 %v5445_v53  ;;  %2891 = vperm.xlu1 %3472, %v2869_v44   ;;  %v2881_v53 = vld [vmem:[%s5407_s16 + $0x68] sm:$0xff] }
 0x140   :  { %3157 = vmatprep.subr.bf16.mxu1 %v754_v1  ;;  %2886 = vperm.xlu0 %3471, %v2868_v20   ;;  %v4787_v19 = vpop.permute.xlu1 %2117  ;;  %v2882_v1 = vld [vmem:[%s5407_s16 + $0x70] sm:$0xff]  ;;  %v2883_v20 = vld [vmem:[%s5407_s16 + $0x78] sm:$0xff] }
 0x141   :  { %v4789_v17 = vpop.permute.xlu0 %2112 }
 0x143   :  { %3158 = vmatpush3.bf16.msra.mxu1 %v5446_v62  ;;  %2896 = vperm.xlu1 %3472, %v2870_v15   ;;  %v3503_v62 = vld [vmem:[%s5395_s4 + $0x40] ss:$8 sps:$4 sm:$0xff]   ;;  %v3504_v15 = vld [vmem:[%s5395_s4 + $0x54] ss:$8 sps:$4 sm:$0xff]  }
 0x144   :  { %3159 = vmatprep.subr.bf16.mxu1 %v753_v60  ;;  %2646 = vperm.xlu0 %3471, %v2576_v10   ;;  %v4806_v14 = vpop.permute.xlu1 %1989  ;;  %v1904_v10 = vld [vmem:[#allocation2] sm:$0x1] }
 0x145   :  { %v4811_v2 = vpop.permute.xlu0 %1984 }
 0x147   :  { %3160 = vmatpush3.bf16.msra.mxu1 %v5447_v3  ;;  %2901 = vperm.xlu1 %3472, %v2871_v40   ;;  %v3506_v40 = vld [vmem:[%s5395_s4 + $0x50] ss:$8 sps:$4 sm:$0xff]  }
 0x148   :  { %2651 = vperm.xlu0 %3471, %v2577_v24   ;;  %v4822_v52 = vpop.permute.xlu1 %2107  ;;  %v3507_v24 = vld [vmem:[%s5395_s4 + $0x64] ss:$8 sps:$4 sm:$0xff]  }
 0x149   :  { %v4827_v42 = vpop.permute.xlu0 %2102 }
 0x14a   :  { %1146 = vmatmul.mubr.bf16.vlgmr.msra.gmra.mxu1 %v3489_v25  ;;  %v3001_v25 = vld [vmem:[#allocation3] sm:$0x1] }
 0x14b   :  { %1153 = vmatprep.mubr.bf16.mxu1 %v3492_v6  ;;  %2906 = vperm.xlu1 %3472, %v2872_v12   ;;  %v3509_v12 = vld [vmem:[%s5395_s4 + $0x60] ss:$8 sps:$4 sm:$0xff]  }
 0x14c   :  { %2656 = vperm.xlu0 %3471, %v2578_v46   ;;  %v4838_v44 = vpop.permute.xlu1 %1979  ;;  %v3510_v46 = vld [vmem:[%s5395_s4 + $0x74] ss:$8 sps:$4 sm:$0xff]  }
 0x14d   :  { %v4843_v60 = vpop.permute.xlu0 %1974 }
 0x14f   :  { %2916 = vperm.xlu1 %3472, %v2874_v30   ;;  %v3515_v30 = vld [vmem:[%s5395_s4 + $0x80] ss:$8 sps:$4 sm:$0xff]  }
 0x150   :  { %2911 = vperm.xlu0 %3471, %v2873_v33   ;;  %v4851_v3 = vpop.permute.xlu1 %2097  ;;  %v3516_v33 = vld [vmem:[%s5395_s4 + $0x94] ss:$8 sps:$4 sm:$0xff]  }
 0x151   :  { %v4853_v6 = vpop.permute.xlu0 %2092 }
 0x152   :  { %1154 = vmatmul.mubr.bf16.gmra.mxu1 %v3494_v22  ;;  %v3512_v22 = vld [vmem:[%s5395_s4 + $0x70] ss:$8 sps:$4 sm:$0xff]  }
 0x153   :  { %1161 = vmatprep.mubr.bf16.mxu1 %v3495_v47  ;;  %2926 = vperm.xlu1 %3472, %v2876_v45   ;;  %v3513_v47 = vld [vmem:[%s5395_s4 + $0x84] ss:$8 sps:$4 sm:$0xff]   ;;  %v3518_v45 = vld [vmem:[%s5395_s4 + $0x90] ss:$8 sps:$4 sm:$0xff]  }
 0x154   :  { %2921 = vperm.xlu0 %3471, %v2875_v54   ;;  %v3519_v54 = vld [vmem:[%s5395_s4 + $0xa4] ss:$8 sps:$4 sm:$0xff]  }
 0x157   :  { %2936 = vperm.xlu1 %3472, %v2878_v39   ;;  %v3524_v39 = vld [vmem:[%s5395_s4 + $0xb0] ss:$8 sps:$4 sm:$0xff]  }
 0x158   :  { %2931 = vperm.xlu0 %3471, %v2877_v51   ;;  %v3525_v51 = vld [vmem:[%s5395_s4 + $0xc4] ss:$8 sps:$4 sm:$0xff]  }
 0x15a   :  { %1162 = vmatmul.mubr.bf16.gmra.mxu1 %v3497_v29  ;;  %v3521_v29 = vld [vmem:[%s5395_s4 + $0xa0] ss:$8 sps:$4 sm:$0xff]  }
 0x15b   :  { %1169 = vmatprep.mubr.bf16.mxu1 %v3498_v43  ;;  %2946 = vperm.xlu1 %3472, %v2880_v32   ;;  %v3522_v43 = vld [vmem:[%s5395_s4 + $0xb4] ss:$8 sps:$4 sm:$0xff]   ;;  %v3527_v32 = vld [vmem:[%s5395_s4 + $0xc0] ss:$8 sps:$4 sm:$0xff]  }
 0x15c   :  { %2941 = vperm.xlu0 %3471, %v2879_v59   ;;  %v3528_v59 = vld [vmem:[%s5395_s4 + $0xd4] ss:$8 sps:$4 sm:$0xff]  }
 0x15f   :  { %2956 = vperm.xlu1 %3472, %v2882_v1   ;;  %v3533_v1 = vld [vmem:[%s5395_s4 + $0xe0] ss:$8 sps:$4 sm:$0xff]  }
 0x160   :  { %2951 = vperm.xlu0 %3471, %v2881_v53   ;;  %v3534_v53 = vld [vmem:[%s5395_s4 + $0xf4] ss:$8 sps:$4 sm:$0xff]  }
 0x162   :  { %1170 = vmatmul.mubr.bf16.gmra.mxu1 %v3500_v34  ;;  %v3530_v34 = vld [vmem:[%s5395_s4 + $0xd0] ss:$8 sps:$4 sm:$0xff]  }
 0x163   :  { %1177 = vmatprep.mubr.bf16.mxu1 %v3501_v36  ;;  %1864 = vperm.xlu1 %3472, %v1786_v57   ;;  %v3531_v36 = vld [vmem:[%s5395_s4 + $0xe4] ss:$8 sps:$4 sm:$0xff]   ;;  %v3536_v57 = vld [vmem:[%s5395_s4 + $0xf0] ss:$8 sps:$4 sm:$0xff]  }
 0x164   :  { %2961 = vperm.xlu0 %3471, %v2883_v20  }
 0x167   :  { %1907 = vperm.xlu1 %3472, %v1904_v10  }
 0x168   :  { %3004 = vperm.xlu0 %3471, %v3001_v25  }
 0x16a   :  { %1178 = vmatmul.mubr.bf16.gmra.mxu1 %v3503_v62 }
 0x16b   :  { %1185 = vmatprep.mubr.bf16.mxu1 %v3504_v15 }
 0x172   :  { %1186 = vmatmul.mubr.bf16.gmra.mxu1 %v3506_v40 }
 0x173   :  { %1193 = vmatprep.mubr.bf16.mxu1 %v3507_v24 }
 0x17a   :  { %1194 = vmatmul.mubr.bf16.gmra.mxu1 %v3509_v12 }
 0x17b   :  { %1201 = vmatprep.mubr.bf16.mxu1 %v3510_v46 }
 0x182   :  { %1202 = vmatmul.mubr.bf16.gmra.mxu1 %v3512_v22 }
 0x183   :  { %1209 = vmatprep.mubr.bf16.mxu1 %v3513_v47 }
 0x18a   :  { %1210 = vmatmul.mubr.bf16.gmra.mxu1 %v3515_v30 }
 0x18b   :  { %1217 = vmatprep.mubr.bf16.mxu1 %v3516_v33 }
 0x192   :  { %1218 = vmatmul.mubr.bf16.gmra.mxu1 %v3518_v45 }
 0x193   :  { %1225 = vmatprep.mubr.bf16.mxu1 %v3519_v54 }
 0x19a   :  { %1226 = vmatmul.mubr.bf16.gmra.mxu1 %v3521_v29 }
 0x19b   :  { %1233 = vmatprep.mubr.bf16.mxu1 %v3522_v43 }
 0x1a2   :  { %1234 = vmatmul.mubr.bf16.gmra.mxu1 %v3524_v39 }
 0x1a3   :  { %1241 = vmatprep.mubr.bf16.mxu1 %v3525_v51 }
 0x1aa   :  { %1242 = vmatmul.mubr.bf16.gmra.mxu1 %v3527_v32 }
 0x1ab   :  { %1249 = vmatprep.mubr.bf16.mxu1 %v3528_v59 }
 0x1b2   :  { %1250 = vmatmul.mubr.bf16.gmra.mxu1 %v3530_v34 }
 0x1b3   :  { %1257 = vmatprep.mubr.bf16.mxu1 %v3531_v36 }
 0x1ba   :  { %1258 = vmatmul.mubr.bf16.gmra.mxu1 %v3533_v1 }
 0x1bb   :  { %1265 = vmatprep.mubr.bf16.mxu1 %v3534_v53 }
 0x1c2   :  { %1266 = vmatmul.mubr.bf16.gmra.mxu1 %v3536_v57 }
 0x20a   :  { %v3161_v20 = vpop.f32.mrf.mxu1 }
 0x20c   :  { %v3162_v62 = vpop.f32.mrf.mxu1 }
 0x20d   :  { %v3163_v15 = vadd.f32 %v3162_v62, %v3161_v20 }
 0x20e   :  { %v3164_v10 = vpop.f32.mrf.mxu1 }
 0x20f   :  { %v1148_v25 = vadd.f32 %v3163_v15, %v4716_v58 }
 0x210   :  { %v3165_v40 = vpop.f32.mrf.mxu1 }
 0x211   :  { %v1274_v24 = vmul.f32 0.5, %v1148_v25  ;;  %v3166_v12 = vadd.f32 %v3165_v40, %v3164_v10 }
 0x212   :  { %v3167_v46 = vpop.f32.mrf.mxu1 }
 0x213   :  { %3641 = vtanh.f32 %v1274_v24  ;;  %v1151_v22 = vadd.f32 %v3166_v12, %v4711_v38 }
 0x214   :  { %v3168_v47 = vpop.f32.mrf.mxu1 }
 0x215   :  { %v1275_v30 = vmul.f32 0.5, %v1151_v22  ;;  %v3169_v33 = vadd.f32 %v3168_v47, %v3167_v46 }
 0x216   :  { %v3170_v45 = vpop.f32.mrf.mxu1 }
 0x217   :  { %3643 = vtanh.f32 %v1275_v30  ;;  %v1156_v54 = vadd.f32 %v3169_v33, %v4687_v55 }
 0x218   :  { %v3171_v29 = vpop.f32.mrf.mxu1 }
 0x219   :  { %v1276_v43 = vmul.f32 0.5, %v1156_v54  ;;  %v3172_v39 = vadd.f32 %v3171_v29, %v3170_v45 }
 0x21a   :  { %v3173_v51 = vpop.f32.mrf.mxu1 }
 0x21b   :  { %3645 = vtanh.f32 %v1276_v43  ;;  %v1159_v58 = vadd.f32 %v3172_v39, %v4685_v0 }
 0x21c   :  { %v3174_v32 = vpop.f32.mrf.mxu1 }
 0x21d   :  { %v1277_v59 = vmul.f32 0.5, %v1159_v58  ;;  %v3175_v34 = vadd.f32 %v3174_v32, %v3173_v51 }
 0x21e   :  { %v3176_v36 = vpop.f32.mrf.mxu1 }
 0x21f   :  { %3647 = vtanh.f32 %v1277_v59  ;;  %v1164_v38 = vadd.f32 %v3175_v34, %v4661_v31 }
 0x220   :  { %v3642_v1 = vpop.eup %3641  ;;  %v3177_v53 = vpop.f32.mrf.mxu1 }
 0x221   :  { %v1278_v57 = vmul.f32 0.5, %v1164_v38  ;;  %v3178_v20 = vadd.f32 %v3177_v53, %v3176_v36  ;;  %v1338_v55 = vmul.f32 0.5, %v3642_v1 }
 0x222   :  { %v3179_v62 = vpop.f32.mrf.mxu1 }
 0x223   :  { %3649 = vtanh.f32 %v1278_v57  ;;  %v1167_v15 = vadd.f32 %v3178_v20, %v4657_v50  ;;  %v4924_v46 = vadd.f32 0.5, %v1338_v55 }
 0x224   :  { %v3644_v10 = vpop.eup %3643  ;;  %v3180_v25 = vpop.f32.mrf.mxu1 }
 0x225   :  { %v1339_v40 = vmul.f32 0.5, %v3644_v10  ;;  %v1279_v0 = vmul.f32 0.5, %v1167_v15  ;;  %v3181_v24 = vadd.f32 %v3180_v25, %v3179_v62  ;;  %5448 = vst [vmem:[#allocation17_spill] sm:$0xff] %v4924_v46 }
 0x226   :  { %v3182_v12 = vpop.f32.mrf.mxu1 }
 0x227   :  { %v4926_v22 = vadd.f32 0.5, %v1339_v40  ;;  %3651 = vtanh.f32 %v1279_v0  ;;  %v1172_v31 = vadd.f32 %v3181_v24, %v4621_v27 }
 0x228   :  { %v3646_v47 = vpop.eup %3645  ;;  %v3183_v30 = vpop.f32.mrf.mxu1 }
 0x229   :  { %5449 = vst [vmem:[#allocation18_spill] sm:$0xff] %v4926_v22  ;;  %v1280_v33 = vmul.f32 0.5, %v1172_v31  ;;  %v3184_v45 = vadd.f32 %v3183_v30, %v3182_v12  ;;  %v1340_v29 = vmul.f32 0.5, %v3646_v47 }
 0x22a   :  { %v3185_v54 = vpop.f32.mrf.mxu1 }
 0x22b   :  { %3653 = vtanh.f32 %v1280_v33  ;;  %v1175_v43 = vadd.f32 %v3184_v45, %v4619_v18  ;;  %v4932_v36 = vadd.f32 0.5, %v1340_v29 }
 0x22c   :  { %v3648_v39 = vpop.eup %3647  ;;  %v3186_v51 = vpop.f32.mrf.mxu1 }
 0x22d   :  { %v1341_v58 = vmul.f32 0.5, %v3648_v39  ;;  %v1281_v32 = vmul.f32 0.5, %v1175_v43  ;;  %v3187_v59 = vadd.f32 %v3186_v51, %v3185_v54  ;;  %5450 = vst [vmem:[#allocation19_spill] sm:$0xff] %v4932_v36 }
 0x22e   :  { %v3188_v34 = vpop.f32.mrf.mxu1 }
 0x22f   :  { %v4934_v27 = vadd.f32 0.5, %v1341_v58  ;;  %3655 = vtanh.f32 %v1281_v32  ;;  %v1180_v38 = vadd.f32 %v3187_v59, %v4577_v26 }
 0x230   :  { %v3650_v1 = vpop.eup %3649  ;;  %v3189_v53 = vpop.f32.mrf.mxu1 }
 0x231   :  { %5451 = vst [vmem:[#allocation20_spill] sm:$0xff] %v4934_v27  ;;  %v1282_v57 = vmul.f32 0.5, %v1180_v38  ;;  %v3190_v20 = vadd.f32 %v3189_v53, %v3188_v34  ;;  %v1342_v55 = vmul.f32 0.5, %v3650_v1  ;;  %v5467_v27 = vld [vmem:[#allocation12_spill] sm:$0xff] }
 0x232   :  { %v3191_v62 = vpop.f32.mrf.mxu1 }
 0x233   :  { %3657 = vtanh.f32 %v1282_v57  ;;  %v1183_v15 = vadd.f32 %v3190_v20, %v4574_v35  ;;  %v4940_v31 = vadd.f32 0.5, %v1342_v55 }
 0x234   :  { %v3652_v10 = vpop.eup %3651  ;;  %v3192_v25 = vpop.f32.mrf.mxu1 }
 0x235   :  { %v1343_v40 = vmul.f32 0.5, %v3652_v10  ;;  %v1283_v0 = vmul.f32 0.5, %v1183_v15  ;;  %v3193_v24 = vadd.f32 %v3192_v25, %v3191_v62  ;;  %5452 = vst [vmem:[#allocation21_spill] sm:$0xff] %v4940_v31  ;;  %v3539_v15 = vld [vmem:[%s5397_s6 + $0x4] ss:$8 sps:$4 sm:$0xff]  }
 0x236   :  { %v3194_v12 = vpop.f32.mrf.mxu1  ;;  %1642 = vmatprep.mubr.bf16.mxu0 %v3539_v15 }
 0x237   :  { %v4942_v26 = vadd.f32 0.5, %v1343_v40  ;;  %3659 = vtanh.f32 %v1283_v0  ;;  %v1188_v47 = vadd.f32 %v3193_v24, %v4541_v5 }
 0x238   :  { %v3654_v30 = vpop.eup %3653  ;;  %v3195_v33 = vpop.f32.mrf.mxu1 }
 0x239   :  { %5453 = vst [vmem:[#allocation22_spill] sm:$0xff] %v4942_v26  ;;  %v1284_v45 = vmul.f32 0.5, %v1188_v47  ;;  %v3196_v54 = vadd.f32 %v3195_v33, %v3194_v12  ;;  %v1344_v43 = vmul.f32 0.5, %v3654_v30 }
 0x23a   :  { %v3197_v29 = vpop.f32.mrf.mxu1 }
 0x23b   :  { %3661 = vtanh.f32 %v1284_v45  ;;  %v1191_v39 = vadd.f32 %v3196_v54, %v4537_v56  ;;  %v4948_v1 = vadd.f32 0.5, %v1344_v43  ;;  %v5458_v54 = vld [vmem:[#allocation10_spill] sm:$0xff] }
 0x23c   :  { %v3656_v51 = vpop.eup %3655  ;;  %v3198_v58 = vpop.f32.mrf.mxu1 }
 0x23d   :  { %v1345_v32 = vmul.f32 0.5, %v3656_v51  ;;  %v1285_v59 = vmul.f32 0.5, %v1191_v39  ;;  %v3199_v34 = vadd.f32 %v3198_v58, %v3197_v29  ;;  %5454 = vst [vmem:[#allocation23_spill] sm:$0xff] %v4948_v1 }
 0x23e   :  { %v3200_v38 = vpop.f32.mrf.mxu1 }
 0x23f   :  { %v4950_v5 = vadd.f32 0.5, %v1345_v32  ;;  %3663 = vtanh.f32 %v1285_v59  ;;  %v1196_v53 = vadd.f32 %v3199_v34, %v4491_v4  ;;  %v5459_v34 = vld [vmem:[#allocation9_spill] sm:$0xff] }
 0x240   :  { %v3658_v57 = vpop.eup %3657  ;;  %v3201_v20 = vpop.f32.mrf.mxu1 }
 0x241   :  { %5455 = vst [vmem:[#allocation24_spill] sm:$0xff] %v4950_v5  ;;  %v1286_v62 = vmul.f32 0.5, %v1196_v53  ;;  %v3202_v55 = vadd.f32 %v3201_v20, %v3200_v38  ;;  %v1346_v25 = vmul.f32 0.5, %v3658_v57 }
 0x242   :  { %v3203_v10 = vpop.f32.mrf.mxu1 }
 0x243   :  { %3665 = vtanh.f32 %v1286_v62  ;;  %v1199_v40 = vadd.f32 %v3202_v55, %v4487_v11  ;;  %v4959_v33 = vadd.f32 0.5, %v1346_v25 }
 0x244   :  { %v3660_v0 = vpop.eup %3659  ;;  %v3204_v24 = vpop.f32.mrf.mxu1 }
 0x245   :  { %v1347_v4 = vmul.f32 0.5, %v3660_v0  ;;  %v1287_v12 = vmul.f32 0.5, %v1199_v40  ;;  %v3205_v47 = vadd.f32 %v3204_v24, %v3203_v10  ;;  %5456 = vst [vmem:[#allocation25_spill] sm:$0xff] %v4959_v33  ;;  %v5469_v33 = vld [vmem:[#allocation8_spill] sm:$0xff] }
 0x246   :  { %v3206_v30 = vpop.f32.mrf.mxu1 }
 0x247   :  { %v4961_v45 = vadd.f32 0.5, %v1347_v4  ;;  %3667 = vtanh.f32 %v1287_v12  ;;  %v1204_v29 = vadd.f32 %v3205_v47, %v5458_v54 }
 0x248   :  { %v3662_v43 = vpop.eup %3661  ;;  %v3207_v39 = vpop.f32.mrf.mxu1 }
 0x249   :  { %5457 = vst [vmem:[#allocation26_spill] sm:$0xff] %v4961_v45  ;;  %v1288_v51 = vmul.f32 0.5, %v1204_v29  ;;  %v3208_v58 = vadd.f32 %v3207_v39, %v3206_v30  ;;  %v1348_v59 = vmul.f32 0.5, %v3662_v43 }
 0x24a   :  { %v3209_v32 = vpop.f32.mrf.mxu1 }
 0x24b   :  { %3669 = vtanh.f32 %v1288_v51  ;;  %v1207_v38 = vadd.f32 %v3208_v58, %v5459_v34  ;;  %v4967_v10 = vadd.f32 0.5, %v1348_v59 }
 0x24c   :  { %v3664_v53 = vpop.eup %3663  ;;  %v3210_v57 = vpop.f32.mrf.mxu1 }
 0x24d   :  { %v1349_v20 = vmul.f32 0.5, %v3664_v53  ;;  %v1289_v62 = vmul.f32 0.5, %v1207_v38  ;;  %v3211_v55 = vadd.f32 %v3210_v57, %v3209_v32  ;;  %5460 = vst [vmem:[#allocation10_spill] sm:$0xff] %v4967_v10 }
 0x24e   :  { %v3212_v15 = vpop.f32.mrf.mxu1 }
 0x24f   :  { %v4969_v25 = vadd.f32 0.5, %v1349_v20  ;;  %3671 = vtanh.f32 %v1289_v62  ;;  %v1212_v40 = vadd.f32 %v3211_v55, %v4703_v13 }
 0x250   :  { %v3666_v0 = vpop.eup %3665  ;;  %v3213_v24 = vpop.f32.mrf.mxu1 }
 0x251   :  { %5461 = vst [vmem:[#allocation9_spill] sm:$0xff] %v4969_v25  ;;  %v1290_v4 = vmul.f32 0.5, %v1212_v40  ;;  %v3214_v12 = vadd.f32 %v3213_v24, %v3212_v15  ;;  %v1350_v54 = vmul.f32 0.5, %v3666_v0 }
 0x252   :  { %v3215_v30 = vpop.f32.mrf.mxu1 }
 0x253   :  { %3673 = vtanh.f32 %v1290_v4  ;;  %v1215_v29 = vadd.f32 %v3214_v12, %v4698_v21  ;;  %v4975_v34 = vadd.f32 0.5, %v1350_v54 }
 0x254   :  { %v3668_v43 = vpop.eup %3667  ;;  %v3216_v39 = vpop.f32.mrf.mxu1 }
 0x255   :  { %v1351_v51 = vmul.f32 0.5, %v3668_v43  ;;  %v1291_v58 = vmul.f32 0.5, %v1215_v29  ;;  %v3217_v32 = vadd.f32 %v3216_v39, %v3215_v30 }
 0x256   :  { %v3218_v59 = vpop.f32.mrf.mxu1 }
 0x257   :  { %v4977_v13 = vadd.f32 0.5, %v1351_v51  ;;  %3675 = vtanh.f32 %v1291_v58  ;;  %v1220_v38 = vadd.f32 %v3217_v32, %v4677_v61 }
 0x258   :  { %v3670_v53 = vpop.eup %3669  ;;  %v3219_v57 = vpop.f32.mrf.mxu1 }
 0x259   :  { %v1292_v20 = vmul.f32 0.5, %v1220_v38  ;;  %v3220_v62 = vadd.f32 %v3219_v57, %v3218_v59  ;;  %v1352_v15 = vmul.f32 0.5, %v3670_v53 }
 0x25a   :  { %v4982_v55 = vpop.f32.mrf.mxu1 }
 0x25b   :  { %3677 = vtanh.f32 %v1292_v20  ;;  %v1223_v40 = vadd.f32 %v3220_v62, %v4672_v28  ;;  %v4989_v61 = vadd.f32 0.5, %v1352_v15 }
 0x25c   :  { %v3672_v0 = vpop.eup %3671  ;;  %v4985_v24 = vpop.f32.mrf.mxu1 }
 0x25d   :  { %v1353_v4 = vmul.f32 0.5, %v3672_v0  ;;  %v1293_v12 = vmul.f32 0.5, %v1223_v40 }
 0x25e   :  { %v4987_v30 = vpop.f32.mrf.mxu1 }
 0x25f   :  { %v4991_v54 = vadd.f32 0.5, %v1353_v4  ;;  %3679 = vtanh.f32 %v1293_v12 }
 0x260   :  { %v3674_v29 = vpop.eup %3673  ;;  %v4993_v43 = vpop.f32.mrf.mxu1 }
 0x261   :  { %v1354_v28 = vmul.f32 0.5, %v3674_v29 }
 0x262   :  { %v3227_v51 = vpop.f32.mrf.mxu1 }
 0x263   :  { %v4997_v53 = vadd.f32 0.5, %v1354_v28  ;;  %v5468_v28 = vld [vmem:[#allocation13_spill] sm:$0xff] }
 0x264   :  { %v3676_v58 = vpop.eup %3675  ;;  %v3228_v32 = vpop.f32.mrf.mxu1 }
 0x265   :  { %v1355_v59 = vmul.f32 0.5, %v3676_v58  ;;  %5462 = vst [vmem:[#allocation27_spill] sm:$0xff] %v4997_v53 }
 0x266   :  { %v3230_v38 = vpop.f32.mrf.mxu1 }
 0x267   :  { %v4999_v57 = vadd.f32 0.5, %v1355_v59 }
 0x268   :  { %v3678_v20 = vpop.eup %3677  ;;  %v3231_v62 = vpop.f32.mrf.mxu1 }
 0x269   :  { %5463 = vst [vmem:[#allocation28_spill] sm:$0xff] %v4999_v57  ;;  %v1356_v0 = vmul.f32 0.5, %v3678_v20 }
 0x26a   :  { %v3233_v40 = vpop.f32.mrf.mxu1 }
 0x26b   :  { %v5003_v29 = vadd.f32 0.5, %v1356_v0  ;;  %v5466_v0 = vld [vmem:[#allocation11_spill] sm:$0xff] }
 0x26c   :  { %v3680_v4 = vpop.eup %3679  ;;  %v3234_v12 = vpop.f32.mrf.mxu1 }
 0x26d   :  { %v1357_v50 = vmul.f32 0.5, %v3680_v4  ;;  %5464 = vst [vmem:[#allocation29_spill] sm:$0xff] %v5003_v29  ;;  %v3235_v10 = vadd.f32 %v3234_v12, %v3233_v40 }
 0x26e   :  { %v3236_v18 = vpop.f32.mrf.mxu1 }
 0x26f   :  { %v5005_v35 = vadd.f32 0.5, %v1357_v50 }
 0x270   :  { %v3237_v58 = vpop.f32.mrf.mxu1 }
 0x271   :  { %5465 = vst [vmem:[#allocation30_spill] sm:$0xff] %v5005_v35  ;;  %v3238_v5 = vadd.f32 %v3237_v58, %v3236_v18  ;;  %v5016_v18 = vpop.permute.xlu1 %1969 }
 0x272   :  { %v3239_v59 = vpop.f32.mrf.mxu1 }
 0x274   :  { %v3240_v56 = vpop.f32.mrf.mxu1 }
 0x275   :  { %v3241_v36 = vadd.f32 %v3240_v56, %v3239_v59  ;;  %v3232_v56 = vadd.f32 %v3231_v62, %v3230_v38  ;;  %v5033_v38 = vld [vmem:[%s5474_s13] ss:$0 sm:$0xff]  ;;  %v5035_v62 = vpop.permute.xlu1 %2087 }
 0x276   :  { %v3242_v11 = vpop.f32.mrf.mxu1 }
 0x278   :  { %v3243_v47 = vpop.f32.mrf.mxu1 }
 0x279   :  { %v3244_v4 = vadd.f32 %v3243_v47, %v3242_v11  ;;  %v5041_v58 = vpop.permute.xlu1 %1959 }
 0x27a   :  { %v3245_v21 = vpop.f32.mrf.mxu1 }
 0x27b   :  { %v1255_v29 = vadd.f32 %v3244_v4, %v5468_v28  ;;  %v3229_v28 = vadd.f32 %v3228_v32, %v3227_v51 }
 0x27c   :  { %v3246_v15 = vpop.f32.mrf.mxu1 }
 0x27d   :  { %v3247_v46 = vadd.f32 %v3246_v15, %v3245_v21  ;;  %v5470_v21 = vld [vmem:[#allocation14_spill] sm:$0xff] }
 0x27e   :  { %v3248_v39 = vpop.f32.mrf.mxu1 }
 0x27f   :  { %v1260_v31 = vadd.f32 %v3247_v46, %v5467_v27  ;;  %v5471_v46 = vld [vmem:[#allocation15_spill] sm:$0xff] }
 0x280   :  { %v3249_v20 = vpop.f32.mrf.mxu1  ;;  %v1247_v27 = vadd.f32 %v3238_v5, %v5471_v46  ;;  %v1239_v5 = vadd.f32 %v3232_v56, %v4596_v48  ;;  %v5051_v46 = vpop.permute.xlu1 %2077 }
 0x281   :  { %v3250_v22 = vadd.f32 %v3249_v20, %v3248_v39  ;;  %v1252_v39 = vadd.f32 %v3241_v36, %v5470_v21  ;;  %v1302_v11 = vmul.f32 0.5, %v1260_v31  ;;  %v1301_v20 = vmul.f32 0.5, %v1255_v29 }
 0x282   :  { %v3251_v53 = vpop.f32.mrf.mxu1 }
 0x283   :  { %v1263_v57 = vadd.f32 %v3250_v22, %v5466_v0  ;;  %v1910_v22 = vlaneseq  ;;  %v1300_v40 = vmul.f32 0.5, %v1252_v39 }
 0x284   :  { %v3252_v50 = vpop.f32.mrf.mxu1 }
 0x285   :  { %v3253_v26 = vadd.f32 %v3252_v50, %v3251_v53  ;;  %v1303_v35 = vmul.f32 0.5, %v1263_v57  ;;  %v5472_v53 = vld [vmem:[#allocation7_spill] sm:$0xff]  ;;  %v5019_v31 = vshrl.u32 %v1910_v22, 7 }
 0x286   :  { %v3254_v1 = vpop.f32.mrf.mxu1 }
 0x287   :  { %v1268_v45 = vadd.f32 %v3253_v26, %v5469_v33  ;;  %3681 = vtanh.f32 %v1303_v35  ;;  %v5473_v26 = vld [vmem:[#allocation16_spill] sm:$0xff]  ;;  %v3226_v35 = vadd.f32 %v4993_v43, %v4987_v30  ;;  %v1912_v32 = vsub.s32 0, %v5019_v31 }
 0x288   :  { %v3255_v25 = vpop.f32.mrf.mxu1  ;;  %v1244_v33 = vadd.f32 %v3235_v10, %v5473_v26  ;;  %v1236_v10 = vadd.f32 %v3229_v28, %v4601_v8  ;;  %v1297_v30 = vmul.f32 0.5, %v1239_v5  ;;  %v2031_v26 = vmul.f32 %v5033_v38, %v4768_v16 }
 0x289   :  { %v1304_v47 = vmul.f32 0.5, %v1268_v45  ;;  %v3256_v15 = vadd.f32 %v3255_v25, %v3254_v1  ;;  %v5021_v1 = vpop.permute.xlu0 %1964  ;;  %v1299_v45 = vmul.f32 0.5, %v1247_v27  ;;  %v3223_v25 = vadd.f32 %v4985_v24, %v4982_v55 }
 0x28a   :  { %v1298_v51 = vmul.f32 0.5, %v1244_v33  ;;  %v1231_v48 = vadd.f32 %v3226_v35, %v4641_v23  ;;  %v1296_v8 = vmul.f32 0.5, %v1236_v10  ;;  %v2033_v23 = vmul.f32 %v5033_v38, %v4730_v49 }
 0x28b   :  { %3683 = vtanh.f32 %v1304_v47  ;;  %v1271_v57 = vadd.f32 %v3256_v15, %v5472_v53  ;;  %v1228_v55 = vadd.f32 %v3223_v25, %v4645_v41  ;;  %v2032_v41 = vmul.f32 %v5033_v38, %v4735_v9 }
 0x28c   :  { %3685 = vtanh.f32 %v1302_v11  ;;  %v1295_v12 = vmul.f32 0.5, %v1231_v48  ;;  %v2145_v47 = vadd.f32 %v4749_v37, %v2033_v23  ;;  %v2030_v37 = vmul.f32 %v5033_v38, %v4773_v63 }
 0x28d   :  { %v1305_v36 = vmul.f32 0.5, %v1271_v57  ;;  %3687 = vtanh.f32 %v1301_v20  ;;  %v5038_v43 = vpop.permute.xlu0 %2082  ;;  %v1294_v59 = vmul.f32 0.5, %v1228_v55  ;;  %v2144_v15 = vadd.f32 %v4757_v7, %v2032_v41 }
 0x28e   :  { %v2161_v9 = vmul.f32 0.5, %v2145_v47  ;;  %v2142_v25 = vadd.f32 %v4789_v17, %v2030_v37  ;;  %v2029_v10 = vmul.f32 %v5033_v38, %v4806_v14  ;;  %v2028_v63 = vmul.f32 %v5033_v38, %v4811_v2  ;;  %v1950_v17 = vpop.permute.xlu1 %1949 }
 0x28f   :  { %3689 = vtanh.f32 %v1305_v36  ;;  %v2160_v7 = vmul.f32 0.5, %v2144_v15  ;;  %v5475_v55 = vpack.c.bf16 %v4991_v54, %v4989_v61  ;;  %v2027_v61 = vmul.f32 %v5033_v38, %v4838_v44 }
 0x290   :  { %3691 = vtanh.f32 %v1300_v40  ;;  %v5476_v54 = vpack.c.bf16 %v4977_v13, %v4975_v34  ;;  %v2025_v34 = vmul.f32 %v5033_v38, %v5016_v18  ;;  %v2023_v18 = vmul.f32 %v5033_v38, %v5041_v58 }
 0x291   :  { %3693 = vtanh.f32 %v1299_v45  ;;  %v5045_v0 = vpop.permute.xlu0 %1954  ;;  %v2143_v45 = vadd.f32 %v4787_v19, %v2031_v26  ;;  %v2141_v19 = vadd.f32 %v4822_v52, %v2029_v10  ;;  %v2026_v52 = vmul.f32 %v5033_v38, %v4843_v60 }
 0x292   :  { %3695 = vtanh.f32 %v1298_v51  ;;  %v2139_v15 = vadd.f32 %v4851_v3, %v2027_v61  ;;  %v2068_v44 = vpop.permute.xlu1 %2067  ;;  %v2137_v26 = vadd.f32 %v5035_v62, %v2025_v34  ;;  %v5487_v61 = vld [vmem:[#allocation21_spill] sm:$0xff] }
 0x293   :  { %3697 = vtanh.f32 %v1297_v30 }
 0x294   :  { %v3682_v24 = vpop.eup %3681  ;;  %3699 = vtanh.f32 %v1296_v8 }
 0x295   :  { %3701 = vtanh.f32 %v1295_v12  ;;  %v1367_v39 = vmul.f32 0.5, %v3682_v24  ;;  %v5057_v33 = vpop.permute.xlu0 %2072  ;;  %v2159_v12 = vmul.f32 0.5, %v2143_v45 }
 0x296   :  { %3703 = vtanh.f32 %v1294_v59  ;;  %v1940_v10 = vpop.permute.xlu1 %1939 }
 0x297   :  { %v1399_v53 = vadd.f32 0.5, %v1367_v39  ;;  %3705 = vtanh.f32 %v2161_v9 }
 0x298   :  { %v3684_v29 = vpop.eup %3683  ;;  %3707 = vtanh.f32 %v2160_v7 }
 0x299   :  { %v3686_v4 = vpop.eup %3685  ;;  %v1368_v21 = vmul.f32 0.5, %v3684_v29  ;;  %v2140_v29 = vadd.f32 %v4827_v42, %v2028_v63  ;;  %v1945_v59 = vpop.permute.xlu0 %1944  ;;  %3709 = vtanh.f32 %v2159_v12  ;;  %v5483_v63 = vld [vmem:[#allocation24_spill] sm:$0xff] }
 0x29a   :  { %v3688_v50 = vpop.eup %3687  ;;  %v1366_v20 = vmul.f32 0.5, %v3686_v4  ;;  %v2158_v4 = vmul.f32 0.5, %v2142_v25  ;;  %v2135_v25 = vadd.f32 %v5051_v46, %v2023_v18  ;;  %v3537_v18 = vld [vmem:[%s5397_s6] ss:$8 sps:$4 sm:$0xff]  }
 0x29b   :  { %v1400_v49 = vadd.f32 0.5, %v1368_v21  ;;  %v1365_v57 = vmul.f32 0.5, %v3688_v50  ;;  %v2157_v21 = vmul.f32 0.5, %v2141_v19  ;;  %v2156_v47 = vmul.f32 0.5, %v2140_v29 }
 0x29c   :  { %v3690_v11 = vpop.eup %3689  ;;  %v1398_v36 = vadd.f32 0.5, %v1366_v20  ;;  %3711 = vtanh.f32 %v2158_v4 }
 0x29d   :  { %v1369_v22 = vmul.f32 0.5, %v3690_v11  ;;  %v3692_v56 = vpop.eup %3691  ;;  %v1397_v16 = vadd.f32 0.5, %v1365_v57  ;;  %v2063_v13 = vpop.permute.xlu0 %2062  ;;  %3713 = vtanh.f32 %v2157_v21  ;;  %v2024_v57 = vmul.f32 %v5033_v38, %v5021_v1  ;;  %v5481_v1 = vld [vmem:[#allocation25_spill] sm:$0xff] }
 0x29e   :  { %v3694_v28 = vpop.eup %3693  ;;  %v1364_v35 = vmul.f32 0.5, %v3692_v56  ;;  %v1432_v51 = vpack.c.bf16 %v1399_v53, %v1398_v36  ;;  %3715 = vtanh.f32 %v2156_v47  ;;  %v2022_v36 = vmul.f32 %v5033_v38, %v5045_v0  ;;  %v5490_v21 = vld [vmem:[#allocation29_spill] sm:$0xff] }
 0x29f   :  { %v1401_v27 = vadd.f32 0.5, %v1369_v22  ;;  %v3696_v5 = vpop.eup %3695  ;;  %v1363_v48 = vmul.f32 0.5, %v3694_v28  ;;  %v2138_v22 = vadd.f32 %v4853_v6, %v2026_v52  ;;  %v2155_v28 = vmul.f32 0.5, %v2139_v15 }
 0x2a0   :  { %v3698_v30 = vpop.eup %3697  ;;  %v1396_v8 = vadd.f32 0.5, %v1364_v35  ;;  %v1362_v14 = vmul.f32 0.5, %v3696_v5  ;;  %v2136_v37 = vadd.f32 %v5038_v43, %v2024_v57  ;;  %v5480_v35 = vld [vmem:[#allocation26_spill] sm:$0xff]  ;;  %v2153_v43 = vmul.f32 0.5, %v2137_v26 }
 0x2a1   :  { %v1433_v40 = vpack.c.bf16 %v1401_v27, %v1400_v49  ;;  %v3700_v24 = vpop.eup %3699  ;;  %v1395_v50 = vadd.f32 0.5, %v1363_v48  ;;  %v1361_v2 = vmul.f32 0.5, %v3698_v30  ;;  %v5477_v49 = vld [vmem:[#allocation9_spill] sm:$0xff]  ;;  %v5478_v27 = vld [vmem:[#allocation10_spill] sm:$0xff]  ;;  %v2154_v9 = vmul.f32 0.5, %v2138_v22 }
 0x2a2   :  { %v1431_v23 = vpack.c.bf16 %v1397_v16, %v1396_v8  ;;  %v3702_v41 = vpop.eup %3701  ;;  %v1394_v39 = vadd.f32 0.5, %v1362_v14  ;;  %v1360_v42 = vmul.f32 0.5, %v3700_v24  ;;  %v5479_v53 = vpack.c.bf16 %v5477_v49, %v5478_v27  ;;  %v1935_v16 = vpop.permute.xlu0 %1934  ;;  %v5493_v49 = vld [vmem:[#allocation19_spill] sm:$0xff] }
 0x2a3   :  { %3257 = vmatprep.subr.bf16.mxu0 %v1433_v40  ;;  %v3704_v11 = vpop.eup %3703  ;;  %v1393_v56 = vadd.f32 0.5, %v1361_v2  ;;  %v1359_v60 = vmul.f32 0.5, %v3702_v41  ;;  %v5482_v5 = vpack.c.bf16 %v5480_v35, %v5481_v1  ;;  %3717 = vtanh.f32 %v2155_v28  ;;  %v5486_v41 = vld [vmem:[#allocation22_spill] sm:$0xff]  ;;  %v5499_v1 = vld [vmem:[#allocation17_spill] sm:$0xff] }
 0x2a4   :  { %3258 = vmatpush3.bf16.msra.mxu0 %v5475_v55  ;;  %v1430_v20 = vpack.c.bf16 %v1395_v50, %v1394_v39  ;;  %v1392_v3 = vadd.f32 0.5, %v1360_v42  ;;  %v1358_v6 = vmul.f32 0.5, %v3704_v11  ;;  %v3706_v45 = vpop.eup %3705  ;;  %v2134_v58 = vadd.f32 %v5057_v33, %v2022_v36  ;;  %v5484_v55 = vld [vmem:[#allocation23_spill] sm:$0xff]  ;;  %v5498_v35 = vld [vmem:[#allocation18_spill] sm:$0xff] }
 0x2a5   :  { %3259 = vmatprep.subr.bf16.mxu0 %v1432_v51  ;;  %v1391_v40 = vadd.f32 0.5, %v1359_v60  ;;  %v3708_v51 = vpop.eup %3707  ;;  %3719 = vtanh.f32 %v2154_v9  ;;  %v2152_v48 = vmul.f32 0.5, %v2136_v37  ;;  %v2021_v0 = vmul.f32 %v5033_v38, %v1950_v17 }
 0x2a6   :  { %v1429_v7 = vpack.c.bf16 %v1393_v56, %v1392_v3  ;;  %v1390_v62 = vadd.f32 0.5, %v1358_v6  ;;  %v5485_v19 = vpack.c.bf16 %v5483_v63, %v5484_v55  ;;  %v2193_v8 = vmul.f32 0.5, %v3706_v45  ;;  %v3710_v33 = vpop.eup %3709  ;;  %v2053_v2 = vpop.permute.xlu0 %2052  ;;  %v3540_v45 = vld [vmem:[%s5397_s6 + $0x14] ss:$8 sps:$4 sm:$0xff]  }
 0x2a7   :  { %v2192_v46 = vmul.f32 0.5, %v3708_v51  ;;  %v2151_v14 = vmul.f32 0.5, %v2135_v25  ;;  %v2020_v24 = vmul.f32 %v5033_v38, %v1945_v59  ;;  %3721 = vtanh.f32 %v2153_v43  ;;  %v5489_v59 = vld [vmem:[#allocation30_spill] sm:$0xff] }
 0x2a8   :  { %3260 = vmatpush3.bf16.msra.mxu0 %v5476_v54  ;;  %v1428_v30 = vpack.c.bf16 %v1391_v40, %v1390_v62  ;;  %v2150_v12 = vmul.f32 0.5, %v2134_v58  ;;  %v2133_v29 = vadd.f32 %v2068_v44, %v2021_v0  ;;  %3723 = vtanh.f32 %v2152_v48 }
 0x2a9   :  { %3261 = vmatprep.subr.bf16.mxu0 %v1431_v23  ;;  %v2132_v4 = vadd.f32 %v2063_v13, %v2020_v24  ;;  %v2058_v23 = vpop.permute.xlu1 %2057  ;;  %v3712_v50 = vpop.eup %3711  ;;  %v2019_v17 = vmul.f32 %v5033_v38, %v1940_v10  ;;  %v5488_v52 = vpack.c.bf16 %v5486_v41, %v5487_v61  ;;  %3725 = vtanh.f32 %v2151_v14  ;;  %v5492_v13 = vld [vmem:[#allocation20_spill] sm:$0xff] }
 0x2aa   :  { %v2018_v54 = vmul.f32 %v5033_v38, %v1935_v16  ;;  %v5491_v39 = vpack.c.bf16 %v5489_v59, %v5490_v21  ;;  %v2208_v42 = vadd.f32 0.5, %v2192_v46  ;;  %v2209_v11 = vadd.f32 0.5, %v2193_v8  ;;  %v3714_v47 = vpop.eup %3713  ;;  %v5495_v38 = vld [vmem:[#allocation28_spill] sm:$0xff]  ;;  %v3545_v59 = vld [vmem:[%s5397_s6 + $0x20] ss:$8 sps:$4 sm:$0xff]  }
 0x2ab   :  { %3727 = vtanh.f32 %v2150_v12  ;;  %v2149_v15 = vmul.f32 0.5, %v2133_v29  ;;  %v2131_v22 = vadd.f32 %v2058_v23, %v2019_v17  ;;  %v3716_v44 = vpop.eup %3715  ;;  %v2190_v56 = vmul.f32 0.5, %v3712_v50  ;;  %v3543_v14 = vld [vmem:[%s5397_s6 + $0x24] ss:$8 sps:$4 sm:$0xff]  }
 0x2ac   :  { %3262 = vmatpush3.bf16.msra.mxu0 %v5479_v53  ;;  %v2148_v60 = vmul.f32 0.5, %v2132_v4  ;;  %v2130_v34 = vadd.f32 %v2053_v2, %v2018_v54  ;;  %v5494_v27 = vpack.c.bf16 %v5492_v13, %v5493_v49  ;;  %v5496_v53 = vld [vmem:[#allocation27_spill] sm:$0xff]  ;;  %v2233_v3 = vpack.c.bf16 %v2209_v11, %v2208_v42 }
 0x2ad   :  { %3263 = vmatprep.subr.bf16.mxu0 %v1430_v20  ;;  %v2191_v20 = vmul.f32 0.5, %v3710_v33  ;;  %v5497_v57 = vpack.c.bf16 %v5495_v38, %v5496_v53  ;;  %v2189_v6 = vmul.f32 0.5, %v3714_v47  ;;  %v2188_v28 = vmul.f32 0.5, %v3716_v44  ;;  %v3551_v49 = vld [vmem:[%s5397_s6 + $0x40] ss:$8 sps:$4 sm:$0xff]  }
 0x2ae   :  { %3729 = vtanh.f32 %v2149_v15  ;;  %v2147_v9 = vmul.f32 0.5, %v2131_v22  ;;  %v2146_v37 = vmul.f32 0.5, %v2130_v34  ;;  %v3549_v34 = vld [vmem:[%s5397_s6 + $0x44] ss:$8 sps:$4 sm:$0xff]   ;;  %v3554_v38 = vld [vmem:[%s5397_s6 + $0x50] ss:$8 sps:$4 sm:$0xff]  }
 0x2af   :  { %3731 = vtanh.f32 %v2148_v60  ;;  %v2207_v40 = vadd.f32 0.5, %v2191_v20  ;;  %v2204_v25 = vadd.f32 0.5, %v2188_v28  ;;  %v2205_v10 = vadd.f32 0.5, %v2189_v6  ;;  %v3548_v60 = vld [vmem:[%s5397_s6 + $0x30] ss:$8 sps:$4 sm:$0xff]  }
 0x2b0   :  { %3264 = vmatpush3.bf16.msra.mxu0 %v5482_v5  ;;  %v3718_v26 = vpop.eup %3717  ;;  %v5500_v5 = vpack.c.bf16 %v5498_v35, %v5499_v1  ;;  %3733 = vtanh.f32 %v2147_v9  ;;  %v3555_v53 = vld [vmem:[%s5397_s6 + $0x64] ss:$8 sps:$4 sm:$0xff]   ;;  %v3558_v6 = vld [vmem:[%s5397_s6 + $0x74] ss:$8 sps:$4 sm:$0xff]   ;;  %v3560_v9 = vld [vmem:[%s5397_s6 + $0x70] ss:$8 sps:$4 sm:$0xff]  }
 0x2b1   :  { %3265 = vmatprep.subr.bf16.mxu0 %v1429_v7  ;;  %v2206_v7 = vadd.f32 0.5, %v2190_v56  ;;  %v2187_v51 = vmul.f32 0.5, %v3718_v26  ;;  %3735 = vtanh.f32 %v2146_v37  ;;  %v3561_v26 = vld [vmem:[%s5403_s12] sm:$0xff]   ;;  %v3564_v35 = vld [vmem:[%s5403_s12 + $0x18] sm:$0xff]  }
 0x2b2   :  { %v3720_v36 = vpop.eup %3719  ;;  %v3565_v1 = vld [vmem:[%s5403_s12 + $0x20] sm:$0xff]  }
 0x2b3   :  { %v2186_v43 = vmul.f32 0.5, %v3720_v36  ;;  %v2232_v58 = vpack.c.bf16 %v2207_v40, %v2206_v7  ;;  %v2203_v46 = vadd.f32 0.5, %v2187_v51  ;;  %v3563_v7 = vld [vmem:[%s5403_s12 + $0x10] sm:$0xff]  }
 0x2b4   :  { %3266 = vmatpush3.bf16.msra.mxu0 %v5485_v19  ;;  %v3722_v62 = vpop.eup %3721  ;;  %v3542_v19 = vld [vmem:[%s5397_s6 + $0x10] ss:$8 sps:$4 sm:$0xff]  }
 0x2b5   :  { %3267 = vmatprep.subr.bf16.mxu0 %v1428_v30  ;;  %v3724_v16 = vpop.eup %3723  ;;  %v2231_v30 = vpack.c.bf16 %v2205_v10, %v2204_v25  ;;  %v2185_v63 = vmul.f32 0.5, %v3722_v62  ;;  %v2202_v8 = vadd.f32 0.5, %v2186_v43  ;;  %v3567_v25 = vld [vmem:[%s5403_s12 + $0x30] sm:$0xff]   ;;  %v3568_v62 = vld [vmem:[%s5403_s12 + $0x38] sm:$0xff]  }
 0x2b6   :  { %v3726_v48 = vpop.eup %3725  ;;  %v2184_v55 = vmul.f32 0.5, %v3724_v16 }
 0x2b7   :  { %v2183_v24 = vmul.f32 0.5, %v3726_v48  ;;  %v2201_v33 = vadd.f32 0.5, %v2185_v63  ;;  %v2230_v23 = vpack.c.bf16 %v2203_v46, %v2202_v8 }
 0x2b8   :  { %3268 = vmatpush3.bf16.msra.mxu0 %v5488_v52  ;;  %v3728_v0 = vpop.eup %3727  ;;  %v2200_v4 = vadd.f32 0.5, %v2184_v55 }
 0x2b9   :  { %3269 = vmatprep.subr.bf16.mxu0 %v5491_v39  ;;  %v2182_v12 = vmul.f32 0.5, %v3728_v0  ;;  %v2199_v17 = vadd.f32 0.5, %v2183_v24  ;;  %v3546_v39 = vld [vmem:[%s5397_s6 + $0x34] ss:$8 sps:$4 sm:$0xff]   ;;  %v5210_v0 = vpop.permute.xlu0 %2322 }
 0x2ba   :  { %v2229_v54 = vpack.c.bf16 %v2201_v33, %v2200_v4 }
 0x2bb   :  { %v3730_v29 = vpop.eup %3729  ;;  %v2198_v2 = vadd.f32 0.5, %v2182_v12 }
 0x2bc   :  { %3270 = vmatpush3.bf16.msra.mxu0 %v5494_v27  ;;  %v3732_v50 = vpop.eup %3731  ;;  %v2181_v61 = vmul.f32 0.5, %v3730_v29  ;;  %v3552_v27 = vld [vmem:[%s5397_s6 + $0x54] ss:$8 sps:$4 sm:$0xff]  }
 0x2bd   :  { %3271 = vmatprep.subr.bf16.mxu0 %v5497_v57  ;;  %v3734_v41 = vpop.eup %3733  ;;  %v2180_v52 = vmul.f32 0.5, %v3732_v50  ;;  %v2228_v42 = vpack.c.bf16 %v2199_v17, %v2198_v2  ;;  %v5155_v57 = vpop.permute.xlu1 %2327 }
 0x2be   :  { %v3736_v21 = vpop.eup %3735  ;;  %v2197_v11 = vadd.f32 0.5, %v2181_v61  ;;  %v2179_v15 = vmul.f32 0.5, %v3734_v41  ;;  %v5214_v55 = vpop.permute.xlu0 %2312 }
 0x2bf   :  { %v2196_v47 = vadd.f32 0.5, %v2180_v52  ;;  %v2178_v22 = vmul.f32 0.5, %v3736_v21 }
 0x2c0   :  { %3272 = vmatpush3.bf16.msra.mxu0 %v5500_v5  ;;  %v2195_v44 = vadd.f32 0.5, %v2179_v15 }
 0x2c1   :  { %3389 = vmatprep.subr.bf16.mxu0 %v2233_v3  ;;  %v2194_v20 = vadd.f32 0.5, %v2178_v22  ;;  %v2227_v56 = vpack.c.bf16 %v2197_v11, %v2196_v47  ;;  %v5163_v28 = vpop.permute.xlu1 %2317 }
 0x2c2   :  { %v5218_v8 = vpop.permute.xlu0 %2302 }
 0x2c3   :  { %1643 = vmatmul.mubr.bf16.vlgmr.msra.gmra.mxu0 %v3537_v18  ;;  %v2226_v13 = vpack.c.bf16 %v2195_v44, %v2194_v20  ;;  %v3562_v18 = vld [vmem:[%s5403_s12 + $0x8] sm:$0xff]  }
 0x2c4   :  { %3390 = vmatpush3.bf16.msra.mxu0 %v2233_v3  ;;  %1650 = vmatprep.mubr.bf16.mxu0 %v3540_v45  ;;  %v3557_v3 = vld [vmem:[%s5397_s6 + $0x60] ss:$8 sps:$4 sm:$0xff]   ;;  %s3023_s6 = sshll.u32 %s3858_s23, 4  ;;  %s3024_s6 = int_to_ptr.vmem [resolvable:$true] %s3023_s6 }
 0x2c5   :  { %3391 = vmatprep.subr.bf16.mxu0 %v2232_v58  ;;  %v5171_v37 = vpop.permute.xlu1 %2307  ;;  %v3566_v45 = vld [vmem:[%s5403_s12 + $0x28] sm:$0xff]   ;;  %s3835_s10 = scalar_lea.vmem %s3024_s6, 16  ;;  %s3839_s17 = scalar_lea.vmem %s3024_s6, 32 }
 0x2c6   :  { %p3836_p0 = scmp.ne.s32.totalorder %s3024_s6, %s3835_s10  ;;  %p3840_p1 = scmp.lt.s32.totalorder %s3024_s6, %s3024_s6 }
 0x2c7   :  { %p3841_p2 = scmp.lt.s32.totalorder %s3839_s17, %s3835_s10 }
 0x2c8   :  { %3392 = vmatpush3.bf16.msra.mxu0 %v2232_v58 }
 0x2c9   :  { %3393 = vmatprep.subr.bf16.mxu0 %v2231_v30  ;;  %v5179_v40 = vpop.permute.xlu1 %2297  ;;  %p3842_p3 = por %p3841_p2, %p3840_p1 }
 0x2cb   :  { %1651 = vmatmul.mubr.bf16.gmra.mxu0 %v3542_v19  ;;  %p3843_p4 = pnand %p3842_p3, %p3836_p0 }
 0x2cc   :  { %3394 = vmatpush3.bf16.msra.mxu0 %v2231_v30  ;;  %1658 = vmatprep.mubr.bf16.mxu0 %v3543_v14  ;;  %v5222_v14 = vpop.permute.xlu0 %2292 }
 0x2cd   :  { %3395 = vmatprep.subr.bf16.mxu0 %v2230_v23  ;;  %v5181_v36 = vpop.permute.xlu1 %2287 }
 0x2d0   :  { %3396 = vmatpush3.bf16.msra.mxu0 %v2230_v23  ;;  %v5226_v12 = vpop.permute.xlu0 %2282 }
 0x2d1   :  { %3397 = vmatprep.subr.bf16.mxu0 %v2229_v54  ;;  %v5189_v5 = vpop.permute.xlu1 %2277 }
 0x2d3   :  { %1659 = vmatmul.mubr.bf16.gmra.mxu0 %v3545_v59 }
 0x2d4   :  { %3398 = vmatpush3.bf16.msra.mxu0 %v2229_v54  ;;  %1666 = vmatprep.mubr.bf16.mxu0 %v3546_v39  ;;  %v5230_v33 = vpop.permute.xlu0 %2272 }
 0x2d5   :  { %3399 = vmatprep.subr.bf16.mxu0 %v2228_v42  ;;  %v5197_v10 = vpop.permute.xlu1 %2267 }
 0x2d8   :  { %3400 = vmatpush3.bf16.msra.mxu0 %v2228_v42  ;;  %v5234_v23 = vpop.permute.xlu0 %2262 }
 0x2d9   :  { %3401 = vmatprep.subr.bf16.mxu0 %v2227_v56  ;;  %v5202_v51 = vpop.permute.xlu1 %2257 }
 0x2db   :  { %1667 = vmatmul.mubr.bf16.gmra.mxu0 %v3548_v60 }
 0x2dc   :  { %3402 = vmatpush3.bf16.msra.mxu0 %v2227_v56  ;;  %1674 = vmatprep.mubr.bf16.mxu0 %v3549_v34  ;;  %v5238_v17 = vpop.permute.xlu0 %2252 }
 0x2dd   :  { %3403 = vmatprep.subr.bf16.mxu0 %v2226_v13  ;;  %v1458_v43 = vpop.permute.xlu1 %1457 }
 0x2e0   :  { %3404 = vmatpush3.bf16.msra.mxu0 %v2226_v13  ;;  %v1453_v41 = vpop.permute.xlu0 %1452 }
 0x2e1   :  { %v1468_v58 = vpop.permute.xlu1 %1467 }
 0x2e3   :  { %1675 = vmatmul.mubr.bf16.gmra.mxu0 %v3551_v49 }
 0x2e4   :  { %1682 = vmatprep.mubr.bf16.mxu0 %v3552_v27  ;;  %v1463_v52 = vpop.permute.xlu0 %1462 }
 0x2e5   :  { %v5204_v16 = vpop.permute.xlu1 %1477 }
 0x2e8   :  { %v1473_v59 = vpop.permute.xlu0 %1472 }
 0x2e9   :  { %v5206_v48 = vpop.permute.xlu1 %1487 }
 0x2eb   :  { %1683 = vmatmul.mubr.bf16.gmra.mxu0 %v3554_v38 }
 0x2ec   :  { %1690 = vmatprep.mubr.bf16.mxu0 %v3555_v53  ;;  %v5248_v39 = vpop.permute.xlu0 %1482 }
 0x2ed   :  { %v5208_v30 = vpop.permute.xlu1 %1497 }
 0x2f0   :  { %v5252_v47 = vpop.permute.xlu0 %1492 }
 0x2f1   :  { %v5212_v63 = vpop.permute.xlu1 %1507 }
 0x2f3   :  { %1691 = vmatmul.mubr.bf16.gmra.mxu0 %v3557_v3 }
 0x2f4   :  { %1698 = vmatprep.mubr.bf16.mxu0 %v3558_v6  ;;  %v5256_v34 = vpop.permute.xlu0 %1502 }
 0x2f5   :  { %v5216_v19 = vpop.permute.xlu1 %1517 }
 0x2f9   :  { %v5220_v46 = vpop.permute.xlu1 %1527 }
 0x2fb   :  { %1699 = vmatmul.mubr.bf16.gmra.mxu0 %v3560_v9 }
 0x2fc   :  { %3405 = vmatprep.mubr.bf16.mxu0 %v3561_v26 }
 0x2fd   :  { %v5224_v24 = vpop.permute.xlu1 %1794 }
 0x301   :  { %v5228_v29 = vpop.permute.xlu1 %1804 }
 0x303   :  { %3406 = vmatmul.mubr.bf16.vlgmr.msra.gmra.mxu0 %v3562_v18  ;;  %v5260_v18 = vpop.permute.xlu0 %1512 }
 0x304   :  { %3409 = vmatprep.mubr.bf16.mxu0 %v3563_v7 }
 0x305   :  { %v5232_v4 = vpop.permute.xlu1 %1814 }
 0x309   :  { %v5236_v50 = vpop.permute.xlu1 %1824 }
 0x30b   :  { %3410 = vmatmul.mubr.bf16.gmra.mxu0 %v3564_v35 }
 0x30c   :  { %3413 = vmatprep.mubr.bf16.mxu0 %v3565_v1 }
 0x30d   :  { %v5240_v2 = vpop.permute.xlu1 %1834 }
 0x311   :  { %v5242_v61 = vpop.permute.xlu1 %1844 }
 0x313   :  { %3414 = vmatmul.mubr.bf16.gmra.mxu0 %v3566_v45 }
 0x314   :  { %3417 = vmatprep.mubr.bf16.mxu0 %v3567_v25 }
 0x315   :  { %v5244_v54 = vpop.permute.xlu1 %1854 }
 0x319   :  { %v5246_v21 = vpop.permute.xlu1 %2581 }
 0x31b   :  { %3418 = vmatmul.mubr.bf16.gmra.mxu0 %v3568_v62 }
 0x31d   :  { %v5250_v42 = vpop.permute.xlu1 %2591 }
 0x321   :  { %v5254_v15 = vpop.permute.xlu1 %2601 }
 0x325   :  { %v5258_v27 = vpop.permute.xlu1 %2611 }
 0x329   :  { %v5262_v35 = vpop.permute.xlu1 %2621 }
 0x383   :  { %v3273_v11 = vpop.f32.mrf.mxu0 }
 0x385   :  { %v3274_v22 = vpop.f32.mrf.mxu0 }
 0x386   :  { %v3275_v44 = vadd.f32 %v3274_v22, %v3273_v11  ;;  %v3570_v22 = vld [vmem:[%s5405_s14 + $0x10] sm:$0xff]  }
 0x387   :  { %v3276_v20 = vpop.f32.mrf.mxu0  ;;  %3441 = vmatprep.mubr.bf16.mxu1 %v3570_v22 }
 0x388   :  { %v1645_v56 = vadd.f32 %v3275_v44, %v1453_v41  ;;  %v5270_v44 = vpop.permute.xlu0 %1522 }
 0x389   :  { %v3277_v60 = vpop.f32.mrf.mxu0 }
 0x38a   :  { %v1707_v13 = vmul.f32 0.5, %v1645_v56  ;;  %v3278_v49 = vadd.f32 %v3277_v60, %v3276_v20  ;;  %v5272_v56 = vpop.permute.xlu1 %2631 }
 0x38b   :  { %v3279_v38 = vpop.f32.mrf.mxu0 }
 0x38c   :  { %3737 = vtanh.f32 %v1707_v13  ;;  %v1648_v53 = vadd.f32 %v3278_v49, %v1458_v43  ;;  %v3569_v43 = vld [vmem:[%s5405_s14] sm:$0xff]  }
 0x38d   :  { %v3280_v3 = vpop.f32.mrf.mxu0  ;;  %3437 = vmatprep.mubr.bf16.mxu0 %v3569_v43 }
 0x38e   :  { %v1708_v6 = vmul.f32 0.5, %v1648_v53  ;;  %v3281_v9 = vadd.f32 %v3280_v3, %v3279_v38 }
 0x38f   :  { %v3282_v26 = vpop.f32.mrf.mxu0 }
 0x390   :  { %3739 = vtanh.f32 %v1708_v6  ;;  %v1653_v7 = vadd.f32 %v3281_v9, %v1463_v52  ;;  %v1790_v9 = vpop.permute.xlu0 %1789 }
 0x391   :  { %v3283_v1 = vpop.f32.mrf.mxu0 }
 0x392   :  { %v1709_v45 = vmul.f32 0.5, %v1653_v7  ;;  %v3284_v25 = vadd.f32 %v3283_v1, %v3282_v26 }
 0x393   :  { %v3285_v62 = vpop.f32.mrf.mxu0 }
 0x394   :  { %3741 = vtanh.f32 %v1709_v45  ;;  %v1656_v41 = vadd.f32 %v3284_v25, %v1468_v58  ;;  %v5275_v45 = vpop.permute.xlu1 %2641 }
 0x395   :  { %v3286_v11 = vpop.f32.mrf.mxu0 }
 0x396   :  { %v1710_v52 = vmul.f32 0.5, %v1656_v41  ;;  %v3287_v20 = vadd.f32 %v3286_v11, %v3285_v62 }
 0x397   :  { %v3288_v60 = vpop.f32.mrf.mxu0 }
 0x398   :  { %3743 = vtanh.f32 %v1710_v52  ;;  %v1661_v58 = vadd.f32 %v3287_v20, %v1473_v59 }
 0x399   :  { %v3738_v13 = vpop.eup %3737  ;;  %v3289_v49 = vpop.f32.mrf.mxu0 }
 0x39a   :  { %v1739_v38 = vmul.f32 0.5, %v3738_v13  ;;  %v1711_v53 = vmul.f32 0.5, %v1661_v58  ;;  %v3290_v3 = vadd.f32 %v3289_v49, %v3288_v60 }
 0x39b   :  { %v3291_v6 = vpop.f32.mrf.mxu0 }
 0x39c   :  { %v1755_v26 = vadd.f32 0.5, %v1739_v38  ;;  %3745 = vtanh.f32 %v1711_v53  ;;  %v1664_v7 = vadd.f32 %v3290_v3, %v5204_v16  ;;  %v5279_v38 = vpop.permute.xlu1 %2891 }
 0x39d   :  { %v3740_v1 = vpop.eup %3739  ;;  %v3292_v25 = vpop.f32.mrf.mxu0 }
 0x39e   :  { %v1867_v62 = vmul.f32 %v1790_v9, %v1755_v26  ;;  %v1740_v41 = vmul.f32 0.5, %v3740_v1  ;;  %v1712_v11 = vmul.f32 0.5, %v1664_v7  ;;  %v3293_v43 = vadd.f32 %v3292_v25, %v3291_v6  ;;  %v1800_v7 = vpop.permute.xlu0 %1799 }
 0x39f   :  { %v3294_v59 = vpop.f32.mrf.mxu0 }
 0x3a0   :  { %v1756_v22 = vadd.f32 0.5, %v1740_v41  ;;  %3747 = vtanh.f32 %v1712_v11  ;;  %v1669_v52 = vadd.f32 %v3293_v43, %v5248_v39 }
 0x3a1   :  { %v3742_v20 = vpop.eup %3741  ;;  %v3295_v60 = vpop.f32.mrf.mxu0 }
 0x3a2   :  { %v1868_v58 = vmul.f32 %v5224_v24, %v1756_v22  ;;  %v1741_v13 = vmul.f32 0.5, %v3742_v20  ;;  %v1713_v49 = vmul.f32 0.5, %v1669_v52  ;;  %v3296_v16 = vadd.f32 %v3295_v60, %v3294_v59  ;;  %v5283_v20 = vpop.permute.xlu1 %2896 }
 0x3a3   :  { %v3297_v53 = vpop.f32.mrf.mxu0 }
 0x3a4   :  { %v1883_v3 = vadd.f32 %v1868_v58, %v1867_v62  ;;  %v1757_v9 = vadd.f32 0.5, %v1741_v13  ;;  %3749 = vtanh.f32 %v1713_v49  ;;  %v1672_v6 = vadd.f32 %v3296_v16, %v5206_v48 }
 0x3a5   :  { %v3744_v26 = vpop.eup %3743  ;;  %v3298_v1 = vpop.f32.mrf.mxu0 }
 0x3a6   :  { %v1869_v25 = vmul.f32 %v1800_v7, %v1757_v9  ;;  %v1742_v39 = vmul.f32 0.5, %v3744_v26  ;;  %v1714_v41 = vmul.f32 0.5, %v1672_v6  ;;  %v3299_v11 = vadd.f32 %v3298_v1, %v3297_v53  ;;  %v1810_v6 = vpop.permute.xlu0 %1809 }
 0x3a7   :  { %v3300_v43 = vpop.f32.mrf.mxu0 }
 0x3a8   :  { %v1884_v24 = vadd.f32 %v1883_v3, %v1869_v25  ;;  %v1758_v22 = vadd.f32 0.5, %v1742_v39  ;;  %3751 = vtanh.f32 %v1714_v41  ;;  %v1677_v59 = vadd.f32 %v3299_v11, %v5252_v47  ;;  %v5287_v39 = vpop.permute.xlu1 %2901 }
 0x3a9   :  { %v3746_v52 = vpop.eup %3745  ;;  %v3301_v62 = vpop.f32.mrf.mxu0 }
 0x3aa   :  { %v1870_v60 = vmul.f32 %v5228_v29, %v1758_v22  ;;  %v1743_v48 = vmul.f32 0.5, %v3746_v52  ;;  %v1715_v58 = vmul.f32 0.5, %v1677_v59  ;;  %v3302_v13 = vadd.f32 %v3301_v62, %v3300_v43 }
 0x3ab   :  { %v3303_v49 = vpop.f32.mrf.mxu0 }
 0x3ac   :  { %v1885_v16 = vadd.f32 %v1884_v24, %v1870_v60  ;;  %v1759_v9 = vadd.f32 0.5, %v1743_v48  ;;  %3753 = vtanh.f32 %v1715_v58  ;;  %v1680_v53 = vadd.f32 %v3302_v13, %v5208_v30  ;;  %v1820_v48 = vpop.permute.xlu0 %1819 }
 0x3ad   :  { %v3748_v3 = vpop.eup %3747  ;;  %v3304_v26 = vpop.f32.mrf.mxu0 }
 0x3ae   :  { %v1871_v7 = vmul.f32 %v1810_v6, %v1759_v9  ;;  %v1744_v47 = vmul.f32 0.5, %v3748_v3  ;;  %v1716_v1 = vmul.f32 0.5, %v1680_v53  ;;  %v3305_v25 = vadd.f32 %v3304_v26, %v3303_v49 }
 0x3af   :  { %v3306_v41 = vpop.f32.mrf.mxu0 }
 0x3b0   :  { %v1886_v29 = vadd.f32 %v1885_v16, %v1871_v7  ;;  %v1760_v11 = vadd.f32 0.5, %v1744_v47  ;;  %3755 = vtanh.f32 %v1716_v1  ;;  %v1685_v43 = vadd.f32 %v3305_v25, %v5256_v34  ;;  %v5292_v16 = vpop.permute.xlu1 %2906 }
 0x3b1   :  { %v3750_v24 = vpop.eup %3749  ;;  %v3307_v22 = vpop.f32.mrf.mxu0 }
 0x3b2   :  { %v1872_v59 = vmul.f32 %v5232_v4, %v1760_v11  ;;  %v1745_v30 = vmul.f32 0.5, %v3750_v24  ;;  %v1717_v52 = vmul.f32 0.5, %v1685_v43  ;;  %v3308_v62 = vadd.f32 %v3307_v22, %v3306_v41 }
 0x3b3   :  { %v3309_v60 = vpop.f32.mrf.mxu0 }
 0x3b4   :  { %v1887_v58 = vadd.f32 %v1886_v29, %v1872_v59  ;;  %v1761_v13 = vadd.f32 0.5, %v1745_v30  ;;  %3757 = vtanh.f32 %v1717_v52  ;;  %v1688_v49 = vadd.f32 %v3308_v62, %v5212_v63  ;;  %v5296_v24 = vpop.permute.xlu1 %2916 }
 0x3b5   :  { %v3752_v9 = vpop.eup %3751  ;;  %v3310_v53 = vpop.f32.mrf.mxu0 }
 0x3b6   :  { %v1873_v3 = vmul.f32 %v1820_v48, %v1761_v13  ;;  %v1746_v34 = vmul.f32 0.5, %v3752_v9  ;;  %v1718_v6 = vmul.f32 0.5, %v1688_v49  ;;  %v3311_v26 = vadd.f32 %v3310_v53, %v3309_v60  ;;  %v1830_v60 = vpop.permute.xlu0 %1829 }
 0x3b7   :  { %v3312_v7 = vpop.f32.mrf.mxu0 }
 0x3b8   :  { %v1888_v4 = vadd.f32 %v1887_v58, %v1873_v3  ;;  %v1762_v47 = vadd.f32 0.5, %v1746_v34  ;;  %3759 = vtanh.f32 %v1718_v6  ;;  %v1693_v1 = vadd.f32 %v3311_v26, %v5260_v18  ;;  %v5300_v6 = vpop.permute.xlu1 %2926 }
 0x3b9   :  { %v3754_v25 = vpop.eup %3753  ;;  %v3313_v41 = vpop.f32.mrf.mxu0 }
 0x3ba   :  { %v1874_v29 = vmul.f32 %v5236_v50, %v1762_v47  ;;  %v1747_v11 = vmul.f32 0.5, %v3754_v25  ;;  %v1719_v63 = vmul.f32 0.5, %v1693_v1  ;;  %v3314_v43 = vadd.f32 %v3313_v41, %v3312_v7 }
 0x3bb   :  { %v3315_v22 = vpop.f32.mrf.mxu0 }
 0x3bc   :  { %v1889_v59 = vadd.f32 %v1888_v4, %v1874_v29  ;;  %v1763_v30 = vadd.f32 0.5, %v1747_v11  ;;  %3761 = vtanh.f32 %v1719_v63  ;;  %v1696_v52 = vadd.f32 %v3314_v43, %v5216_v19  ;;  %v1840_v63 = vpop.permute.xlu0 %1839 }
 0x3bd   :  { %v3756_v62 = vpop.eup %3755  ;;  %v3316_v48 = vpop.f32.mrf.mxu0 }
 0x3be   :  { %v1875_v58 = vmul.f32 %v1830_v60, %v1763_v30  ;;  %v1748_v18 = vmul.f32 0.5, %v3756_v62  ;;  %v1720_v13 = vmul.f32 0.5, %v1696_v52  ;;  %v3317_v49 = vadd.f32 %v3316_v48, %v3315_v22  ;;  %v5308_v30 = vpop.permute.xlu1 %2936 }
 0x3bf   :  { %v3318_v9 = vpop.f32.mrf.mxu0 }
 0x3c0   :  { %v1890_v50 = vadd.f32 %v1889_v59, %v1875_v58  ;;  %v1764_v53 = vadd.f32 0.5, %v1748_v18  ;;  %3763 = vtanh.f32 %v1720_v13  ;;  %v1701_v3 = vadd.f32 %v3317_v49, %v5270_v44  ;;  %v1850_v13 = vpop.permute.xlu0 %1849 }
 0x3c1   :  { %v3758_v34 = vpop.eup %3757  ;;  %v3319_v26 = vpop.f32.mrf.mxu0 }
 0x3c2   :  { %v1876_v7 = vmul.f32 %v5240_v2, %v1764_v53  ;;  %v1749_v19 = vmul.f32 0.5, %v3758_v34  ;;  %v1721_v4 = vmul.f32 0.5, %v1701_v3  ;;  %v3320_v47 = vadd.f32 %v3319_v26, %v3318_v9  ;;  %v5315_v53 = vpop.permute.xlu1 %2946 }
 0x3c3   :  { %v5303_v1 = vpop.f32.mrf.mxu0 }
 0x3c4   :  { %v1891_v25 = vadd.f32 %v1890_v50, %v1876_v7  ;;  %v1765_v41 = vadd.f32 0.5, %v1749_v19  ;;  %3765 = vtanh.f32 %v1721_v4  ;;  %v1704_v29 = vadd.f32 %v3320_v47, %v5220_v46 }
 0x3c5   :  { %v3760_v11 = vpop.eup %3759  ;;  %v5306_v43 = vpop.f32.mrf.mxu0 }
 0x3c6   :  { %v1877_v44 = vmul.f32 %v1840_v63, %v1765_v41  ;;  %v1750_v22 = vmul.f32 0.5, %v3760_v11  ;;  %v1722_v59 = vmul.f32 0.5, %v1704_v29 }
 0x3c7   :  { %v5310_v2 = vpop.f32.mrf.mxu0 }
 0x3c8   :  { %v1892_v52 = vadd.f32 %v1891_v25, %v1877_v44  ;;  %v1766_v62 = vadd.f32 0.5, %v1750_v22  ;;  %3767 = vtanh.f32 %v1722_v59  ;;  %v1860_v59 = vpop.permute.xlu0 %1859 }
 0x3c9   :  { %v3762_v60 = vpop.eup %3761  ;;  %v5312_v48 = vpop.f32.mrf.mxu0 }
 0x3ca   :  { %v1878_v58 = vmul.f32 %v5242_v61, %v1766_v62  ;;  %v1751_v46 = vmul.f32 0.5, %v3762_v60  ;;  %v5318_v61 = vpop.permute.xlu1 %2956 }
 0x3cb   :  { %v3411_v18 = vpop.f32.mrf.mxu0 }
 0x3cc   :  { %v1893_v49 = vadd.f32 %v1892_v52, %v1878_v58  ;;  %v1767_v9 = vadd.f32 0.5, %v1751_v46 }
 0x3cd   :  { %v3764_v50 = vpop.eup %3763  ;;  %v2428_v3 = vpop.f32.mrf.mxu0 }
 0x3ce   :  { %v1879_v34 = vmul.f32 %v1850_v13, %v1767_v9  ;;  %v1752_v26 = vmul.f32 0.5, %v3764_v50 }
 0x3cf   :  { %v3412_v7 = vpop.f32.mrf.mxu0 }
 0x3d0   :  { %v1894_v19 = vadd.f32 %v1893_v49, %v1879_v34  ;;  %v1768_v4 = vadd.f32 0.5, %v1752_v26  ;;  %v1865_v49 = vpop.permute.xlu1 %1864 }
 0x3d1   :  { %v3766_v47 = vpop.eup %3765  ;;  %v2431_v25 = vpop.f32.mrf.mxu0 }
 0x3d2   :  { %v1880_v41 = vmul.f32 %v5244_v54, %v1768_v4  ;;  %v1753_v29 = vmul.f32 0.5, %v3766_v47 }
 0x3d3   :  { %v3415_v11 = vpop.f32.mrf.mxu0 }
 0x3d4   :  { %v1895_v63 = vadd.f32 %v1894_v19, %v1880_v41  ;;  %v1769_v44 = vadd.f32 0.5, %v1753_v29  ;;  %v2453_v19 = vadd.f32 %v3415_v11, %v5218_v8  ;;  %v2440_v11 = vadd.f32 %v3412_v7, %v5181_v36 }
 0x3d5   :  { %v3768_v22 = vpop.eup %3767  ;;  %v2444_v52 = vpop.f32.mrf.mxu0  ;;  %v2421_v7 = vadd.f32 %v5303_v1, %v5234_v23 }
 0x3d6   :  { %v1881_v62 = vmul.f32 %v1860_v59, %v1769_v44  ;;  %v1754_v60 = vmul.f32 0.5, %v3768_v22 }
 0x3d7   :  { %v3416_v58 = vpop.f32.mrf.mxu0 }
 0x3d8   :  { %v1896_v46 = vadd.f32 %v1895_v63, %v1881_v62  ;;  %v1770_v13 = vadd.f32 0.5, %v1754_v60  ;;  %v2456_v34 = vadd.f32 %v3416_v58, %v5171_v37  ;;  %v2485_v62 = vmul.f32 0.5, %v2453_v19 }
 0x3d9   :  { %v2447_v9 = vpop.f32.mrf.mxu0  ;;  %v2445_v58 = vadd.f32 %v2444_v52, %v5222_v14  ;;  %v2429_v52 = vadd.f32 %v2428_v3, %v5230_v33 }
 0x3da   :  { %v1882_v50 = vmul.f32 %v1865_v49, %v1770_v13  ;;  %v2486_v41 = vmul.f32 0.5, %v2456_v34  ;;  %v2448_v63 = vadd.f32 %v2447_v9, %v5179_v40  ;;  %v2437_v40 = vadd.f32 %v3411_v18, %v5226_v12 }
 0x3db   :  { %v3419_v54 = vpop.f32.mrf.mxu0  ;;  %v2482_v13 = vmul.f32 0.5, %v2440_v11  ;;  %v2432_v49 = vadd.f32 %v2431_v25, %v5189_v5  ;;  %v2479_v12 = vmul.f32 0.5, %v2429_v52  ;;  %v2416_v5 = vadd.f32 %v5312_v48, %v5202_v51 }
 0x3dc   :  { %v5321_v26 = vadd.f32 %v1896_v46, %v1882_v50  ;;  %v2469_v4 = vadd.f32 %v3419_v54, %v5210_v0  ;;  %v2484_v46 = vmul.f32 0.5, %v2448_v63  ;;  %v2481_v14 = vmul.f32 0.5, %v2437_v40 }
 0x3dd   :  { %v2460_v47 = vpop.f32.mrf.mxu0  ;;  %v2480_v36 = vmul.f32 0.5, %v2432_v49  ;;  %v2477_v34 = vmul.f32 0.5, %v2421_v7 }
 0x3de   :  { %v2489_v29 = vmul.f32 0.5, %v2469_v4  ;;  %v2461_v44 = vadd.f32 %v2460_v47, %v5214_v55  ;;  %v2476_v4 = vmul.f32 0.5, %v2416_v5 }
 0x3df   :  { %v3420_v22 = vpop.f32.mrf.mxu0 }
 0x3e0   :  { %v2472_v59 = vadd.f32 %v3420_v22, %v5155_v57  ;;  %3769 = vtanh.f32 %v2489_v29  ;;  %v2487_v37 = vmul.f32 0.5, %v2461_v44  ;;  %v2483_v57 = vmul.f32 0.5, %v2445_v58 }
 0x3e1   :  { %v2463_v60 = vpop.f32.mrf.mxu0  ;;  %3771 = vtanh.f32 %v2486_v41 }
 0x3e2   :  { %v2490_v0 = vmul.f32 0.5, %v2472_v59  ;;  %v2464_v8 = vadd.f32 %v2463_v60, %v5163_v28  ;;  %3773 = vtanh.f32 %v2487_v37  ;;  %v2424_v28 = vadd.f32 %v5310_v2, %v5197_v10 }
 0x3e3   :  { %v2413_v10 = vadd.f32 %v5306_v43, %v5238_v17 }
 0x3e4   :  { %3775 = vtanh.f32 %v2490_v0  ;;  %v2488_v55 = vmul.f32 0.5, %v2464_v8  ;;  %v2478_v50 = vmul.f32 0.5, %v2424_v28 }
 0x3e5   :  { %3777 = vtanh.f32 %v2485_v62  ;;  %v2475_v48 = vmul.f32 0.5, %v2413_v10 }
 0x3e6   :  { %3779 = vtanh.f32 %v2488_v55 }
 0x3e7   :  { %3781 = vtanh.f32 %v2484_v46 }
 0x3e8   :  { %3783 = vtanh.f32 %v2483_v57 }
 0x3e9   :  { %3785 = vtanh.f32 %v2482_v13 }
 0x3ea   :  { %3787 = vtanh.f32 %v2481_v14 }
 0x3eb   :  { %3789 = vtanh.f32 %v2480_v36 }
 0x3ec   :  { %3791 = vtanh.f32 %v2479_v12 }
 0x3ed   :  { %v3770_v9 = vpop.eup %3769  ;;  %3793 = vtanh.f32 %v2478_v50 }
 0x3ee   :  { %v3772_v18 = vpop.eup %3771  ;;  %v2521_v33 = vmul.f32 0.5, %v3770_v9  ;;  %3795 = vtanh.f32 %v2477_v34 }
 0x3ef   :  { %v3774_v25 = vpop.eup %3773  ;;  %v2518_v19 = vmul.f32 0.5, %v3772_v18  ;;  %3797 = vtanh.f32 %v2476_v4 }
 0x3f0   :  { %v2519_v54 = vmul.f32 0.5, %v3774_v25  ;;  %v2537_v47 = vadd.f32 0.5, %v2521_v33  ;;  %3799 = vtanh.f32 %v2475_v48  ;;  %v3573_v48 = vld [vmem:[%s5405_s14 + $0x20] sm:$0xff]  }
 0x3f1   :  { %v3776_v3 = vpop.eup %3775  ;;  %v2534_v17 = vadd.f32 0.5, %v2518_v19 }
 0x3f2   :  { %v3778_v2 = vpop.eup %3777  ;;  %v2522_v23 = vmul.f32 0.5, %v3776_v3  ;;  %v2535_v22 = vadd.f32 0.5, %v2519_v54 }
 0x3f3   :  { %v3780_v1 = vpop.eup %3779  ;;  %v2517_v44 = vmul.f32 0.5, %v3778_v2 }
 0x3f4   :  { %v2538_v41 = vadd.f32 0.5, %v2522_v23  ;;  %v2520_v29 = vmul.f32 0.5, %v3780_v1  ;;  %v3782_v51 = vpop.eup %3781 }
 0x3f5   :  { %v3784_v62 = vpop.eup %3783  ;;  %v2516_v43 = vmul.f32 0.5, %v3782_v51  ;;  %v2533_v58 = vadd.f32 0.5, %v2517_v44  ;;  %v3572_v51 = vld [vmem:[%s5405_s14 + $0x18] sm:$0xff]   ;;  %v3574_v44 = vld [vmem:[%s5405_s14 + $0x28] sm:$0xff]  }
 0x3f6   :  { %v2536_v63 = vadd.f32 0.5, %v2520_v29  ;;  %v2562_v59 = vpack.c.bf16 %v2538_v41, %v2537_v47  ;;  %v3786_v60 = vpop.eup %3785  ;;  %v2515_v0 = vmul.f32 0.5, %v3784_v62  ;;  %v3571_v29 = vld [vmem:[%s5405_s14 + $0x8] sm:$0xff]  }
 0x3f7   :  { %v3788_v8 = vpop.eup %3787  ;;  %v2514_v11 = vmul.f32 0.5, %v3786_v60  ;;  %v2532_v46 = vadd.f32 0.5, %v2516_v43  ;;  %v2560_v55 = vpack.c.bf16 %v2534_v17, %v2533_v58 }
 0x3f8   :  { %3421 = vmatprep.subr.bf16.mxu0 %v2562_v59  ;;  %3453 = vmatprep.subr.bf16.mxu1 %v2562_v59  ;;  %v2561_v37 = vpack.c.bf16 %v2536_v63, %v2535_v22  ;;  %v3790_v40 = vpop.eup %3789  ;;  %v2513_v57 = vmul.f32 0.5, %v3788_v8  ;;  %v2531_v13 = vadd.f32 0.5, %v2515_v0  ;;  %v3575_v22 = vld [vmem:[%s5405_s14 + $0x30] sm:$0xff]   ;;  %v3576_v63 = vld [vmem:[%s5405_s14 + $0x38] sm:$0xff]  }
 0x3f9   :  { %3422 = vmatpush3.bf16.msra.mxu0 %v2562_v59  ;;  %3461 = vmatpush3.bf16.msra.mxu1 %v2562_v59  ;;  %v3792_v49 = vpop.eup %3791  ;;  %v2530_v52 = vadd.f32 0.5, %v2514_v11  ;;  %v2512_v28 = vmul.f32 0.5, %v3790_v40  ;;  %v2587_v59 = vpop.permute.xlu0 %2586 }
 0x3fa   :  { %3423 = vmatprep.subr.bf16.mxu0 %v2561_v37  ;;  %3454 = vmatprep.subr.bf16.mxu1 %v2561_v37  ;;  %v3794_v14 = vpop.eup %3793  ;;  %v2559_v36 = vpack.c.bf16 %v2532_v46, %v2531_v13  ;;  %v2529_v9 = vadd.f32 0.5, %v2513_v57  ;;  %v2511_v12 = vmul.f32 0.5, %v3792_v49 }
 0x3fb   :  { %v3796_v7 = vpop.eup %3795  ;;  %v2510_v18 = vmul.f32 0.5, %v3794_v14  ;;  %v2528_v50 = vadd.f32 0.5, %v2512_v28 }
 0x3fc   :  { %v2558_v5 = vpack.c.bf16 %v2530_v52, %v2529_v9  ;;  %v3798_v25 = vpop.eup %3797  ;;  %v2509_v33 = vmul.f32 0.5, %v3796_v7  ;;  %v2527_v3 = vadd.f32 0.5, %v2511_v12 }
 0x3fd   :  { %3424 = vmatpush3.bf16.msra.mxu0 %v2561_v37  ;;  %3462 = vmatpush3.bf16.msra.mxu1 %v2561_v37  ;;  %v3800_v34 = vpop.eup %3799  ;;  %v2526_v10 = vadd.f32 0.5, %v2510_v18  ;;  %v2508_v2 = vmul.f32 0.5, %v3798_v25  ;;  %v2597_v62 = vpop.permute.xlu0 %2596 }
 0x3fe   :  { %3425 = vmatprep.subr.bf16.mxu0 %v2560_v55  ;;  %3455 = vmatprep.subr.bf16.mxu1 %v2560_v55  ;;  %v2557_v54 = vpack.c.bf16 %v2528_v50, %v2527_v3  ;;  %v2525_v23 = vadd.f32 0.5, %v2509_v33  ;;  %v2507_v1 = vmul.f32 0.5, %v3800_v34 }
 0x3ff   :  { %v2524_v4 = vadd.f32 0.5, %v2508_v2 }
 0x400   :  { %v2556_v19 = vpack.c.bf16 %v2526_v10, %v2525_v23  ;;  %v2523_v47 = vadd.f32 0.5, %v2507_v1 }
 0x401   :  { %3426 = vmatpush3.bf16.msra.mxu0 %v2560_v55  ;;  %3463 = vmatpush3.bf16.msra.mxu1 %v2560_v55  ;;  %v2607_v17 = vpop.permute.xlu0 %2606 }
 0x402   :  { %3427 = vmatprep.subr.bf16.mxu0 %v2559_v36  ;;  %3456 = vmatprep.subr.bf16.mxu1 %v2559_v36  ;;  %v2555_v41 = vpack.c.bf16 %v2524_v4, %v2523_v47 }
 0x405   :  { %3428 = vmatpush3.bf16.msra.mxu0 %v2559_v36  ;;  %3464 = vmatpush3.bf16.msra.mxu1 %v2559_v36  ;;  %v2617_v43 = vpop.permute.xlu0 %2616 }
 0x406   :  { %3429 = vmatprep.subr.bf16.mxu0 %v2558_v5  ;;  %3457 = vmatprep.subr.bf16.mxu1 %v2558_v5 }
 0x409   :  { %3430 = vmatpush3.bf16.msra.mxu0 %v2558_v5  ;;  %3465 = vmatpush3.bf16.msra.mxu1 %v2558_v5  ;;  %v2627_v37 = vpop.permute.xlu0 %2626 }
 0x40a   :  { %3431 = vmatprep.subr.bf16.mxu0 %v2557_v54  ;;  %3458 = vmatprep.subr.bf16.mxu1 %v2557_v54 }
 0x40d   :  { %3432 = vmatpush3.bf16.msra.mxu0 %v2557_v54  ;;  %3466 = vmatpush3.bf16.msra.mxu1 %v2557_v54  ;;  %v2637_v60 = vpop.permute.xlu0 %2636 }
 0x40e   :  { %3433 = vmatprep.subr.bf16.mxu0 %v2556_v19  ;;  %3459 = vmatprep.subr.bf16.mxu1 %v2556_v19 }
 0x411   :  { %3434 = vmatpush3.bf16.msra.mxu0 %v2556_v19  ;;  %3467 = vmatpush3.bf16.msra.mxu1 %v2556_v19  ;;  %v5360_v8 = vpop.permute.xlu0 %2886 }
 0x412   :  { %3435 = vmatprep.subr.bf16.mxu0 %v2555_v41  ;;  %3460 = vmatprep.subr.bf16.mxu1 %v2555_v41 }
 0x415   :  { %3436 = vmatpush3.bf16.msra.mxu0 %v2555_v41  ;;  %3468 = vmatpush3.bf16.msra.mxu1 %v2555_v41  ;;  %v2647_v5 = vpop.permute.xlu0 %2646 }
 0x418   :  { %3438 = vmatmul.mubr.bf16.vlgmr.msra.gmra.mxu0 %v3571_v29  ;;  %3442 = vmatmul.mubr.bf16.vlgmr.msra.gmra.mxu1 %v3572_v51 }
 0x419   :  { %3445 = vmatprep.mubr.bf16.mxu1 %v3573_v48  ;;  %v2652_v54 = vpop.permute.xlu0 %2651 }
 0x420   :  { %3446 = vmatmul.mubr.bf16.gmra.mxu1 %v3574_v44 }
 0x421   :  { %3449 = vmatprep.mubr.bf16.mxu1 %v3575_v22 }
 0x428   :  { %3450 = vmatmul.mubr.bf16.gmra.mxu1 %v3576_v63  ;;  %v2657_v63 = vpop.permute.xlu0 %2656 }
 0x4d8   :  { %v3439_v58 = vpop.f32.mrf.mxu0  ;;  %v3443_v0 = vpop.f32.mrf.mxu1 }
 0x4d9   :  { %v2750_v11 = vadd.f32 %v3439_v58, %v5250_v42  ;;  %v2766_v36 = vadd.f32 %v3443_v0, %v5258_v27 }
 0x4da   :  { %v2741_v46 = vpop.f32.mrf.mxu0  ;;  %v2757_v55 = vpop.f32.mrf.mxu1 }
 0x4db   :  { %v2806_v40 = vmul.f32 0.5, %v2750_v11  ;;  %v2742_v57 = vadd.f32 %v2741_v46, %v5246_v21  ;;  %v2758_v13 = vadd.f32 %v2757_v55, %v5254_v15  ;;  %v2810_v3 = vmul.f32 0.5, %v2766_v36 }
 0x4dc   :  { %v3440_v49 = vpop.f32.mrf.mxu0  ;;  %v3444_v14 = vpop.f32.mrf.mxu1 }
 0x4dd   :  { %v2804_v52 = vmul.f32 0.5, %v2742_v57  ;;  %v2753_v28 = vadd.f32 %v3440_v49, %v2597_v62  ;;  %3801 = vtanh.f32 %v2806_v40  ;;  %v2808_v7 = vmul.f32 0.5, %v2758_v13  ;;  %v2912_v49 = vpop.permute.xlu0 %2911 }
 0x4de   :  { %v2744_v9 = vpop.f32.mrf.mxu0  ;;  %v2760_v12 = vpop.f32.mrf.mxu1  ;;  %v2769_v25 = vadd.f32 %v3444_v14, %v2617_v43 }
 0x4df   :  { %3803 = vtanh.f32 %v2804_v52  ;;  %v2807_v18 = vmul.f32 0.5, %v2753_v28  ;;  %v2745_v42 = vadd.f32 %v2744_v9, %v2587_v59  ;;  %v2761_v50 = vadd.f32 %v2760_v12, %v2607_v17 }
 0x4e0   :  { %v3447_v33 = vpop.f32.mrf.mxu1  ;;  %v2811_v27 = vmul.f32 0.5, %v2769_v25 }
 0x4e1   :  { %3805 = vtanh.f32 %v2807_v18  ;;  %v2805_v21 = vmul.f32 0.5, %v2745_v42  ;;  %v2809_v15 = vmul.f32 0.5, %v2761_v50  ;;  %v2782_v1 = vadd.f32 %v3447_v33, %v5272_v56 }
 0x4e2   :  { %3807 = vtanh.f32 %v2808_v7  ;;  %v2773_v34 = vpop.f32.mrf.mxu1 }
 0x4e3   :  { %3809 = vtanh.f32 %v2805_v21  ;;  %v2774_v10 = vadd.f32 %v2773_v34, %v5262_v35  ;;  %v2814_v44 = vmul.f32 0.5, %v2782_v1 }
 0x4e4   :  { %v3448_v2 = vpop.f32.mrf.mxu1  ;;  %3811 = vtanh.f32 %v2809_v15 }
 0x4e5   :  { %3813 = vtanh.f32 %v2810_v3  ;;  %v2812_v4 = vmul.f32 0.5, %v2774_v10  ;;  %v2785_v41 = vadd.f32 %v3448_v2, %v2637_v60  ;;  %v2922_v10 = vpop.permute.xlu0 %2921 }
 0x4e6   :  { %v2776_v23 = vpop.f32.mrf.mxu1  ;;  %3815 = vtanh.f32 %v2811_v27 }
 0x4e7   :  { %v2777_v19 = vadd.f32 %v2776_v23, %v2627_v37  ;;  %3817 = vtanh.f32 %v2812_v4  ;;  %v2815_v17 = vmul.f32 0.5, %v2785_v41 }
 0x4e8   :  { %v3451_v47 = vpop.f32.mrf.mxu1 }
 0x4e9   :  { %v2813_v29 = vmul.f32 0.5, %v2777_v19  ;;  %v2798_v58 = vadd.f32 %v3451_v47, %v2652_v54 }
 0x4ea   :  { %v2789_v51 = vpop.f32.mrf.mxu1  ;;  %v3802_v48 = vpop.eup %3801 }
 0x4eb   :  { %v2790_v35 = vadd.f32 %v2789_v51, %v5275_v45  ;;  %3819 = vtanh.f32 %v2813_v29  ;;  %v2838_v56 = vmul.f32 0.5, %v3802_v48  ;;  %v2818_v52 = vmul.f32 0.5, %v2798_v58 }
 0x4ec   :  { %v3804_v22 = vpop.eup %3803  ;;  %v3452_v59 = vpop.f32.mrf.mxu1  ;;  %3821 = vtanh.f32 %v2814_v44 }
 0x4ed   :  { %v2836_v62 = vmul.f32 0.5, %v3804_v22  ;;  %v2816_v60 = vmul.f32 0.5, %v2790_v35  ;;  %v2801_v55 = vadd.f32 %v3452_v59, %v2657_v63  ;;  %3823 = vtanh.f32 %v2815_v17  ;;  %v2932_v44 = vpop.permute.xlu0 %2931 }
 0x4ee   :  { %v3806_v43 = vpop.eup %3805  ;;  %v2792_v37 = vpop.f32.mrf.mxu1  ;;  %v2854_v14 = vadd.f32 0.5, %v2838_v56 }
 0x4ef   :  { %v3808_v0 = vpop.eup %3807  ;;  %v2852_v46 = vadd.f32 0.5, %v2836_v62  ;;  %v2839_v40 = vmul.f32 0.5, %v3806_v43  ;;  %v2793_v45 = vadd.f32 %v2792_v37, %v2647_v5  ;;  %3825 = vtanh.f32 %v2816_v60 }
 0x4f0   :  { %v3810_v11 = vpop.eup %3809  ;;  %v2840_v36 = vmul.f32 0.5, %v3808_v0  ;;  %v2819_v18 = vmul.f32 0.5, %v2801_v55  ;;  %v2966_v5 = vmul.f32 %v5283_v20, %v2854_v14 }
 0x4f1   :  { %v2837_v57 = vmul.f32 0.5, %v3810_v11  ;;  %v3812_v13 = vpop.eup %3811  ;;  %v2817_v9 = vmul.f32 0.5, %v2793_v45  ;;  %v2964_v12 = vmul.f32 %v5360_v8, %v2852_v46  ;;  %v2855_v50 = vadd.f32 0.5, %v2839_v40  ;;  %v2942_v46 = vpop.permute.xlu0 %2941 }
 0x4f2   :  { %v3814_v28 = vpop.eup %3813  ;;  %v2841_v33 = vmul.f32 0.5, %v3812_v13  ;;  %v2856_v15 = vadd.f32 0.5, %v2840_v36 }
 0x4f3   :  { %v2853_v7 = vadd.f32 0.5, %v2837_v57  ;;  %v3816_v42 = vpop.eup %3815  ;;  %3827 = vtanh.f32 %v2817_v9  ;;  %v2842_v21 = vmul.f32 0.5, %v3814_v28  ;;  %v2967_v2 = vmul.f32 %v5287_v39, %v2855_v50 }
 0x4f4   :  { %3829 = vtanh.f32 %v2818_v52  ;;  %v3818_v34 = vpop.eup %3817  ;;  %v2843_v27 = vmul.f32 0.5, %v3816_v42  ;;  %v2857_v8 = vadd.f32 0.5, %v2841_v33 }
 0x4f5   :  { %v2965_v25 = vmul.f32 %v5279_v38, %v2853_v7  ;;  %3831 = vtanh.f32 %v2819_v18  ;;  %v2858_v1 = vadd.f32 0.5, %v2842_v21  ;;  %v2968_v38 = vmul.f32 %v5292_v16, %v2856_v15 }
 0x4f6   :  { %v2844_v19 = vmul.f32 0.5, %v3818_v34  ;;  %v2859_v41 = vadd.f32 0.5, %v2843_v27  ;;  %v2969_v20 = vmul.f32 %v2912_v49, %v2857_v8 }
 0x4f7   :  { %v2980_v3 = vadd.f32 %v2965_v25, %v2964_v12  ;;  %v2970_v35 = vmul.f32 %v5296_v24, %v2858_v1  ;;  %v2952_v12 = vpop.permute.xlu0 %2951 }
 0x4f8   :  { %v3820_v23 = vpop.eup %3819  ;;  %v2860_v63 = vadd.f32 0.5, %v2844_v19  ;;  %v2971_v62 = vmul.f32 %v2922_v10, %v2859_v41 }
 0x4f9   :  { %v2981_v54 = vadd.f32 %v2980_v3, %v2966_v5  ;;  %v3822_v47 = vpop.eup %3821  ;;  %v2845_v51 = vmul.f32 0.5, %v3820_v23 }
 0x4fa   :  { %v3824_v48 = vpop.eup %3823  ;;  %v2846_v39 = vmul.f32 0.5, %v3822_v47  ;;  %v2972_v37 = vmul.f32 %v5300_v6, %v2860_v63  ;;  %v1898_v6 = vrot.slane %v5321_v26, 4  ;;  %v1908_v47 = vpop.permute.xlu1 %1907 }
 0x4fb   :  { %v2982_v4 = vadd.f32 %v2981_v54, %v2967_v2  ;;  %v2847_v43 = vmul.f32 0.5, %v3824_v48  ;;  %v2861_v56 = vadd.f32 0.5, %v2845_v51  ;;  %v2962_v3 = vpop.permute.xlu0 %2961  ;;  %v3833_v48 = vld [vmem:[%s5474_s13] sm:$0x1] }
 0x4fc   :  { %v3826_v59 = vpop.eup %3825  ;;  %v2862_v58 = vadd.f32 0.5, %v2846_v39  ;;  %v1899_v15 = vadd.f32 %v1898_v6, %v5321_v26  ;;  %v1913_v26 = vrot.slane %v1908_v47, %v1912_v32 }
 0x4fd   :  { %v2983_v29 = vadd.f32 %v2982_v4, %v2968_v38  ;;  %v2848_v60 = vmul.f32 0.5, %v3826_v59  ;;  %v2863_v40 = vadd.f32 0.5, %v2847_v43  ;;  %v2973_v57 = vmul.f32 %v2932_v44, %v2861_v56 }
 0x4fe   :  { %v2974_v13 = vmul.f32 %v5308_v30, %v2862_v58  ;;  %v1900_v2 = vrot.slane %v1899_v15, 2 }
 0x4ff   :  { %v2984_v22 = vadd.f32 %v2983_v29, %v2969_v20  ;;  %v2864_v52 = vadd.f32 0.5, %v2848_v60  ;;  %v2975_v28 = vmul.f32 %v2942_v46, %v2863_v40  ;;  %v3005_v4 = vpop.permute.xlu0 %3004 }
 0x500   :  { %v3828_v16 = vpop.eup %3827  ;;  %v1901_v8 = vadd.f32 %v1900_v2, %v1899_v15 }
 0x501   :  { %v2985_v17 = vadd.f32 %v2984_v22, %v2970_v35  ;;  %v3830_v11 = vpop.eup %3829  ;;  %v2849_v24 = vmul.f32 0.5, %v3828_v16  ;;  %v2976_v42 = vmul.f32 %v5315_v53, %v2864_v52 }
 0x502   :  { %v3832_v45 = vpop.eup %3831  ;;  %v2850_v14 = vmul.f32 0.5, %v3830_v11  ;;  %v1902_v38 = vrot.slane %v1901_v8, 1 }
 0x503   :  { %v2986_v0 = vadd.f32 %v2985_v17, %v2971_v62  ;;  %v2851_v7 = vmul.f32 0.5, %v3832_v45  ;;  %v2865_v9 = vadd.f32 0.5, %v2849_v24 }
 0x504   :  { %v2866_v18 = vadd.f32 0.5, %v2850_v14  ;;  %v1903_v41 = vadd.f32 %v1902_v38, %v1901_v8 }
 0x505   :  { %v2987_v55 = vadd.f32 %v2986_v0, %v2972_v37  ;;  %v2867_v33 = vadd.f32 0.5, %v2851_v7  ;;  %v2977_v21 = vmul.f32 %v2952_v12, %v2865_v9 }
 0x506   :  { %v2978_v5 = vmul.f32 %v5318_v61, %v2866_v18  ;;  %v3010_v61 = vrot.slane %v3005_v4, %v1912_v32  ;;  %v1914_v51 = vadd.f32 %v1913_v26, %v1903_v41 }
 0x507   :  { %v2988_v49 = vadd.f32 %v2987_v55, %v2973_v57  ;;  %v2979_v34 = vmul.f32 %v2962_v3, %v2867_v33 }
 0x509   :  { %v2989_v36 = vadd.f32 %v2988_v49, %v2974_v13 }
 0x50b   :  { %v2990_v50 = vadd.f32 %v2989_v36, %v2975_v28 }
 0x50d   :  { %v2991_v25 = vadd.f32 %v2990_v50, %v2976_v42 }
 0x50f   :  { %v2992_v30 = vadd.f32 %v2991_v25, %v2977_v21 }
 0x511   :  { %v2993_v10 = vadd.f32 %v2992_v30, %v2978_v5 }
 0x513   :  { %v2994_v27 = vadd.f32 %v2993_v10, %v2979_v34 }
 0x515   :  { %v2995_v54 = vrot.slane %v2994_v27, 4 }
 0x517   :  { %v2996_v23 = vadd.f32 %v2995_v54, %v2994_v27 }
 0x519   :  { %v2997_v1 = vrot.slane %v2996_v23, 2 }
 0x51b   :  { %v2998_v53 = vadd.f32 %v2997_v1, %v2996_v23 }
 0x51d   :  { %v2999_v19 = vrot.slane %v2998_v53, 1 }
 0x51f   :  { %v3000_v20 = vadd.f32 %v2999_v19, %v2998_v53 }
 0x521   :  { %v3011_v29 = vadd.f32 %v3010_v61, %v3000_v20 }
 0x523   :  { %v3012_v44 = vadd.f32 %v3833_v48, %v3011_v29 }
 0x525   :  { %v3013_v35 = vsub.f32 %v1914_v51, %v3012_v44 }
 0x527   :  { %v3014_v22 = vmul.f32 0.5, %v3013_v35 }
 0x529   :  { %v3015_v39 = vmul.f32 %v3014_v22, %v3013_v35 }
 0x52b   :  { %3016 = vst [vmem:[#allocation4] sm:$0x1] %v3015_v39 }
 0x52c   :  { %3846 = shalt.err (!%p3843_p4)
}
 0x52d   :  { %3026 = dma.vmem_to_hbm [thread:$0]  %s3024_s6, 16, %s5408_s18, [#allocation5]  }
 0x52e   :  { %3855 = dma.done.wait [#allocation5], 16  }
 0x52f   :  { %3856 = vsyncadd [#allocation5], 4294967280 }
 0x530   :  { %3030 = vsyncpa [#allocation5], 1 }

</bundles_post_ra>
